<compile_context>
chip_gen: v5e
topology: v5e:2x2
jax: 0.10.0
libtpu: 0.0.40
codegen_flags: <defaults>
</compile_context>

<pallas_src>
import jax
import jax.numpy as jnp
from jax.experimental import pallas as pl
from jax.experimental.pallas import tpu as pltpu

# ----------------------------- model config (small) -----------------------------
INPUT_DIM = 1
SEQ_LEN = 8
PRED_LEN = 4
HIDDEN_DIM = 32      # gate width 4*H = 128 = one full lane tile
NUM_LAYERS = 2
BATCH = 2

H = HIDDEN_DIM
G = 4 * H            # 128
OUT_W = 128          # lane-dense output width (first PRED_LEN lanes valid)

# packed-parameter slab layout (all offsets static, rows multiple of 8):
ROW_WFUSED = 0                 # rows [0, 2H)    : W_fused (2H, 2G)
ROW_VEC0 = 2 * H               # row 64          : [wfold | bfold]
ROW_VEC1 = 2 * H + 1           # row 65          : [b2    | bout ]
ROW_WOUT = 72                  # rows [72, 72+H) : [wout  | 0    ]
SLAB_ROWS = ROW_WOUT + H       # 104

_HIGHEST = jax.lax.Precision.HIGHEST


# ----------------------------- Pallas kernel -----------------------------
def _lstm_forecaster_kernel(x_ref, slab_ref, out_ref):
    """x_ref: (S, B, 1) f32 | slab_ref: (SLAB_ROWS, 2G) f32 | out_ref: (B, OUT_W) f32."""
    S, B, _ = x_ref.shape

    # Static slices of the packed slab (brought in by ONE DMA).
    w_fused = slab_ref[ROW_WFUSED:ROW_WFUSED + 2 * H, :]        # (2H, 2G)
    wfold = slab_ref[ROW_VEC0:ROW_VEC0 + 1, 0:G]                # (1, G)
    bfold = slab_ref[ROW_VEC0:ROW_VEC0 + 1, G:2 * G]            # (1, G)
    b2 = slab_ref[ROW_VEC1:ROW_VEC1 + 1, 0:G]                   # (1, G)
    bout = slab_ref[ROW_VEC1:ROW_VEC1 + 1, G:2 * G]             # (1, OUT_W)
    wout = slab_ref[ROW_WOUT:ROW_WOUT + H, 0:OUT_W]             # (H, OUT_W)

    # Layer-1 input-gate contributions for ALL timesteps, outside the recurrence.
    # INPUT_DIM == 1 -> pure VPU broadcast multiply. Pre-scaled + bias-folded.
    x = x_ref[...]
    xg1 = x * wfold + bfold                                     # (S, B, G)

    # Hoisted out of the unrolled loop (JAX does not CSE broadcast_in_dim).
    b2b = jnp.broadcast_to(b2, (B, G))

    h1g = jnp.zeros((B, G), jnp.float32)    # h1[t-1] @ W_hh1 (scaled); h1[-1] == 0
    h2 = jnp.zeros((B, H), jnp.float32)
    c1 = jnp.zeros((B, H), jnp.float32)
    c2 = jnp.zeros((B, H), jnp.float32)

    # Fully unrolled recurrence (S static). PyTorch gate order: i, f, g, o.
    # Activation trick: i/f/o lanes' pre-activations were pre-scaled by 0.5, so one
    # tanh per cell gives tanh(g) on g lanes and sigmoid = 0.5*t + 0.5 on i/f/o lanes.
    for t in range(S):
        # ---- layer-1 cell, step t (no matmul left on this part of the chain) ----
        t1 = jnp.tanh(h1g + xg1[t])
        sg1 = 0.5 * t1 + 0.5
        c1 = sg1[:, H:2 * H] * c1 + sg1[:, 0:H] * t1[:, 2 * H:3 * H]
        h1 = sg1[:, 3 * H:4 * H] * jnp.tanh(c1)

        # TODO(synk): nn.LSTM inter-layer dropout is train-mode only; inference = identity.

        # ---- ONE fused, skewed MXU pass: [h1[t] | h2[t-1]] @ W_fused ----
        #   lanes [0, G)  -> h1[t] @ W_hh1  (layer-1 recurrent term for step t+1)
        #   lanes [G, 2G) -> layer-2 gate pre-activations for step t
        fused = jnp.dot(jnp.concatenate([h1, h2], axis=1), w_fused,
                        preferred_element_type=jnp.float32, precision=_HIGHEST)
        h1g = fused[:, 0:G]

        # ---- layer-2 cell, step t ----
        t2 = jnp.tanh(fused[:, G:2 * G] + b2b)
        sg2 = 0.5 * t2 + 0.5
        c2 = sg2[:, H:2 * H] * c2 + sg2[:, 0:H] * t2[:, 2 * H:3 * H]
        h2 = sg2[:, 3 * H:4 * H] * jnp.tanh(c2)

    # Output projection on the last top-layer hidden state; lane-dense (B, 128).
    out_ref[...] = (
        jnp.dot(h2, wout, preferred_element_type=jnp.float32, precision=_HIGHEST)
        + bout
    ).astype(out_ref.dtype)


# ----------------------------- one-time parameter packing -----------------------------
def pack_params(p):
    """Fold + pre-scale + pack all parameters into one (SLAB_ROWS, 2G) f32 slab.

    Called ONCE at parameter-load time (outside the jitted forward):
      * embedding folded into the layer-1 input projection,
      * layer-1/2 gate matmuls fused into one skewed (2H, 2G) weight,
      * i/f/o gate columns pre-scaled by 0.5 for the single-tanh activation trick,
      * output projection zero-padded to a lane-dense 128-wide block.
    """
    assert INPUT_DIM == 1 and 4 * HIDDEN_DIM == 128

    mm = lambda a, b: jnp.matmul(a, b, precision=_HIGHEST)

    # gate scale: 0.5 for i, f, o (sigmoid via tanh identity), 1.0 for g (tanh)
    s = jnp.concatenate([jnp.full((1, H), 0.5, jnp.float32),
                         jnp.full((1, H), 0.5, jnp.float32),
                         jnp.full((1, H), 1.0, jnp.float32),
                         jnp.full((1, H), 0.5, jnp.float32)], axis=1)          # (1, G)

    # emb(x) @ W_ih1 + b1  ==  x @ (W_emb @ W_ih1) + (b_emb @ W_ih1 + b1)
    wfold = mm(p["w_emb_t"], p["w_ih1_t"]) * s                                 # (1, G)
    bfold = (mm(p["b_emb"], p["w_ih1_t"]) + p["b1"]) * s                       # (1, G)

    # [h1[t] | h2[t-1]] @ [[W_hh1, W_ih2], [0, W_hh2]]
    w_fused = jnp.concatenate(
        [jnp.concatenate([p["w_hh1_t"], p["w_ih2_t"]], axis=1),
         jnp.concatenate([jnp.zeros((H, G), jnp.float32), p["w_hh2_t"]], axis=1)],
        axis=0) * jnp.concatenate([s, s], axis=1)                              # (2H, 2G)

    b2 = p["b2"] * s                                                           # (1, G)
    wout = jnp.zeros((H, OUT_W), jnp.float32).at[:, :PRED_LEN].set(p["w_out_t"])
    bout = jnp.zeros((1, OUT_W), jnp.float32).at[:, :PRED_LEN].set(p["b_out"])

    slab = jnp.zeros((SLAB_ROWS, 2 * G), jnp.float32)
    slab = slab.at[ROW_WFUSED:ROW_WFUSED + 2 * H, :].set(w_fused)
    slab = slab.at[ROW_VEC0, 0:G].set(wfold[0])
    slab = slab.at[ROW_VEC0, G:2 * G].set(bfold[0])
    slab = slab.at[ROW_VEC1, 0:G].set(b2[0])
    slab = slab.at[ROW_VEC1, G:2 * G].set(bout[0])
    slab = slab.at[ROW_WOUT:ROW_WOUT + H, 0:OUT_W].set(wout)
    return slab


# ----------------------------- forward wrapper -----------------------------
@jax.jit
def lstm_forecaster_forward(x, slab):
    """x: (B, SEQ_LEN*INPUT_DIM) f32, slab: packed params -> (B, PRED_LEN) f32."""
    B = x.shape[0]
    B_pad = max(8, ((B + 7) // 8) * 8)                  # fill sublanes

    x_bsi = x.reshape(B, SEQ_LEN, INPUT_DIM)
    if B_pad != B:
        x_bsi = jnp.pad(x_bsi, ((0, B_pad - B), (0, 0), (0, 0)))
    x_sbi = x_bsi.transpose(1, 0, 2)                    # time-major (S, B_pad, I)

    vmem = pl.BlockSpec(memory_space=pltpu.MemorySpace.VMEM)
    out = pl.pallas_call(
        _lstm_forecaster_kernel,
        out_shape=jax.ShapeDtypeStruct((B_pad, OUT_W), jnp.float32),
        in_specs=[vmem, vmem],
        out_specs=vmem,
    )(x_sbi, slab)
    # NOTE: for large batched inference (esp. v7x 2-TC), add a leading batch grid
    # axis with dimension_semantics=("parallel",); pointless at B_pad == 8.
    return out[:B, :PRED_LEN]


# ----------------------------- deterministic params -----------------------------
def init_params(key):
    Hd, I, P = HIDDEN_DIM, INPUT_DIM, PRED_LEN
    keys = jax.random.split(key, 12)
    s = 1.0 / jnp.sqrt(jnp.float32(Hd))

    def u(k, shape):
        return jax.random.uniform(k, shape, jnp.float32, -s, s)

    # Stored pre-transposed: (in_features, out_features); LSTM gate order i,f,g,o.
    return {
        "w_emb_t": u(keys[0], (I, Hd)),
        "b_emb":   u(keys[1], (1, Hd)),
        "w_ih1_t": u(keys[2], (Hd, 4 * Hd)),
        "w_hh1_t": u(keys[3], (Hd, 4 * Hd)),
        "b1":      u(keys[4], (1, 4 * Hd)) + u(keys[5], (1, 4 * Hd)),   # b_ih + b_hh
        "w_ih2_t": u(keys[6], (Hd, 4 * Hd)),
        "w_hh2_t": u(keys[7], (Hd, 4 * Hd)),
        "b2":      u(keys[8], (1, 4 * Hd)) + u(keys[9], (1, 4 * Hd)),
        "w_out_t": u(keys[10], (Hd, P)),
        "b_out":   u(keys[11], (1, P)),
    }


# ----------------------------- pure-JAX reference -----------------------------
def reference_forward(x, p):
    B = x.shape[0]
    mm = lambda a, b: jnp.matmul(a, b, precision=_HIGHEST)
    xs = x.reshape(B, SEQ_LEN, INPUT_DIM)
    emb = mm(xs, p["w_emb_t"]) + p["b_emb"]             # (B, S, H)

    def cell(e, h, c, wih, whh, b):
        g = mm(e, wih) + mm(h, whh) + b
        i = jax.nn.sigmoid(g[:, :H])
        f = jax.nn.sigmoid(g[:, H:2 * H])
        gg = jnp.tanh(g[:, 2 * H:3 * H])
        o = jax.nn.sigmoid(g[:, 3 * H:])
        c = f * c + i * gg
        return o * jnp.tanh(c), c

    h1 = c1 = h2 = c2 = jnp.zeros((B, H), jnp.float32)
    for t in range(SEQ_LEN):
        h1, c1 = cell(emb[:, t, :], h1, c1, p["w_ih1_t"], p["w_hh1_t"], p["b1"])
        h2, c2 = cell(h1, h2, c2, p["w_ih2_t"], p["w_hh2_t"], p["b2"])
    return mm(h2, p["w_out_t"]) + p["b_out"]


# ----------------------------- main -----------------------------
if __name__ == "__main__":
    key = jax.random.PRNGKey(0)
    k_params, k_x = jax.random.split(key)

    params = init_params(k_params)
    slab = pack_params(params)          # one-time fold/pack, OUTSIDE the jitted forward
    x = jax.random.normal(k_x, (BATCH, SEQ_LEN * INPUT_DIM), jnp.float32)

    out = lstm_forecaster_forward(x, slab)
    out = jax.block_until_ready(out)

    ref = reference_forward(x, params)
    assert out.shape == (BATCH, PRED_LEN), out.shape
    assert jnp.allclose(out, ref, atol=2e-4, rtol=2e-4), (out, ref)

    print("KERNEL_OK")
</pallas_src>

<mosaic_0001>
module attributes {stable_mosaic.version = 11 : i64} {
  func.func @_lstm_forecaster_kernel(%arg0: memref<8x8x1xf32, #tpu.memory_space<vmem>>, %arg1: memref<104x256xf32, #tpu.memory_space<vmem>>, %arg2: memref<8x128xf32, #tpu.memory_space<vmem>>) attributes {dimension_semantics = [], scalar_prefetch = 0 : i64, scratch_operands = 0 : i64, tpu.core_type = #tpu.core_type<tc>} {
    %c0 = arith.constant 0 : index
    %c0_0 = arith.constant 0 : index
    %0 = vector.load %arg1[%c0, %c0_0] : memref<104x256xf32, #tpu.memory_space<vmem>>, vector<64x256xf32>
    %c64 = arith.constant 64 : index
    %c0_1 = arith.constant 0 : index
    %1 = vector.load %arg1[%c64, %c0_1] : memref<104x256xf32, #tpu.memory_space<vmem>>, vector<1x128xf32>
    %c64_2 = arith.constant 64 : index
    %c128 = arith.constant 128 : index
    %2 = vector.load %arg1[%c64_2, %c128] : memref<104x256xf32, #tpu.memory_space<vmem>>, vector<1x128xf32>
    %c65 = arith.constant 65 : index
    %c0_3 = arith.constant 0 : index
    %3 = vector.load %arg1[%c65, %c0_3] : memref<104x256xf32, #tpu.memory_space<vmem>>, vector<1x128xf32>
    %c65_4 = arith.constant 65 : index
    %c128_5 = arith.constant 128 : index
    %4 = vector.load %arg1[%c65_4, %c128_5] : memref<104x256xf32, #tpu.memory_space<vmem>>, vector<1x128xf32>
    %c72 = arith.constant 72 : index
    %c0_6 = arith.constant 0 : index
    %5 = vector.load %arg1[%c72, %c0_6] : memref<104x256xf32, #tpu.memory_space<vmem>>, vector<32x128xf32>
    %c0_7 = arith.constant 0 : index
    %c0_8 = arith.constant 0 : index
    %c0_9 = arith.constant 0 : index
    %6 = vector.load %arg0[%c0_7, %c0_8, %c0_9] : memref<8x8x1xf32, #tpu.memory_space<vmem>>, vector<8x8x1xf32>
    %7 = vector.shape_cast %1 : vector<1x128xf32> to vector<1x1x128xf32>
    %8 = vector.broadcast %6 : vector<8x8x1xf32> to vector<8x8x128xf32>
    %9 = vector.broadcast %7 : vector<1x1x128xf32> to vector<8x8x128xf32>
    %10 = arith.mulf %8, %9 : vector<8x8x128xf32>
    %11 = vector.shape_cast %2 : vector<1x128xf32> to vector<1x1x128xf32>
    %12 = vector.broadcast %11 : vector<1x1x128xf32> to vector<8x8x128xf32>
    %13 = arith.addf %10, %12 : vector<8x8x128xf32>
    %14 = vector.shape_cast %3 : vector<1x128xf32> to vector<1x128xf32>
    %15 = vector.broadcast %14 : vector<1x128xf32> to vector<8x128xf32>
    %cst = arith.constant 0.000000e+00 : f32
    %16 = vector.broadcast %cst : f32 to vector<8x128xf32>
    %cst_10 = arith.constant 0.000000e+00 : f32
    %17 = vector.broadcast %cst_10 : f32 to vector<8x32xf32>
    %cst_11 = arith.constant 0.000000e+00 : f32
    %18 = vector.broadcast %cst_11 : f32 to vector<8x32xf32>
    %cst_12 = arith.constant 0.000000e+00 : f32
    %19 = vector.broadcast %cst_12 : f32 to vector<8x32xf32>
    %20 = vector.extract_strided_slice %13 {offsets = [0, 0, 0], sizes = [1, 8, 128], strides = [1, 1, 1]} : vector<8x8x128xf32> to vector<1x8x128xf32>
    %21 = vector.shape_cast %20 : vector<1x8x128xf32> to vector<8x128xf32>
    %22 = arith.addf %16, %21 : vector<8x128xf32>
    %23 = math.tanh %22 : vector<8x128xf32>
    %cst_13 = arith.constant 5.000000e-01 : f32
    %24 = vector.broadcast %cst_13 : f32 to vector<8x128xf32>
    %25 = arith.mulf %24, %23 : vector<8x128xf32>
    %cst_14 = arith.constant 5.000000e-01 : f32
    %26 = vector.broadcast %cst_14 : f32 to vector<8x128xf32>
    %27 = arith.addf %25, %26 : vector<8x128xf32>
    %28 = vector.extract_strided_slice %27 {offsets = [0, 32], sizes = [8, 32], strides = [1, 1]} : vector<8x128xf32> to vector<8x32xf32>
    %29 = arith.mulf %28, %18 : vector<8x32xf32>
    %30 = vector.extract_strided_slice %27 {offsets = [0, 0], sizes = [8, 32], strides = [1, 1]} : vector<8x128xf32> to vector<8x32xf32>
    %31 = vector.extract_strided_slice %23 {offsets = [0, 64], sizes = [8, 32], strides = [1, 1]} : vector<8x128xf32> to vector<8x32xf32>
    %32 = arith.mulf %30, %31 : vector<8x32xf32>
    %33 = arith.addf %29, %32 : vector<8x32xf32>
    %34 = vector.extract_strided_slice %27 {offsets = [0, 96], sizes = [8, 32], strides = [1, 1]} : vector<8x128xf32> to vector<8x32xf32>
    %35 = math.tanh %33 : vector<8x32xf32>
    %36 = arith.mulf %34, %35 : vector<8x32xf32>
    %37 = tpu.concatenate %36, %17 in 1 : vector<8x32xf32>, vector<8x32xf32> -> vector<8x64xf32>
    %cst_15 = arith.constant dense<0.000000e+00> : vector<8x256xf32>
    %38 = tpu.matmul %37, %0, %cst_15 {dimension_numbers = #tpu.dot_dimension_numbers<[1], [0], [0], [1], [0, 0, 1, 1], [], []>, precision = #tpu.contract_precision<fp32>} : vector<8x64xf32>, vector<64x256xf32>, vector<8x256xf32> -> vector<8x256xf32>
    %39 = vector.extract_strided_slice %38 {offsets = [0, 0], sizes = [8, 128], strides = [1, 1]} : vector<8x256xf32> to vector<8x128xf32>
    %40 = vector.extract_strided_slice %38 {offsets = [0, 128], sizes = [8, 128], strides = [1, 1]} : vector<8x256xf32> to vector<8x128xf32>
    %41 = arith.addf %40, %15 : vector<8x128xf32>
    %42 = math.tanh %41 : vector<8x128xf32>
    %cst_16 = arith.constant 5.000000e-01 : f32
    %43 = vector.broadcast %cst_16 : f32 to vector<8x128xf32>
    %44 = arith.mulf %43, %42 : vector<8x128xf32>
    %cst_17 = arith.constant 5.000000e-01 : f32
    %45 = vector.broadcast %cst_17 : f32 to vector<8x128xf32>
    %46 = arith.addf %44, %45 : vector<8x128xf32>
    %47 = vector.extract_strided_slice %46 {offsets = [0, 32], sizes = [8, 32], strides = [1, 1]} : vector<8x128xf32> to vector<8x32xf32>
    %48 = arith.mulf %47, %19 : vector<8x32xf32>
    %49 = vector.extract_strided_slice %46 {offsets = [0, 0], sizes = [8, 32], strides = [1, 1]} : vector<8x128xf32> to vector<8x32xf32>
    %50 = vector.extract_strided_slice %42 {offsets = [0, 64], sizes = [8, 32], strides = [1, 1]} : vector<8x128xf32> to vector<8x32xf32>
    %51 = arith.mulf %49, %50 : vector<8x32xf32>
    %52 = arith.addf %48, %51 : vector<8x32xf32>
    %53 = vector.extract_strided_slice %46 {offsets = [0, 96], sizes = [8, 32], strides = [1, 1]} : vector<8x128xf32> to vector<8x32xf32>
    %54 = math.tanh %52 : vector<8x32xf32>
    %55 = arith.mulf %53, %54 : vector<8x32xf32>
    %56 = vector.extract_strided_slice %13 {offsets = [1, 0, 0], sizes = [1, 8, 128], strides = [1, 1, 1]} : vector<8x8x128xf32> to vector<1x8x128xf32>
    %57 = vector.shape_cast %56 : vector<1x8x128xf32> to vector<8x128xf32>
    %58 = arith.addf %39, %57 : vector<8x128xf32>
    %59 = math.tanh %58 : vector<8x128xf32>
    %cst_18 = arith.constant 5.000000e-01 : f32
    %60 = vector.broadcast %cst_18 : f32 to vector<8x128xf32>
    %61 = arith.mulf %60, %59 : vector<8x128xf32>
    %cst_19 = arith.constant 5.000000e-01 : f32
    %62 = vector.broadcast %cst_19 : f32 to vector<8x128xf32>
    %63 = arith.addf %61, %62 : vector<8x128xf32>
    %64 = vector.extract_strided_slice %63 {offsets = [0, 32], sizes = [8, 32], strides = [1, 1]} : vector<8x128xf32> to vector<8x32xf32>
    %65 = arith.mulf %64, %33 : vector<8x32xf32>
    %66 = vector.extract_strided_slice %63 {offsets = [0, 0], sizes = [8, 32], strides = [1, 1]} : vector<8x128xf32> to vector<8x32xf32>
    %67 = vector.extract_strided_slice %59 {offsets = [0, 64], sizes = [8, 32], strides = [1, 1]} : vector<8x128xf32> to vector<8x32xf32>
    %68 = arith.mulf %66, %67 : vector<8x32xf32>
    %69 = arith.addf %65, %68 : vector<8x32xf32>
    %70 = vector.extract_strided_slice %63 {offsets = [0, 96], sizes = [8, 32], strides = [1, 1]} : vector<8x128xf32> to vector<8x32xf32>
    %71 = math.tanh %69 : vector<8x32xf32>
    %72 = arith.mulf %70, %71 : vector<8x32xf32>
    %73 = tpu.concatenate %72, %55 in 1 : vector<8x32xf32>, vector<8x32xf32> -> vector<8x64xf32>
    %cst_20 = arith.constant dense<0.000000e+00> : vector<8x256xf32>
    %74 = tpu.matmul %73, %0, %cst_20 {dimension_numbers = #tpu.dot_dimension_numbers<[1], [0], [0], [1], [0, 0, 1, 1], [], []>, precision = #tpu.contract_precision<fp32>} : vector<8x64xf32>, vector<64x256xf32>, vector<8x256xf32> -> vector<8x256xf32>
    %75 = vector.extract_strided_slice %74 {offsets = [0, 0], sizes = [8, 128], strides = [1, 1]} : vector<8x256xf32> to vector<8x128xf32>
    %76 = vector.extract_strided_slice %74 {offsets = [0, 128], sizes = [8, 128], strides = [1, 1]} : vector<8x256xf32> to vector<8x128xf32>
    %77 = arith.addf %76, %15 : vector<8x128xf32>
    %78 = math.tanh %77 : vector<8x128xf32>
    %cst_21 = arith.constant 5.000000e-01 : f32
    %79 = vector.broadcast %cst_21 : f32 to vector<8x128xf32>
    %80 = arith.mulf %79, %78 : vector<8x128xf32>
    %cst_22 = arith.constant 5.000000e-01 : f32
    %81 = vector.broadcast %cst_22 : f32 to vector<8x128xf32>
    %82 = arith.addf %80, %81 : vector<8x128xf32>
    %83 = vector.extract_strided_slice %82 {offsets = [0, 32], sizes = [8, 32], strides = [1, 1]} : vector<8x128xf32> to vector<8x32xf32>
    %84 = arith.mulf %83, %52 : vector<8x32xf32>
    %85 = vector.extract_strided_slice %82 {offsets = [0, 0], sizes = [8, 32], strides = [1, 1]} : vector<8x128xf32> to vector<8x32xf32>
    %86 = vector.extract_strided_slice %78 {offsets = [0, 64], sizes = [8, 32], strides = [1, 1]} : vector<8x128xf32> to vector<8x32xf32>
    %87 = arith.mulf %85, %86 : vector<8x32xf32>
    %88 = arith.addf %84, %87 : vector<8x32xf32>
    %89 = vector.extract_strided_slice %82 {offsets = [0, 96], sizes = [8, 32], strides = [1, 1]} : vector<8x128xf32> to vector<8x32xf32>
    %90 = math.tanh %88 : vector<8x32xf32>
    %91 = arith.mulf %89, %90 : vector<8x32xf32>
    %92 = vector.extract_strided_slice %13 {offsets = [2, 0, 0], sizes = [1, 8, 128], strides = [1, 1, 1]} : vector<8x8x128xf32> to vector<1x8x128xf32>
    %93 = vector.shape_cast %92 : vector<1x8x128xf32> to vector<8x128xf32>
    %94 = arith.addf %75, %93 : vector<8x128xf32>
    %95 = math.tanh %94 : vector<8x128xf32>
    %cst_23 = arith.constant 5.000000e-01 : f32
    %96 = vector.broadcast %cst_23 : f32 to vector<8x128xf32>
    %97 = arith.mulf %96, %95 : vector<8x128xf32>
    %cst_24 = arith.constant 5.000000e-01 : f32
    %98 = vector.broadcast %cst_24 : f32 to vector<8x128xf32>
    %99 = arith.addf %97, %98 : vector<8x128xf32>
    %100 = vector.extract_strided_slice %99 {offsets = [0, 32], sizes = [8, 32], strides = [1, 1]} : vector<8x128xf32> to vector<8x32xf32>
    %101 = arith.mulf %100, %69 : vector<8x32xf32>
    %102 = vector.extract_strided_slice %99 {offsets = [0, 0], sizes = [8, 32], strides = [1, 1]} : vector<8x128xf32> to vector<8x32xf32>
    %103 = vector.extract_strided_slice %95 {offsets = [0, 64], sizes = [8, 32], strides = [1, 1]} : vector<8x128xf32> to vector<8x32xf32>
    %104 = arith.mulf %102, %103 : vector<8x32xf32>
    %105 = arith.addf %101, %104 : vector<8x32xf32>
    %106 = vector.extract_strided_slice %99 {offsets = [0, 96], sizes = [8, 32], strides = [1, 1]} : vector<8x128xf32> to vector<8x32xf32>
    %107 = math.tanh %105 : vector<8x32xf32>
    %108 = arith.mulf %106, %107 : vector<8x32xf32>
    %109 = tpu.concatenate %108, %91 in 1 : vector<8x32xf32>, vector<8x32xf32> -> vector<8x64xf32>
    %cst_25 = arith.constant dense<0.000000e+00> : vector<8x256xf32>
    %110 = tpu.matmul %109, %0, %cst_25 {dimension_numbers = #tpu.dot_dimension_numbers<[1], [0], [0], [1], [0, 0, 1, 1], [], []>, precision = #tpu.contract_precision<fp32>} : vector<8x64xf32>, vector<64x256xf32>, vector<8x256xf32> -> vector<8x256xf32>
    %111 = vector.extract_strided_slice %110 {offsets = [0, 0], sizes = [8, 128], strides = [1, 1]} : vector<8x256xf32> to vector<8x128xf32>
    %112 = vector.extract_strided_slice %110 {offsets = [0, 128], sizes = [8, 128], strides = [1, 1]} : vector<8x256xf32> to vector<8x128xf32>
    %113 = arith.addf %112, %15 : vector<8x128xf32>
    %114 = math.tanh %113 : vector<8x128xf32>
    %cst_26 = arith.constant 5.000000e-01 : f32
    %115 = vector.broadcast %cst_26 : f32 to vector<8x128xf32>
    %116 = arith.mulf %115, %114 : vector<8x128xf32>
    %cst_27 = arith.constant 5.000000e-01 : f32
    %117 = vector.broadcast %cst_27 : f32 to vector<8x128xf32>
    %118 = arith.addf %116, %117 : vector<8x128xf32>
    %119 = vector.extract_strided_slice %118 {offsets = [0, 32], sizes = [8, 32], strides = [1, 1]} : vector<8x128xf32> to vector<8x32xf32>
    %120 = arith.mulf %119, %88 : vector<8x32xf32>
    %121 = vector.extract_strided_slice %118 {offsets = [0, 0], sizes = [8, 32], strides = [1, 1]} : vector<8x128xf32> to vector<8x32xf32>
    %122 = vector.extract_strided_slice %114 {offsets = [0, 64], sizes = [8, 32], strides = [1, 1]} : vector<8x128xf32> to vector<8x32xf32>
    %123 = arith.mulf %121, %122 : vector<8x32xf32>
    %124 = arith.addf %120, %123 : vector<8x32xf32>
    %125 = vector.extract_strided_slice %118 {offsets = [0, 96], sizes = [8, 32], strides = [1, 1]} : vector<8x128xf32> to vector<8x32xf32>
    %126 = math.tanh %124 : vector<8x32xf32>
    %127 = arith.mulf %125, %126 : vector<8x32xf32>
    %128 = vector.extract_strided_slice %13 {offsets = [3, 0, 0], sizes = [1, 8, 128], strides = [1, 1, 1]} : vector<8x8x128xf32> to vector<1x8x128xf32>
    %129 = vector.shape_cast %128 : vector<1x8x128xf32> to vector<8x128xf32>
    %130 = arith.addf %111, %129 : vector<8x128xf32>
    %131 = math.tanh %130 : vector<8x128xf32>
    %cst_28 = arith.constant 5.000000e-01 : f32
    %132 = vector.broadcast %cst_28 : f32 to vector<8x128xf32>
    %133 = arith.mulf %132, %131 : vector<8x128xf32>
    %cst_29 = arith.constant 5.000000e-01 : f32
    %134 = vector.broadcast %cst_29 : f32 to vector<8x128xf32>
    %135 = arith.addf %133, %134 : vector<8x128xf32>
    %136 = vector.extract_strided_slice %135 {offsets = [0, 32], sizes = [8, 32], strides = [1, 1]} : vector<8x128xf32> to vector<8x32xf32>
    %137 = arith.mulf %136, %105 : vector<8x32xf32>
    %138 = vector.extract_strided_slice %135 {offsets = [0, 0], sizes = [8, 32], strides = [1, 1]} : vector<8x128xf32> to vector<8x32xf32>
    %139 = vector.extract_strided_slice %131 {offsets = [0, 64], sizes = [8, 32], strides = [1, 1]} : vector<8x128xf32> to vector<8x32xf32>
    %140 = arith.mulf %138, %139 : vector<8x32xf32>
    %141 = arith.addf %137, %140 : vector<8x32xf32>
    %142 = vector.extract_strided_slice %135 {offsets = [0, 96], sizes = [8, 32], strides = [1, 1]} : vector<8x128xf32> to vector<8x32xf32>
    %143 = math.tanh %141 : vector<8x32xf32>
    %144 = arith.mulf %142, %143 : vector<8x32xf32>
    %145 = tpu.concatenate %144, %127 in 1 : vector<8x32xf32>, vector<8x32xf32> -> vector<8x64xf32>
    %cst_30 = arith.constant dense<0.000000e+00> : vector<8x256xf32>
    %146 = tpu.matmul %145, %0, %cst_30 {dimension_numbers = #tpu.dot_dimension_numbers<[1], [0], [0], [1], [0, 0, 1, 1], [], []>, precision = #tpu.contract_precision<fp32>} : vector<8x64xf32>, vector<64x256xf32>, vector<8x256xf32> -> vector<8x256xf32>
    %147 = vector.extract_strided_slice %146 {offsets = [0, 0], sizes = [8, 128], strides = [1, 1]} : vector<8x256xf32> to vector<8x128xf32>
    %148 = vector.extract_strided_slice %146 {offsets = [0, 128], sizes = [8, 128], strides = [1, 1]} : vector<8x256xf32> to vector<8x128xf32>
    %149 = arith.addf %148, %15 : vector<8x128xf32>
    %150 = math.tanh %149 : vector<8x128xf32>
    %cst_31 = arith.constant 5.000000e-01 : f32
    %151 = vector.broadcast %cst_31 : f32 to vector<8x128xf32>
    %152 = arith.mulf %151, %150 : vector<8x128xf32>
    %cst_32 = arith.constant 5.000000e-01 : f32
    %153 = vector.broadcast %cst_32 : f32 to vector<8x128xf32>
    %154 = arith.addf %152, %153 : vector<8x128xf32>
    %155 = vector.extract_strided_slice %154 {offsets = [0, 32], sizes = [8, 32], strides = [1, 1]} : vector<8x128xf32> to vector<8x32xf32>
    %156 = arith.mulf %155, %124 : vector<8x32xf32>
    %157 = vector.extract_strided_slice %154 {offsets = [0, 0], sizes = [8, 32], strides = [1, 1]} : vector<8x128xf32> to vector<8x32xf32>
    %158 = vector.extract_strided_slice %150 {offsets = [0, 64], sizes = [8, 32], strides = [1, 1]} : vector<8x128xf32> to vector<8x32xf32>
    %159 = arith.mulf %157, %158 : vector<8x32xf32>
    %160 = arith.addf %156, %159 : vector<8x32xf32>
    %161 = vector.extract_strided_slice %154 {offsets = [0, 96], sizes = [8, 32], strides = [1, 1]} : vector<8x128xf32> to vector<8x32xf32>
    %162 = math.tanh %160 : vector<8x32xf32>
    %163 = arith.mulf %161, %162 : vector<8x32xf32>
    %164 = vector.extract_strided_slice %13 {offsets = [4, 0, 0], sizes = [1, 8, 128], strides = [1, 1, 1]} : vector<8x8x128xf32> to vector<1x8x128xf32>
    %165 = vector.shape_cast %164 : vector<1x8x128xf32> to vector<8x128xf32>
    %166 = arith.addf %147, %165 : vector<8x128xf32>
    %167 = math.tanh %166 : vector<8x128xf32>
    %cst_33 = arith.constant 5.000000e-01 : f32
    %168 = vector.broadcast %cst_33 : f32 to vector<8x128xf32>
    %169 = arith.mulf %168, %167 : vector<8x128xf32>
    %cst_34 = arith.constant 5.000000e-01 : f32
    %170 = vector.broadcast %cst_34 : f32 to vector<8x128xf32>
    %171 = arith.addf %169, %170 : vector<8x128xf32>
    %172 = vector.extract_strided_slice %171 {offsets = [0, 32], sizes = [8, 32], strides = [1, 1]} : vector<8x128xf32> to vector<8x32xf32>
    %173 = arith.mulf %172, %141 : vector<8x32xf32>
    %174 = vector.extract_strided_slice %171 {offsets = [0, 0], sizes = [8, 32], strides = [1, 1]} : vector<8x128xf32> to vector<8x32xf32>
    %175 = vector.extract_strided_slice %167 {offsets = [0, 64], sizes = [8, 32], strides = [1, 1]} : vector<8x128xf32> to vector<8x32xf32>
    %176 = arith.mulf %174, %175 : vector<8x32xf32>
    %177 = arith.addf %173, %176 : vector<8x32xf32>
    %178 = vector.extract_strided_slice %171 {offsets = [0, 96], sizes = [8, 32], strides = [1, 1]} : vector<8x128xf32> to vector<8x32xf32>
    %179 = math.tanh %177 : vector<8x32xf32>
    %180 = arith.mulf %178, %179 : vector<8x32xf32>
    %181 = tpu.concatenate %180, %163 in 1 : vector<8x32xf32>, vector<8x32xf32> -> vector<8x64xf32>
    %cst_35 = arith.constant dense<0.000000e+00> : vector<8x256xf32>
    %182 = tpu.matmul %181, %0, %cst_35 {dimension_numbers = #tpu.dot_dimension_numbers<[1], [0], [0], [1], [0, 0, 1, 1], [], []>, precision = #tpu.contract_precision<fp32>} : vector<8x64xf32>, vector<64x256xf32>, vector<8x256xf32> -> vector<8x256xf32>
    %183 = vector.extract_strided_slice %182 {offsets = [0, 0], sizes = [8, 128], strides = [1, 1]} : vector<8x256xf32> to vector<8x128xf32>
    %184 = vector.extract_strided_slice %182 {offsets = [0, 128], sizes = [8, 128], strides = [1, 1]} : vector<8x256xf32> to vector<8x128xf32>
    %185 = arith.addf %184, %15 : vector<8x128xf32>
    %186 = math.tanh %185 : vector<8x128xf32>
    %cst_36 = arith.constant 5.000000e-01 : f32
    %187 = vector.broadcast %cst_36 : f32 to vector<8x128xf32>
    %188 = arith.mulf %187, %186 : vector<8x128xf32>
    %cst_37 = arith.constant 5.000000e-01 : f32
    %189 = vector.broadcast %cst_37 : f32 to vector<8x128xf32>
    %190 = arith.addf %188, %189 : vector<8x128xf32>
    %191 = vector.extract_strided_slice %190 {offsets = [0, 32], sizes = [8, 32], strides = [1, 1]} : vector<8x128xf32> to vector<8x32xf32>
    %192 = arith.mulf %191, %160 : vector<8x32xf32>
    %193 = vector.extract_strided_slice %190 {offsets = [0, 0], sizes = [8, 32], strides = [1, 1]} : vector<8x128xf32> to vector<8x32xf32>
    %194 = vector.extract_strided_slice %186 {offsets = [0, 64], sizes = [8, 32], strides = [1, 1]} : vector<8x128xf32> to vector<8x32xf32>
    %195 = arith.mulf %193, %194 : vector<8x32xf32>
    %196 = arith.addf %192, %195 : vector<8x32xf32>
    %197 = vector.extract_strided_slice %190 {offsets = [0, 96], sizes = [8, 32], strides = [1, 1]} : vector<8x128xf32> to vector<8x32xf32>
    %198 = math.tanh %196 : vector<8x32xf32>
    %199 = arith.mulf %197, %198 : vector<8x32xf32>
    %200 = vector.extract_strided_slice %13 {offsets = [5, 0, 0], sizes = [1, 8, 128], strides = [1, 1, 1]} : vector<8x8x128xf32> to vector<1x8x128xf32>
    %201 = vector.shape_cast %200 : vector<1x8x128xf32> to vector<8x128xf32>
    %202 = arith.addf %183, %201 : vector<8x128xf32>
    %203 = math.tanh %202 : vector<8x128xf32>
    %cst_38 = arith.constant 5.000000e-01 : f32
    %204 = vector.broadcast %cst_38 : f32 to vector<8x128xf32>
    %205 = arith.mulf %204, %203 : vector<8x128xf32>
    %cst_39 = arith.constant 5.000000e-01 : f32
    %206 = vector.broadcast %cst_39 : f32 to vector<8x128xf32>
    %207 = arith.addf %205, %206 : vector<8x128xf32>
    %208 = vector.extract_strided_slice %207 {offsets = [0, 32], sizes = [8, 32], strides = [1, 1]} : vector<8x128xf32> to vector<8x32xf32>
    %209 = arith.mulf %208, %177 : vector<8x32xf32>
    %210 = vector.extract_strided_slice %207 {offsets = [0, 0], sizes = [8, 32], strides = [1, 1]} : vector<8x128xf32> to vector<8x32xf32>
    %211 = vector.extract_strided_slice %203 {offsets = [0, 64], sizes = [8, 32], strides = [1, 1]} : vector<8x128xf32> to vector<8x32xf32>
    %212 = arith.mulf %210, %211 : vector<8x32xf32>
    %213 = arith.addf %209, %212 : vector<8x32xf32>
    %214 = vector.extract_strided_slice %207 {offsets = [0, 96], sizes = [8, 32], strides = [1, 1]} : vector<8x128xf32> to vector<8x32xf32>
    %215 = math.tanh %213 : vector<8x32xf32>
    %216 = arith.mulf %214, %215 : vector<8x32xf32>
    %217 = tpu.concatenate %216, %199 in 1 : vector<8x32xf32>, vector<8x32xf32> -> vector<8x64xf32>
    %cst_40 = arith.constant dense<0.000000e+00> : vector<8x256xf32>
    %218 = tpu.matmul %217, %0, %cst_40 {dimension_numbers = #tpu.dot_dimension_numbers<[1], [0], [0], [1], [0, 0, 1, 1], [], []>, precision = #tpu.contract_precision<fp32>} : vector<8x64xf32>, vector<64x256xf32>, vector<8x256xf32> -> vector<8x256xf32>
    %219 = vector.extract_strided_slice %218 {offsets = [0, 0], sizes = [8, 128], strides = [1, 1]} : vector<8x256xf32> to vector<8x128xf32>
    %220 = vector.extract_strided_slice %218 {offsets = [0, 128], sizes = [8, 128], strides = [1, 1]} : vector<8x256xf32> to vector<8x128xf32>
    %221 = arith.addf %220, %15 : vector<8x128xf32>
    %222 = math.tanh %221 : vector<8x128xf32>
    %cst_41 = arith.constant 5.000000e-01 : f32
    %223 = vector.broadcast %cst_41 : f32 to vector<8x128xf32>
    %224 = arith.mulf %223, %222 : vector<8x128xf32>
    %cst_42 = arith.constant 5.000000e-01 : f32
    %225 = vector.broadcast %cst_42 : f32 to vector<8x128xf32>
    %226 = arith.addf %224, %225 : vector<8x128xf32>
    %227 = vector.extract_strided_slice %226 {offsets = [0, 32], sizes = [8, 32], strides = [1, 1]} : vector<8x128xf32> to vector<8x32xf32>
    %228 = arith.mulf %227, %196 : vector<8x32xf32>
    %229 = vector.extract_strided_slice %226 {offsets = [0, 0], sizes = [8, 32], strides = [1, 1]} : vector<8x128xf32> to vector<8x32xf32>
    %230 = vector.extract_strided_slice %222 {offsets = [0, 64], sizes = [8, 32], strides = [1, 1]} : vector<8x128xf32> to vector<8x32xf32>
    %231 = arith.mulf %229, %230 : vector<8x32xf32>
    %232 = arith.addf %228, %231 : vector<8x32xf32>
    %233 = vector.extract_strided_slice %226 {offsets = [0, 96], sizes = [8, 32], strides = [1, 1]} : vector<8x128xf32> to vector<8x32xf32>
    %234 = math.tanh %232 : vector<8x32xf32>
    %235 = arith.mulf %233, %234 : vector<8x32xf32>
    %236 = vector.extract_strided_slice %13 {offsets = [6, 0, 0], sizes = [1, 8, 128], strides = [1, 1, 1]} : vector<8x8x128xf32> to vector<1x8x128xf32>
    %237 = vector.shape_cast %236 : vector<1x8x128xf32> to vector<8x128xf32>
    %238 = arith.addf %219, %237 : vector<8x128xf32>
    %239 = math.tanh %238 : vector<8x128xf32>
    %cst_43 = arith.constant 5.000000e-01 : f32
    %240 = vector.broadcast %cst_43 : f32 to vector<8x128xf32>
    %241 = arith.mulf %240, %239 : vector<8x128xf32>
    %cst_44 = arith.constant 5.000000e-01 : f32
    %242 = vector.broadcast %cst_44 : f32 to vector<8x128xf32>
    %243 = arith.addf %241, %242 : vector<8x128xf32>
    %244 = vector.extract_strided_slice %243 {offsets = [0, 32], sizes = [8, 32], strides = [1, 1]} : vector<8x128xf32> to vector<8x32xf32>
    %245 = arith.mulf %244, %213 : vector<8x32xf32>
    %246 = vector.extract_strided_slice %243 {offsets = [0, 0], sizes = [8, 32], strides = [1, 1]} : vector<8x128xf32> to vector<8x32xf32>
    %247 = vector.extract_strided_slice %239 {offsets = [0, 64], sizes = [8, 32], strides = [1, 1]} : vector<8x128xf32> to vector<8x32xf32>
    %248 = arith.mulf %246, %247 : vector<8x32xf32>
    %249 = arith.addf %245, %248 : vector<8x32xf32>
    %250 = vector.extract_strided_slice %243 {offsets = [0, 96], sizes = [8, 32], strides = [1, 1]} : vector<8x128xf32> to vector<8x32xf32>
    %251 = math.tanh %249 : vector<8x32xf32>
    %252 = arith.mulf %250, %251 : vector<8x32xf32>
    %253 = tpu.concatenate %252, %235 in 1 : vector<8x32xf32>, vector<8x32xf32> -> vector<8x64xf32>
    %cst_45 = arith.constant dense<0.000000e+00> : vector<8x256xf32>
    %254 = tpu.matmul %253, %0, %cst_45 {dimension_numbers = #tpu.dot_dimension_numbers<[1], [0], [0], [1], [0, 0, 1, 1], [], []>, precision = #tpu.contract_precision<fp32>} : vector<8x64xf32>, vector<64x256xf32>, vector<8x256xf32> -> vector<8x256xf32>
    %255 = vector.extract_strided_slice %254 {offsets = [0, 0], sizes = [8, 128], strides = [1, 1]} : vector<8x256xf32> to vector<8x128xf32>
    %256 = vector.extract_strided_slice %254 {offsets = [0, 128], sizes = [8, 128], strides = [1, 1]} : vector<8x256xf32> to vector<8x128xf32>
    %257 = arith.addf %256, %15 : vector<8x128xf32>
    %258 = math.tanh %257 : vector<8x128xf32>
    %cst_46 = arith.constant 5.000000e-01 : f32
    %259 = vector.broadcast %cst_46 : f32 to vector<8x128xf32>
    %260 = arith.mulf %259, %258 : vector<8x128xf32>
    %cst_47 = arith.constant 5.000000e-01 : f32
    %261 = vector.broadcast %cst_47 : f32 to vector<8x128xf32>
    %262 = arith.addf %260, %261 : vector<8x128xf32>
    %263 = vector.extract_strided_slice %262 {offsets = [0, 32], sizes = [8, 32], strides = [1, 1]} : vector<8x128xf32> to vector<8x32xf32>
    %264 = arith.mulf %263, %232 : vector<8x32xf32>
    %265 = vector.extract_strided_slice %262 {offsets = [0, 0], sizes = [8, 32], strides = [1, 1]} : vector<8x128xf32> to vector<8x32xf32>
    %266 = vector.extract_strided_slice %258 {offsets = [0, 64], sizes = [8, 32], strides = [1, 1]} : vector<8x128xf32> to vector<8x32xf32>
    %267 = arith.mulf %265, %266 : vector<8x32xf32>
    %268 = arith.addf %264, %267 : vector<8x32xf32>
    %269 = vector.extract_strided_slice %262 {offsets = [0, 96], sizes = [8, 32], strides = [1, 1]} : vector<8x128xf32> to vector<8x32xf32>
    %270 = math.tanh %268 : vector<8x32xf32>
    %271 = arith.mulf %269, %270 : vector<8x32xf32>
    %272 = vector.extract_strided_slice %13 {offsets = [7, 0, 0], sizes = [1, 8, 128], strides = [1, 1, 1]} : vector<8x8x128xf32> to vector<1x8x128xf32>
    %273 = vector.shape_cast %272 : vector<1x8x128xf32> to vector<8x128xf32>
    %274 = arith.addf %255, %273 : vector<8x128xf32>
    %275 = math.tanh %274 : vector<8x128xf32>
    %cst_48 = arith.constant 5.000000e-01 : f32
    %276 = vector.broadcast %cst_48 : f32 to vector<8x128xf32>
    %277 = arith.mulf %276, %275 : vector<8x128xf32>
    %cst_49 = arith.constant 5.000000e-01 : f32
    %278 = vector.broadcast %cst_49 : f32 to vector<8x128xf32>
    %279 = arith.addf %277, %278 : vector<8x128xf32>
    %280 = vector.extract_strided_slice %279 {offsets = [0, 32], sizes = [8, 32], strides = [1, 1]} : vector<8x128xf32> to vector<8x32xf32>
    %281 = arith.mulf %280, %249 : vector<8x32xf32>
    %282 = vector.extract_strided_slice %279 {offsets = [0, 0], sizes = [8, 32], strides = [1, 1]} : vector<8x128xf32> to vector<8x32xf32>
    %283 = vector.extract_strided_slice %275 {offsets = [0, 64], sizes = [8, 32], strides = [1, 1]} : vector<8x128xf32> to vector<8x32xf32>
    %284 = arith.mulf %282, %283 : vector<8x32xf32>
    %285 = arith.addf %281, %284 : vector<8x32xf32>
    %286 = vector.extract_strided_slice %279 {offsets = [0, 96], sizes = [8, 32], strides = [1, 1]} : vector<8x128xf32> to vector<8x32xf32>
    %287 = math.tanh %285 : vector<8x32xf32>
    %288 = arith.mulf %286, %287 : vector<8x32xf32>
    %289 = tpu.concatenate %288, %271 in 1 : vector<8x32xf32>, vector<8x32xf32> -> vector<8x64xf32>
    %cst_50 = arith.constant dense<0.000000e+00> : vector<8x256xf32>
    %290 = tpu.matmul %289, %0, %cst_50 {dimension_numbers = #tpu.dot_dimension_numbers<[1], [0], [0], [1], [0, 0, 1, 1], [], []>, precision = #tpu.contract_precision<fp32>} : vector<8x64xf32>, vector<64x256xf32>, vector<8x256xf32> -> vector<8x256xf32>
    %291 = vector.extract_strided_slice %290 {offsets = [0, 128], sizes = [8, 128], strides = [1, 1]} : vector<8x256xf32> to vector<8x128xf32>
    %292 = arith.addf %291, %15 : vector<8x128xf32>
    %293 = math.tanh %292 : vector<8x128xf32>
    %cst_51 = arith.constant 5.000000e-01 : f32
    %294 = vector.broadcast %cst_51 : f32 to vector<8x128xf32>
    %295 = arith.mulf %294, %293 : vector<8x128xf32>
    %cst_52 = arith.constant 5.000000e-01 : f32
    %296 = vector.broadcast %cst_52 : f32 to vector<8x128xf32>
    %297 = arith.addf %295, %296 : vector<8x128xf32>
    %298 = vector.extract_strided_slice %297 {offsets = [0, 32], sizes = [8, 32], strides = [1, 1]} : vector<8x128xf32> to vector<8x32xf32>
    %299 = arith.mulf %298, %268 : vector<8x32xf32>
    %300 = vector.extract_strided_slice %297 {offsets = [0, 0], sizes = [8, 32], strides = [1, 1]} : vector<8x128xf32> to vector<8x32xf32>
    %301 = vector.extract_strided_slice %293 {offsets = [0, 64], sizes = [8, 32], strides = [1, 1]} : vector<8x128xf32> to vector<8x32xf32>
    %302 = arith.mulf %300, %301 : vector<8x32xf32>
    %303 = arith.addf %299, %302 : vector<8x32xf32>
    %304 = vector.extract_strided_slice %297 {offsets = [0, 96], sizes = [8, 32], strides = [1, 1]} : vector<8x128xf32> to vector<8x32xf32>
    %305 = math.tanh %303 : vector<8x32xf32>
    %306 = arith.mulf %304, %305 : vector<8x32xf32>
    %cst_53 = arith.constant dense<0.000000e+00> : vector<8x128xf32>
    %307 = tpu.matmul %306, %5, %cst_53 {dimension_numbers = #tpu.dot_dimension_numbers<[1], [0], [0], [1], [0, 0, 1, 1], [], []>, precision = #tpu.contract_precision<fp32>} : vector<8x32xf32>, vector<32x128xf32>, vector<8x128xf32> -> vector<8x128xf32>
    %308 = vector.broadcast %4 : vector<1x128xf32> to vector<8x128xf32>
    %309 = arith.addf %307, %308 : vector<8x128xf32>
    %c0_54 = arith.constant 0 : index
    %c0_55 = arith.constant 0 : index
    %310 = vector.load %arg2[%c0_54, %c0_55] : memref<8x128xf32, #tpu.memory_space<vmem>>, vector<8x128xf32>
    tpu.vector_store %arg2[%c0_54, %c0_55], %309 {strides = array<i32>} : memref<8x128xf32, #tpu.memory_space<vmem>>, vector<8x128xf32>,
    return
  }
}

</mosaic_0001>

<bundles_post_ra>
// kernel: lstm_forecaster_forward.1
= control target key start
LH: loop header
LB: loop body
LE: loop exit
PB: predicated region body
PF: predicated region fallthrough
CT: control target
= control target key end

     0   :  { %7 = vsyncpa [#allocation3], 0  ;;  %s4400_s12 = smov [#allocation2]   ;;  %s4401_s14 = smov 256   ;;  %s5539_s0 = inlined_call_operand.vmem [shape: f32[8,8,1], index: 0, kind: input, shape index: {}]   ;;  %s5540_s1 = inlined_call_operand.hbm [shape: f32[104,256], index: 1, kind: input, shape index: {}]   ;;  %s5541_s2 = inlined_call_operand.vmem [shape: f32[8,128], index: 2, kind: output, shape index: {}]  }
   0x1   :  { %s14_s11 = sshll.u32 %s5540_s1, 4  ;;  %s16_s13 = sshll.u32 %s4400_s12, 4  ;;  %s15_s11 = int_to_ptr.hbm [resolvable:$true] %s14_s11  ;;  %s17_s13 = int_to_ptr.vmem [resolvable:$true] %s16_s13 }
   0x2   :  { %s4402_s15 = smov 16  }
   0x3   :  { %22 = dma.hbm_to_vmem [thread:$0]  %s15_s11, 3328, %s17_s13, [#allocation3], %s4401_s14, %s4401_s14, %s4402_s15  }
   0x4   :  { %4398 = dma.done.wait [#allocation3], 3328  }
   0x5   :  { %4399 = vsyncadd [#allocation3], 4294963968  ;;  %v4403_v0 = vmov 0   ;;  %v51_v1 = vld [vmem:[%s5539_s0] sm:$0xff]  ;;  %v4429_v4 = vld [vmem:[#allocation2 + $0x88] ss:$0 sm:$0xff] }
   0x6   :  { %4302 = vset.pattern.permute.xlu0 %v4403_v0  ;;  %4303 = vset.pattern.permute.xlu2 %v4403_v0  ;;  %v4427_v2 = vld [vmem:[#allocation2 + $0x80] ss:$0 sm:$0xff]  ;;  %5615 = vst [vmem:[#allocation6_spill] sm:$0xff] %v4429_v4  ;;  %s4404_s1 = smov 64   ;;  %s4405_s18 = smov 32   ;;  %v41_v16 = vld [vmem:[#allocation2 + $0x70] sm:$0xff] }
   0x7   :  { %61 = vperm.xlu0 %4302, %v51_v1   ;;  %5614 = vst [vmem:[#allocation5_spill] sm:$0xff] %v4427_v2  ;;  %v39_v17 = vld [vmem:[#allocation2 + $0x60] sm:$0xff]  ;;  %v37_v18 = vld [vmem:[#allocation2 + $0x50] sm:$0xff]  ;;  %v4443_v19 = vand.u32 4294901760, %v41_v16  ;;  %v42_v49 = vld [vmem:[#allocation2 + $0x78] sm:$0xff]  ;;  %vm140_vm0 = vcmask 261120  }
   0x8   :  { %v4445_v20 = vand.u32 4294901760, %v39_v17  ;;  %v4447_v21 = vand.u32 4294901760, %v37_v18  ;;  %v35_v22 = vld [vmem:[#allocation2 + $0x40] sm:$0xff]  ;;  %v33_v23 = vld [vmem:[#allocation2 + $0x30] sm:$0xff]  ;;  %v40_v50 = vld [vmem:[#allocation2 + $0x68] sm:$0xff]  ;;  %v4533_v58 = vand.u32 4294901760, %v42_v49 }
   0x9   :  { %v31_v24 = vld [vmem:[#allocation2 + $0x20] sm:$0xff]  ;;  %v4449_v25 = vand.u32 4294901760, %v35_v22  ;;  %v4451_v26 = vand.u32 4294901760, %v33_v23  ;;  %v29_v28 = vld [vmem:[#allocation2 + $0x10] sm:$0xff]  ;;  %v4456_v30 = vsub.f32 %v41_v16, %v4443_v19  ;;  %287 = vmatpush.msra.mxu3 %v4443_v19  ;;  %155 = vmatpush.msra.mxu0 %v4443_v19  ;;  %v38_v51 = vld [vmem:[#allocation2 + $0x58] sm:$0xff]  ;;  %v4535_v59 = vand.u32 4294901760, %v40_v50 }
   0xa   :  { %v4453_v27 = vand.u32 4294901760, %v31_v24  ;;  %v27_v29 = vld [vmem:[#allocation2] sm:$0xff]  ;;  %v4459_v31 = vsub.f32 %v39_v17, %v4445_v20  ;;  %v4462_v32 = vsub.f32 %v37_v18, %v4447_v21  ;;  %v4466_v33 = vand.u32 4294901760, %v29_v28 }
   0xb   :  { %5617 = vst [vmem:[#allocation8_spill] sm:$0xff] %v4451_v26  ;;  %v4469_v34 = vsub.f32 %v35_v22, %v4449_v25  ;;  %v4472_v35 = vsub.f32 %v33_v23, %v4451_v26  ;;  %v4477_v37 = vand.u32 4294901760, %v27_v29  ;;  %v4480_v38 = vand.u32 4294901760, %v4456_v30  ;;  %250 = vmatpush.msra.mxu2 %v4456_v30  ;;  %289 = vmatpush.msra.mxu3 %v4445_v20 }
   0xc   :  { %5618 = vst [vmem:[#allocation9_spill] sm:$0xff] %v4453_v27  ;;  %v4475_v36 = vsub.f32 %v31_v24, %v4453_v27  ;;  %v4483_v39 = vand.u32 4294901760, %v4459_v31  ;;  %v4487_v40 = vand.u32 4294901760, %v4462_v32  ;;  %157 = vmatpush.msra.mxu0 %v4445_v20  ;;  %v4498_v43 = vsub.f32 %v29_v28, %v4466_v33  ;;  %v36_v24 = vld [vmem:[#allocation2 + $0x48] sm:$0xff] }
   0xd   :  { %5619 = vst [vmem:[#allocation10_spill] sm:$0xff] %v4466_v33  ;;  %v4491_v41 = vand.u32 4294901760, %v4469_v34  ;;  %v4494_v42 = vand.u32 4294901760, %v4472_v35  ;;  %v190_v44 = vsub.f32 %v4456_v30, %v4480_v38  ;;  %253 = vmatpush.msra.mxu2 %v4459_v31  ;;  %291 = vmatpush.msra.mxu3 %v4447_v21  ;;  %v4513_v48 = vsub.f32 %v27_v29, %v4477_v37 }
   0xe   :  { %5620 = vst [vmem:[#allocation11_spill] sm:$0xff] %v4472_v35  ;;  %v196_v45 = vsub.f32 %v4459_v31, %v4483_v39  ;;  %v202_v46 = vsub.f32 %v4462_v32, %v4487_v40  ;;  %v4509_v47 = vand.u32 4294901760, %v4475_v36  ;;  %159 = vmatpush.msra.mxu0 %v4447_v21  ;;  %v4526_v56 = vand.u32 4294901760, %v4498_v43 }
   0xf   :  { %5621 = vst [vmem:[#allocation12_spill] sm:$0xff] %v4475_v36  ;;  %v4515_v52 = vand.u32 4294901760, %v190_v44  ;;  %v208_v54 = vsub.f32 %v4469_v34, %v4491_v41  ;;  %256 = vmatpush.msra.mxu2 %v4462_v32  ;;  %293 = vmatpush.msra.mxu3 %v4449_v25  ;;  %v214_v55 = vsub.f32 %v4472_v35, %v4494_v42  ;;  %v4537_v60 = vand.u32 4294901760, %v38_v51 }
  0x10   :  { %5622 = vst [vmem:[#allocation13_spill] sm:$0xff] %v4477_v37  ;;  %v4517_v53 = vand.u32 4294901760, %v196_v45  ;;  %161 = vmatpush.msra.mxu0 %v4449_v25  ;;  %v4530_v57 = vand.u32 4294901760, %v202_v46  ;;  %v220_v61 = vsub.f32 %v4475_v36, %v4509_v47  ;;  %v4543_v62 = vand.u32 4294901760, %v4513_v48 }
  0x11   :  { %5623 = vst [vmem:[#allocation14_spill] sm:$0xff] %v4480_v38  ;;  %192 = vmatpush.msra.mxu1 %v4515_v52  ;;  %259 = vmatpush.msra.mxu2 %v4469_v34  ;;  %v4547_v63 = vand.u32 4294901760, %v208_v54  ;;  %v4551_v0 = vsub.f32 %v42_v49, %v4533_v58  ;;  %v4554_v1 = vsub.f32 %v40_v50, %v4535_v59  ;;  %v4613_v29 = vand.u32 4294901760, %v36_v24  ;;  %v32_v50 = vld [vmem:[#allocation2 + $0x28] sm:$0xff] }
  0x12   :  { %5624 = vst [vmem:[#allocation15_spill] sm:$0xff] %v4483_v39  ;;  %295 = vmatpush.msra.mxu3 %v4451_v26  ;;  %163 = vmatpush.msra.mxu0 %v4451_v26  ;;  %v4643_v54 = vand.u32 4294901760, %v32_v50  ;;  %vm142_vm1 = vcmask 523264  }
  0x13   :  { %5625 = vst [vmem:[#allocation16_spill] sm:$0xff] %v4487_v40  ;;  %198 = vmatpush.msra.mxu1 %v4517_v53  ;;  %262 = vmatpush.msra.mxu2 %v4472_v35  ;;  %v4637_v49 = vsub.f32 %v36_v24, %v4613_v29 }
  0x14   :  { %5626 = vst [vmem:[#allocation17_spill] sm:$0xff] %v4491_v41  ;;  %297 = vmatpush.msra.mxu3 %v4453_v27  ;;  %165 = vmatpush.msra.mxu0 %v4453_v27 }
  0x15   :  { %5627 = vst [vmem:[#allocation18_spill] sm:$0xff] %v4494_v42  ;;  %204 = vmatpush.msra.mxu1 %v4530_v57  ;;  %265 = vmatpush.msra.mxu2 %v4475_v36 }
  0x16   :  { %5628 = vst [vmem:[#allocation19_spill] sm:$0xff] %v4498_v43  ;;  %299 = vmatpush.msra.mxu3 %v4466_v33  ;;  %167 = vmatpush.msra.mxu0 %v4466_v33 }
  0x17   :  { %5629 = vst [vmem:[#allocation20_spill] sm:$0xff] %v4509_v47  ;;  %210 = vmatpush.msra.mxu1 %v4547_v63  ;;  %268 = vmatpush.msra.mxu2 %v4498_v43 }
  0x18   :  { %5630 = vst [vmem:[#allocation21_spill] sm:$0xff] %v4513_v48  ;;  %301 = vmatpush.msra.mxu3 %v4477_v37  ;;  %169 = vmatpush.msra.mxu0 %v4477_v37 }
  0x19   :  { %5631 = vst [vmem:[#allocation22_spill] sm:$0xff] %v4526_v56  ;;  %271 = vmatpush.msra.mxu2 %v4513_v48 }
  0x1a   :  { %5632 = vst [vmem:[#allocation23_spill] sm:$0xff] %v4543_v62  ;;  %320 = vmatpush.msrb.mxu0 %v4480_v38 }
  0x1b   :  { %392 = vmatpush.msrb.mxu2 %v4533_v58 }
  0x1c   :  { %324 = vmatpush.msrb.mxu0 %v4483_v39 }
  0x1d   :  { %394 = vmatpush.msrb.mxu2 %v4535_v59 }
  0x1e   :  { %328 = vmatpush.msrb.mxu0 %v4487_v40 }
  0x1f   :  { %396 = vmatpush.msrb.mxu2 %v4537_v60 }
  0x20   :  { %332 = vmatpush.msrb.mxu0 %v4491_v41 }
  0x21   :  { %398 = vmatpush.msrb.mxu2 %v4613_v29 }
  0x22   :  { %336 = vmatpush.msrb.mxu0 %v4494_v42 }
  0x24   :  { %340 = vmatpush.msrb.mxu0 %v4509_v47 }
  0x26   :  { %344 = vmatpush.msrb.mxu0 %v4526_v56 }
  0x28   :  { %348 = vmatpush.msrb.mxu0 %v4543_v62 }
  0x79   :  { %v62_v3 = vpop.permute.xlu0 %61 }
  0x7a   :  { %v99_v5 = vmul.f32 %v62_v3, %v4427_v2  ;;  %v4557_v3 = vsub.f32 %v38_v51, %v4537_v60  ;;  %v4641_v51 = vand.u32 4294901760, %v4637_v49 }
  0x7c   :  { %v107_v6 = vadd.f32 %v99_v5, %v4429_v4  ;;  %v226_v5 = vsub.f32 %v4498_v43, %v4526_v56 }
  0x7e   :  { %4304 = vtanh.f32 %v107_v6  ;;  %v4564_v6 = vand.u32 4294901760, %v214_v55  ;;  %v4593_v17 = vand.u32 4294901760, %v226_v5  ;;  %v445_v5 = vsub.f32 %v4637_v49, %v4641_v51 }
  0x80   :  { %216 = vmatpush.msra.mxu1 %v4564_v6  ;;  %5633 = vst [vmem:[#allocation24_spill] sm:$0xff] %v4593_v17  ;;  %v4659_v24 = vand.u32 4294901760, %v445_v5 }
  0x82   :  { %5638 = vst [vmem:[#allocation29_spill] sm:$0xff] %v4659_v24 }
  0x84   :  { %v4305_v7 = vpop.eup %4304 }
  0x85   :  { %121 = vrot.lane.b32.xlu0 %v4305_v7, %s4404_s1  ;;  %v117_v8 = vmul.f32 0.5, %v4305_v7  ;;  %v4568_v7 = vand.u32 4294901760, %v4551_v0 }
  0x87   :  { %v4434_v9 = vadd.f32 0.5, %v117_v8  ;;  %v4571_v8 = vand.u32 4294901760, %v4554_v1 }
  0x89   :  { %v119_v12 = vmul.f32 0.0, %v4434_v9 }
  0xf7   :  { %v122_v10 = vpop.permute.xlu0 %121 }
  0xf8   :  { %v124_v11 = vmul.f32 %v122_v10, %v4434_v9  ;;  %v4574_v10 = vand.u32 4294901760, %v4557_v3 }
  0xfa   :  { %126 = vrot.lane.b32.xlu1 %v124_v11, %s4405_s18  ;;  %v232_v11 = vsub.f32 %v4513_v48, %v4543_v62  ;;  %v439_v16 = vsub.f32 %v4557_v3, %v4574_v10 }
  0xfc   :  { %v4603_v23 = vand.u32 4294901760, %v232_v11  ;;  %v4606_v28 = vand.u32 4294901760, %v439_v16  ;;  %v28_v16 = vld [vmem:[#allocation2 + $0x8] sm:$0xff] }
  0xfe   :  { %5636 = vst [vmem:[#allocation27_spill] sm:$0xff] %v4603_v23 }
  0xff   :  { %5637 = vst [vmem:[#allocation28_spill] sm:$0xff] %v4606_v28 }
 0x16c   :  { %v127_v13 = vpop.permute.xlu1 %126 }
 0x16d   :  { %v4439_v14 = vadd.f32 %v127_v13, %v119_v12  ;;  %v4581_v12 = vand.u32 4294901760, %v220_v61  ;;  %v427_v13 = vsub.f32 %v4551_v0, %v4568_v7  ;;  %v30_v61 = vld [vmem:[#allocation2 + $0x18] sm:$0xff] }
 0x16f   :  { %5616 = vst [vmem:[#allocation7_spill] sm:$0xff] %v4439_v14  ;;  %4306 = vtanh.f32 %v4439_v14  ;;  %v4596_v18 = vand.u32 4294901760, %v427_v13  ;;  %222 = vmatpush.msra.mxu1 %v4581_v12  ;;  %v4654_v13 = vand.u32 4294901760, %v30_v61 }
 0x171   :  { %5634 = vst [vmem:[#allocation25_spill] sm:$0xff] %v4596_v18  ;;  %429 = vmatpush.msrb.mxu3 %v4596_v18  ;;  %228 = vmatpush.msra.mxu1 %v4593_v17  ;;  %v4670_v14 = vsub.f32 %v30_v61, %v4654_v13 }
 0x173   :  { %234 = vmatpush.msra.mxu1 %v4603_v23  ;;  %v4682_v2 = vand.u32 4294901760, %v4670_v14 }
 0x175   :  { %v4307_v15 = vpop.eup %4306  ;;  %363 = vmatpush.msrb.mxu1 %v4443_v19 }
 0x176   :  { %132 = vrot.lane.b32.xlu1 %v4307_v15, %s4404_s1  ;;  %v433_v15 = vsub.f32 %v4554_v1, %v4571_v8 }
 0x177   :  { %365 = vmatpush.msrb.mxu1 %v4445_v20 }
 0x178   :  { %v4598_v22 = vand.u32 4294901760, %v433_v15  ;;  %v4657_v15 = vsub.f32 %v32_v50, %v4643_v54 }
 0x179   :  { %367 = vmatpush.msrb.mxu1 %v4447_v21 }
 0x17a   :  { %5635 = vst [vmem:[#allocation26_spill] sm:$0xff] %v4598_v22  ;;  %435 = vmatpush.msrb.mxu3 %v4598_v22 }
 0x17b   :  { %369 = vmatpush.msrb.mxu1 %v4449_v25 }
 0x17c   :  { %441 = vmatpush.msrb.mxu3 %v4606_v28 }
 0x17d   :  { %371 = vmatpush.msrb.mxu1 %v4451_v26 }
 0x17e   :  { %447 = vmatpush.msrb.mxu3 %v4659_v24 }
 0x17f   :  { %373 = vmatpush.msrb.mxu1 %v4453_v27 }
 0x181   :  { %375 = vmatpush.msrb.mxu1 %v4466_v33 }
 0x183   :  { %377 = vmatpush.msrb.mxu1 %v4477_v37 }
 0x1e8   :  { %v133_v44 = vpop.permute.xlu1 %132 }
 0x1e9   :  { %v135_v45 = vmul.f32 %v133_v44, %v4434_v9  ;;  %v34_v9 = vld [vmem:[#allocation2 + $0x38] sm:$0xff] }
 0x1ea   :  { %v4634_v46 = vand.u32 4294901760, %v34_v9 }
 0x1eb   :  { %137 = vrot.lane.b32.xlu2 %v135_v45, %s4405_s18  ;;  %v4665_v45 = vand.u32 4294901760, %v4657_v15 }
 0x1ec   :  { %400 = vmatpush.msrb.mxu2 %v4634_v46  ;;  %v4646_v55 = vsub.f32 %v34_v9, %v4634_v46  ;;  %v4667_v9 = vand.u32 4294901760, %v28_v16 }
 0x1ed   :  { %v457_v5 = vsub.f32 %v4657_v15, %v4665_v45 }
 0x1ee   :  { %402 = vmatpush.msrb.mxu2 %v4643_v54  ;;  %v4652_v11 = vand.u32 4294901760, %v4646_v55  ;;  %v4679_v4 = vsub.f32 %v28_v16, %v4667_v9 }
 0x1ef   :  { %v4685_v62 = vand.u32 4294901760, %v457_v5  ;;  %v52_v5 = vld [vmem:[%s5539_s0 + $0x8] sm:$0xff] }
 0x1f0   :  { %v451_v44 = vsub.f32 %v4646_v55, %v4652_v11  ;;  %404 = vmatpush.msrb.mxu2 %v4654_v13  ;;  %v4688_v61 = vand.u32 4294901760, %v4679_v4 }
 0x1f1   :  { %5640 = vst [vmem:[#allocation31_spill] sm:$0xff] %v4685_v62 }
 0x1f2   :  { %v4673_v50 = vand.u32 4294901760, %v451_v44  ;;  %406 = vmatpush.msrb.mxu2 %v4667_v9  ;;  %v463_v44 = vsub.f32 %v4670_v14, %v4682_v2  ;;  %v469_v56 = vsub.f32 %v4679_v4, %v4688_v61 }
 0x1f3   :  { %66 = vperm.xlu2 %4303, %v52_v5   ;;  %v5647_v5 = vld [vmem:[#allocation20_spill] sm:$0xff] }
 0x1f4   :  { %5639 = vst [vmem:[#allocation30_spill] sm:$0xff] %v4673_v50  ;;  %453 = vmatpush.msrb.mxu3 %v4673_v50  ;;  %v4695_v16 = vand.u32 4294901760, %v463_v44  ;;  %v4697_v47 = vand.u32 4294901760, %v469_v56 }
 0x1f6   :  { %459 = vmatpush.msrb.mxu3 %v4685_v62  ;;  %5641 = vst [vmem:[#allocation32_spill] sm:$0xff] %v4695_v16 }
 0x1f7   :  { %5642 = vst [vmem:[#allocation33_spill] sm:$0xff] %v4697_v47 }
 0x1f8   :  { %465 = vmatpush.msrb.mxu3 %v4695_v16 }
 0x1fa   :  { %471 = vmatpush.msrb.mxu3 %v4697_v47 }
 0x245   :  { %v138_v42 = vpop.permute.xlu2 %137 }
 0x246   :  { %v141_v62 = vsel %vm140_vm0, %v138_v42, 0.0 }
 0x247   :  { %v144_v41 = vsel %vm142_vm1, %v141_v62, 0  ;;  %v5645_v62 = vld [vmem:[#allocation31_spill] sm:$0xff] }
 0x248   :  { %v170_v44 = vand.u32 4294901760, %v144_v41 }
 0x24a   :  { %v171_v50 = vsub.f32 %v144_v41, %v170_v44  ;;  %236 = vmatmul.f32.vlgmr.msra.gmra.mxu1 %v170_v44  ;;  %v5643_v41 = vld [vmem:[#allocation30_spill] sm:$0xff] }
 0x24b   :  { %524 = vmatpush.msra.mxu1 %v4533_v58 }
 0x24c   :  { %274 = vmatmul.f32.vlgmr.msra.gmra.mxu2 %v171_v50  ;;  %v172_v56 = vand.u32 4294901760, %v171_v50 }
 0x24d   :  { %526 = vmatpush.msra.mxu1 %v4535_v59  ;;  %557 = vmatpush.msra.mxu2 %v4568_v7 }
 0x24e   :  { %305 = vmatmul.f32.vlgmr.msra.gmra.mxu3 %v172_v56  ;;  %v173_v47 = vsub.f32 %v171_v50, %v172_v56 }
 0x24f   :  { %528 = vmatpush.msra.mxu1 %v4537_v60  ;;  %561 = vmatpush.msra.mxu2 %v4571_v8 }
 0x250   :  { %600 = vmatpush.msra.mxu3 %v4533_v58  ;;  %v174_v42 = vand.u32 4294901760, %v173_v47  ;;  %v5644_v47 = vld [vmem:[#allocation17_spill] sm:$0xff] }
 0x251   :  { %530 = vmatpush.msra.mxu1 %v4613_v29  ;;  %565 = vmatpush.msra.mxu2 %v4574_v10 }
 0x252   :  { %602 = vmatpush.msra.mxu3 %v4535_v59  ;;  %175 = vmatmul.f32.vlgmr.msra.gmra.mxu0 %v174_v42 }
 0x253   :  { %379 = vmatmul.f32.vlgmr.msrb.gmra.mxu1 %v170_v44  ;;  %487 = vmatpush.msra.mxu0 %v4551_v0 }
 0x254   :  { %532 = vmatpush.msra.mxu1 %v4634_v46  ;;  %569 = vmatpush.msra.mxu2 %v4641_v51 }
 0x255   :  { %604 = vmatpush.msra.mxu3 %v4537_v60  ;;  %412 = vmatmul.f32.vlgmr.msrb.gmra.mxu2 %v174_v42  ;;  %v5650_v42 = vld [vmem:[#allocation23_spill] sm:$0xff] }
 0x256   :  { %490 = vmatpush.msra.mxu0 %v4554_v1  ;;  %534 = vmatpush.msra.mxu1 %v4643_v54 }
 0x257   :  { %573 = vmatpush.msra.mxu2 %v4652_v11  ;;  %606 = vmatpush.msra.mxu3 %v4613_v29 }
 0x258   :  { %473 = vmatmul.f32.vlgmr.msrb.gmra.mxu3 %v170_v44  ;;  %493 = vmatpush.msra.mxu0 %v4557_v3 }
 0x259   :  { %536 = vmatpush.msra.mxu1 %v4654_v13  ;;  %577 = vmatpush.msra.mxu2 %v4665_v45 }
 0x25a   :  { %608 = vmatpush.msra.mxu3 %v4634_v46  ;;  %496 = vmatpush.msra.mxu0 %v4637_v49 }
 0x25b   :  { %538 = vmatpush.msra.mxu1 %v4667_v9  ;;  %581 = vmatpush.msra.mxu2 %v4682_v2 }
 0x25c   :  { %610 = vmatpush.msra.mxu3 %v4643_v54  ;;  %350 = vmatmul.f32.vlgmr.msrb.gmra.mxu0 %v170_v44 }
 0x25d   :  { %542 = vmatmul.f32.vlgmr.msra.gmra.mxu1 %v172_v56  ;;  %499 = vmatpush.msra.mxu0 %v4646_v55  ;;  %v5649_v56 = vld [vmem:[#allocation22_spill] sm:$0xff] }
 0x25e   :  { %585 = vmatpush.msra.mxu2 %v4688_v61  ;;  %612 = vmatpush.msra.mxu3 %v4654_v13 }
 0x25f   :  { %587 = vmatmul.f32.vlgmr.msra.gmra.mxu2 %v170_v44  ;;  %502 = vmatpush.msra.mxu0 %v4657_v15 }
 0x260   :  { %614 = vmatpush.msra.mxu3 %v4667_v9  ;;  %720 = vmatpush.msrb.mxu1 %v4515_v52 }
 0x261   :  { %616 = vmatmul.f32.vlgmr.msra.gmra.mxu3 %v170_v44  ;;  %505 = vmatpush.msra.mxu0 %v4670_v14  ;;  %v5648_v44 = vld [vmem:[#allocation33_spill] sm:$0xff] }
 0x262   :  { %726 = vmatpush.msrb.mxu1 %v4517_v53  ;;  %778 = vmatpush.msrb.mxu2 %v4456_v30 }
 0x263   :  { %508 = vmatpush.msra.mxu0 %v4679_v4  ;;  %815 = vmatpush.msrb.mxu3 %v4443_v19 }
 0x264   :  { %511 = vmatmul.f32.vlgmr.msra.gmra.mxu0 %v171_v50  ;;  %732 = vmatpush.msrb.mxu1 %v4530_v57  ;;  %v5646_v50 = vld [vmem:[#allocation18_spill] sm:$0xff] }
 0x265   :  { %781 = vmatpush.msrb.mxu2 %v4459_v31  ;;  %817 = vmatpush.msrb.mxu3 %v4445_v20 }
 0x266   :  { %738 = vmatpush.msrb.mxu1 %v4547_v63  ;;  %683 = vmatpush.msrb.mxu0 %v4443_v19 }
 0x267   :  { %784 = vmatpush.msrb.mxu2 %v4462_v32  ;;  %819 = vmatpush.msrb.mxu3 %v4447_v21 }
 0x268   :  { %744 = vmatpush.msrb.mxu1 %v4564_v6  ;;  %685 = vmatpush.msrb.mxu0 %v4445_v20 }
 0x269   :  { %787 = vmatpush.msrb.mxu2 %v4469_v34  ;;  %821 = vmatpush.msrb.mxu3 %v4449_v25 }
 0x26a   :  { %750 = vmatpush.msrb.mxu1 %v4581_v12  ;;  %687 = vmatpush.msrb.mxu0 %v4447_v21 }
 0x26b   :  { %790 = vmatpush.msrb.mxu2 %v4472_v35  ;;  %823 = vmatpush.msrb.mxu3 %v4451_v26 }
 0x26c   :  { %756 = vmatpush.msrb.mxu1 %v4593_v17  ;;  %689 = vmatpush.msrb.mxu0 %v4449_v25 }
 0x26d   :  { %793 = vmatpush.msrb.mxu2 %v4475_v36  ;;  %825 = vmatpush.msrb.mxu3 %v4453_v27 }
 0x26e   :  { %762 = vmatpush.msrb.mxu1 %v4603_v23  ;;  %691 = vmatpush.msrb.mxu0 %v4451_v26 }
 0x26f   :  { %796 = vmatpush.msrb.mxu2 %v4498_v43  ;;  %827 = vmatpush.msrb.mxu3 %v4466_v33 }
 0x270   :  { %891 = vmatpush.msra.mxu1 %v4443_v19  ;;  %693 = vmatpush.msrb.mxu0 %v4453_v27 }
 0x271   :  { %799 = vmatpush.msrb.mxu2 %v4513_v48  ;;  %829 = vmatpush.msrb.mxu3 %v4477_v37 }
 0x272   :  { %893 = vmatpush.msra.mxu1 %v4445_v20  ;;  %695 = vmatpush.msrb.mxu0 %v4466_v33 }
 0x273   :  { %920 = vmatpush.msra.mxu2 %v4533_v58  ;;  %957 = vmatpush.msra.mxu3 %v4596_v18 }
 0x274   :  { %895 = vmatpush.msra.mxu1 %v4447_v21  ;;  %697 = vmatpush.msrb.mxu0 %v4477_v37 }
 0x275   :  { %922 = vmatpush.msra.mxu2 %v4535_v59  ;;  %963 = vmatpush.msra.mxu3 %v4598_v22 }
 0x276   :  { %897 = vmatpush.msra.mxu1 %v4449_v25  ;;  %848 = vmatpush.msra.mxu0 %v4480_v38 }
 0x277   :  { %924 = vmatpush.msra.mxu2 %v4537_v60  ;;  %969 = vmatpush.msra.mxu3 %v4606_v28 }
 0x278   :  { %899 = vmatpush.msra.mxu1 %v4451_v26  ;;  %852 = vmatpush.msra.mxu0 %v4483_v39 }
 0x279   :  { %926 = vmatpush.msra.mxu2 %v4613_v29  ;;  %975 = vmatpush.msra.mxu3 %v4659_v24 }
 0x27a   :  { %901 = vmatpush.msra.mxu1 %v4453_v27  ;;  %856 = vmatpush.msra.mxu0 %v4487_v40 }
 0x27b   :  { %928 = vmatpush.msra.mxu2 %v4634_v46  ;;  %981 = vmatpush.msra.mxu3 %v5643_v41 }
 0x27c   :  { %903 = vmatpush.msra.mxu1 %v4466_v33  ;;  %860 = vmatpush.msra.mxu0 %v5644_v47 }
 0x27d   :  { %930 = vmatpush.msra.mxu2 %v4643_v54  ;;  %987 = vmatpush.msra.mxu3 %v5645_v62  ;;  %v67_v62 = vpop.permute.xlu2 %66 }
 0x27e   :  { %905 = vmatpush.msra.mxu1 %v4477_v37  ;;  %864 = vmatpush.msra.mxu0 %v5646_v50  ;;  %v5651_v50 = vld [vmem:[#allocation5_spill] sm:$0xff]  ;;  %v5652_v37 = vld [vmem:[#allocation6_spill] sm:$0xff] }
 0x27f   :  { %932 = vmatpush.msra.mxu2 %v4654_v13  ;;  %993 = vmatpush.msra.mxu3 %v4695_v16  ;;  %v100_v38 = vmul.f32 %v67_v62, %v5651_v50  ;;  %v4804_v62 = vld [vmem:[#allocation2 + $0x81] ss:$0 sm:$0xff] }
 0x280   :  { %868 = vmatpush.msra.mxu0 %v5647_v5 }
 0x281   :  { %934 = vmatpush.msra.mxu2 %v4667_v9  ;;  %999 = vmatpush.msra.mxu3 %v5648_v44  ;;  %v108_v5 = vadd.f32 %v100_v38, %v5652_v37 }
 0x282   :  { %872 = vmatpush.msra.mxu0 %v5649_v56 }
 0x284   :  { %876 = vmatpush.msra.mxu0 %v5650_v42 }
 0x2c7   :  { %v237_v47 = vpop.f32.mrf.mxu1 }
 0x2cf   :  { %v176_v41 = vpop.f32.mrf.mxu0  ;;  %v275_v24 = vpop.f32.mrf.mxu2 }
 0x2d0   :  { %v238_v40 = vadd.f32 %v237_v47, %v176_v41  ;;  %v380_v18 = vpop.f32.mrf.mxu1 }
 0x2d1   :  { %v306_v39 = vpop.f32.mrf.mxu3 }
 0x2d2   :  { %v276_v28 = vadd.f32 %v275_v24, %v238_v40 }
 0x2d4   :  { %v307_v22 = vadd.f32 %v306_v39, %v276_v28 }
 0x2d8   :  { %v413_v44 = vpop.f32.mrf.mxu2 }
 0x2d9   :  { %v351_v16 = vpop.f32.mrf.mxu0 }
 0x2da   :  { %v352_v48 = vadd.f32 %v351_v16, %v307_v22  ;;  %v543_v47 = vpop.f32.mrf.mxu1 }
 0x2db   :  { %v474_v56 = vpop.f32.mrf.mxu3 }
 0x2dc   :  { %v381_v33 = vadd.f32 %v380_v18, %v352_v48  ;;  %v475_v42 = vadd.f32 %v474_v56, %v413_v44 }
 0x2de   :  { %v641_v43 = vadd.f32 %v381_v33, %v108_v5 }
 0x2e0   :  { %4308 = vtanh.f32 %v641_v43 }
 0x2e1   :  { %v512_v23 = vpop.f32.mrf.mxu0 }
 0x2e2   :  { %v513_v41 = vadd.f32 %v512_v23, %v475_v42  ;;  %v588_v36 = vpop.f32.mrf.mxu2 }
 0x2e4   :  { %v544_v27 = vadd.f32 %v543_v47, %v513_v41  ;;  %v617_v39 = vpop.f32.mrf.mxu3  ;;  %v5653_v41 = vld [vmem:[#allocation7_spill] sm:$0xff] }
 0x2e6   :  { %v4309_v40 = vpop.eup %4308  ;;  %v589_v24 = vadd.f32 %v588_v36, %v544_v27 }
 0x2e7   :  { %647 = vrot.lane.b32.xlu1 %v4309_v40, %s4404_s1  ;;  %v643_v33 = vmul.f32 0.5, %v4309_v40 }
 0x2e8   :  { %v618_v38 = vadd.f32 %v617_v39, %v589_v24 }
 0x2e9   :  { %v644_v43 = vadd.f32 0.5, %v643_v33 }
 0x2ea   :  { %v620_v22 = vadd.f32 %v618_v38, %v4804_v62  ;;  %v53_v38 = vld [vmem:[%s5539_s0 + $0x10] sm:$0xff] }
 0x2eb   :  { %v645_v47 = vmul.f32 %v644_v43, %v5653_v41  ;;  %v5654_v41 = vld [vmem:[#allocation12_spill] sm:$0xff] }
 0x2ec   :  { %4310 = vtanh.f32 %v620_v22 }
 0x2f2   :  { %v4311_v48 = vpop.eup %4310 }
 0x2f3   :  { %626 = vrot.lane.b32.xlu0 %v4311_v48, %s4404_s1  ;;  %v622_v28 = vmul.f32 0.5, %v4311_v48 }
 0x2f5   :  { %v623_v27 = vadd.f32 0.5, %v622_v28 }
 0x2f7   :  { %v624_v5 = vmul.f32 0.0, %v623_v27 }
 0x359   :  { %v648_v18 = vpop.permute.xlu1 %647 }
 0x35a   :  { %v650_v23 = vmul.f32 %v648_v18, %v644_v43 }
 0x35c   :  { %652 = vrot.lane.b32.xlu0 %v650_v23, %s4405_s18 }
 0x365   :  { %v627_v36 = vpop.permute.xlu0 %626 }
 0x366   :  { %v629_v16 = vmul.f32 %v627_v36, %v623_v27 }
 0x368   :  { %631 = vrot.lane.b32.xlu2 %v629_v16, %s4405_s18 }
 0x3c2   :  { %v632_v44 = vpop.permute.xlu2 %631 }
 0x3c3   :  { %v4811_v56 = vadd.f32 %v632_v44, %v624_v5 }
 0x3c5   :  { %4312 = vtanh.f32 %v4811_v56 }
 0x3cb   :  { %v4313_v42 = vpop.eup %4312 }
 0x3cc   :  { %637 = vrot.lane.b32.xlu1 %v4313_v42, %s4404_s1 }
 0x3ce   :  { %v653_v40 = vpop.permute.xlu0 %652 }
 0x3cf   :  { %v4816_v24 = vadd.f32 %v653_v40, %v645_v47  ;;  %v5655_v47 = vld [vmem:[#allocation9_spill] sm:$0xff]  ;;  %v5656_v40 = vld [vmem:[#allocation27_spill] sm:$0xff] }
 0x3d1   :  { %4314 = vtanh.f32 %v4816_v24 }
 0x3d7   :  { %v4315_v39 = vpop.eup %4314 }
 0x3d8   :  { %658 = vrot.lane.b32.xlu2 %v4315_v39, %s4404_s1  ;;  %v5657_v39 = vld [vmem:[#allocation19_spill] sm:$0xff] }
 0x3e0   :  { %71 = vperm.xlu2 %4303, %v53_v38   ;;  %v5658_v38 = vld [vmem:[#allocation10_spill] sm:$0xff] }
 0x432   :  { %v659_v22 = vpop.permute.xlu2 %658 }
 0x433   :  { %v661_v48 = vmul.f32 %v659_v22, %v644_v43  ;;  %v5659_v22 = vld [vmem:[#allocation21_spill] sm:$0xff] }
 0x435   :  { %663 = vrot.lane.b32.xlu0 %v661_v48, %s4405_s18  ;;  %v5660_v48 = vld [vmem:[#allocation13_spill] sm:$0xff] }
 0x43e   :  { %v638_v33 = vpop.permute.xlu1 %637 }
 0x43f   :  { %v640_v18 = vmul.f32 %v638_v33, %v623_v27  ;;  %v5661_v33 = vld [vmem:[#allocation25_spill] sm:$0xff] }
 0x441   :  { %667 = vrot.lane.b32.xlu1 %v640_v18, %s4404_s1  ;;  %v5662_v18 = vld [vmem:[#allocation26_spill] sm:$0xff] }
 0x4a7   :  { %v664_v23 = vpop.permute.xlu0 %663 }
 0x4b3   :  { %v668_v28 = vpop.permute.xlu1 %667 }
 0x4b4   :  { %v670_v36 = vsel %vm140_vm0, %v664_v23, %v668_v28  ;;  %v5663_v23 = vld [vmem:[#allocation14_spill] sm:$0xff]  ;;  %v5664_v28 = vld [vmem:[#allocation28_spill] sm:$0xff] }
 0x4b5   :  { %v672_v16 = vsel %vm142_vm1, %v670_v36, 0  ;;  %v5665_v36 = vld [vmem:[#allocation15_spill] sm:$0xff] }
 0x4b6   :  { %v698_v5 = vand.u32 4294901760, %v672_v16 }
 0x4b8   :  { %v699_v44 = vsub.f32 %v672_v16, %v698_v5  ;;  %764 = vmatmul.f32.vlgmr.msrb.gmra.mxu1 %v698_v5  ;;  %v5666_v16 = vld [vmem:[#allocation29_spill] sm:$0xff] }
 0x4b9   :  { %1052 = vmatpush.msrb.mxu1 %v4533_v58 }
 0x4ba   :  { %802 = vmatmul.f32.vlgmr.msrb.gmra.mxu2 %v699_v44  ;;  %v700_v42 = vand.u32 4294901760, %v699_v44 }
 0x4bb   :  { %1054 = vmatpush.msrb.mxu1 %v4535_v59  ;;  %1085 = vmatpush.msrb.mxu2 %v4568_v7 }
 0x4bc   :  { %833 = vmatmul.f32.vlgmr.msrb.gmra.mxu3 %v700_v42  ;;  %v701_v43 = vsub.f32 %v699_v44, %v700_v42 }
 0x4bd   :  { %1056 = vmatpush.msrb.mxu1 %v4537_v60  ;;  %1089 = vmatpush.msrb.mxu2 %v4571_v8 }
 0x4be   :  { %1128 = vmatpush.msrb.mxu3 %v4533_v58  ;;  %v702_v27 = vand.u32 4294901760, %v701_v43  ;;  %v5670_v43 = vld [vmem:[#allocation31_spill] sm:$0xff] }
 0x4bf   :  { %1058 = vmatpush.msrb.mxu1 %v4613_v29  ;;  %1093 = vmatpush.msrb.mxu2 %v4574_v10 }
 0x4c0   :  { %1130 = vmatpush.msrb.mxu3 %v4535_v59  ;;  %703 = vmatmul.f32.vlgmr.msrb.gmra.mxu0 %v702_v27 }
 0x4c1   :  { %907 = vmatmul.f32.vlgmr.msra.gmra.mxu1 %v698_v5  ;;  %1015 = vmatpush.msrb.mxu0 %v4551_v0 }
 0x4c2   :  { %1060 = vmatpush.msrb.mxu1 %v4634_v46  ;;  %1097 = vmatpush.msrb.mxu2 %v4641_v51 }
 0x4c3   :  { %1132 = vmatpush.msrb.mxu3 %v4537_v60  ;;  %940 = vmatmul.f32.vlgmr.msra.gmra.mxu2 %v702_v27  ;;  %v5671_v27 = vld [vmem:[#allocation18_spill] sm:$0xff] }
 0x4c4   :  { %1018 = vmatpush.msrb.mxu0 %v4554_v1  ;;  %1062 = vmatpush.msrb.mxu1 %v4643_v54 }
 0x4c5   :  { %1101 = vmatpush.msrb.mxu2 %v4652_v11  ;;  %1134 = vmatpush.msrb.mxu3 %v4613_v29 }
 0x4c6   :  { %1001 = vmatmul.f32.vlgmr.msra.gmra.mxu3 %v698_v5  ;;  %1021 = vmatpush.msrb.mxu0 %v4557_v3 }
 0x4c7   :  { %1064 = vmatpush.msrb.mxu1 %v4654_v13  ;;  %1105 = vmatpush.msrb.mxu2 %v4665_v45 }
 0x4c8   :  { %1136 = vmatpush.msrb.mxu3 %v4634_v46  ;;  %1024 = vmatpush.msrb.mxu0 %v4637_v49 }
 0x4c9   :  { %1066 = vmatpush.msrb.mxu1 %v4667_v9  ;;  %1109 = vmatpush.msrb.mxu2 %v4682_v2 }
 0x4ca   :  { %1138 = vmatpush.msrb.mxu3 %v4643_v54  ;;  %878 = vmatmul.f32.vlgmr.msra.gmra.mxu0 %v698_v5 }
 0x4cb   :  { %1070 = vmatmul.f32.vlgmr.msrb.gmra.mxu1 %v700_v42  ;;  %1027 = vmatpush.msrb.mxu0 %v4646_v55  ;;  %v5669_v42 = vld [vmem:[#allocation17_spill] sm:$0xff] }
 0x4cc   :  { %1113 = vmatpush.msrb.mxu2 %v4688_v61  ;;  %1140 = vmatpush.msrb.mxu3 %v4654_v13 }
 0x4cd   :  { %1115 = vmatmul.f32.vlgmr.msrb.gmra.mxu2 %v698_v5  ;;  %1030 = vmatpush.msrb.mxu0 %v4657_v15 }
 0x4ce   :  { %1142 = vmatpush.msrb.mxu3 %v4667_v9  ;;  %1248 = vmatpush.msra.mxu1 %v4515_v52 }
 0x4cf   :  { %1144 = vmatmul.f32.vlgmr.msrb.gmra.mxu3 %v698_v5  ;;  %1033 = vmatpush.msrb.mxu0 %v4670_v14  ;;  %v5667_v5 = vld [vmem:[#allocation16_spill] sm:$0xff] }
 0x4d0   :  { %1254 = vmatpush.msra.mxu1 %v4517_v53  ;;  %1306 = vmatpush.msra.mxu2 %v4456_v30 }
 0x4d1   :  { %1036 = vmatpush.msrb.mxu0 %v4679_v4  ;;  %1343 = vmatpush.msra.mxu3 %v4443_v19 }
 0x4d2   :  { %1039 = vmatmul.f32.vlgmr.msrb.gmra.mxu0 %v699_v44  ;;  %1260 = vmatpush.msra.mxu1 %v4530_v57  ;;  %v5668_v44 = vld [vmem:[#allocation30_spill] sm:$0xff] }
 0x4d3   :  { %1309 = vmatpush.msra.mxu2 %v4459_v31  ;;  %1345 = vmatpush.msra.mxu3 %v4445_v20 }
 0x4d4   :  { %1266 = vmatpush.msra.mxu1 %v4547_v63  ;;  %1211 = vmatpush.msra.mxu0 %v4443_v19 }
 0x4d5   :  { %1312 = vmatpush.msra.mxu2 %v4462_v32  ;;  %1347 = vmatpush.msra.mxu3 %v4447_v21 }
 0x4d6   :  { %1272 = vmatpush.msra.mxu1 %v4564_v6  ;;  %1213 = vmatpush.msra.mxu0 %v4445_v20 }
 0x4d7   :  { %1315 = vmatpush.msra.mxu2 %v4469_v34  ;;  %1349 = vmatpush.msra.mxu3 %v4449_v25 }
 0x4d8   :  { %1278 = vmatpush.msra.mxu1 %v4581_v12  ;;  %1215 = vmatpush.msra.mxu0 %v4447_v21 }
 0x4d9   :  { %1318 = vmatpush.msra.mxu2 %v4472_v35  ;;  %1351 = vmatpush.msra.mxu3 %v4451_v26 }
 0x4da   :  { %1284 = vmatpush.msra.mxu1 %v4593_v17  ;;  %1217 = vmatpush.msra.mxu0 %v4449_v25 }
 0x4db   :  { %1321 = vmatpush.msra.mxu2 %v5654_v41  ;;  %1353 = vmatpush.msra.mxu3 %v5655_v47 }
 0x4dc   :  { %1290 = vmatpush.msra.mxu1 %v5656_v40  ;;  %1219 = vmatpush.msra.mxu0 %v4451_v26 }
 0x4dd   :  { %1324 = vmatpush.msra.mxu2 %v5657_v39  ;;  %1355 = vmatpush.msra.mxu3 %v5658_v38 }
 0x4de   :  { %1419 = vmatpush.msrb.mxu1 %v4443_v19  ;;  %1221 = vmatpush.msra.mxu0 %v5655_v47 }
 0x4df   :  { %1327 = vmatpush.msra.mxu2 %v5659_v22  ;;  %1357 = vmatpush.msra.mxu3 %v5660_v48  ;;  %v72_v22 = vpop.permute.xlu2 %71 }
 0x4e0   :  { %1421 = vmatpush.msrb.mxu1 %v4445_v20  ;;  %1223 = vmatpush.msra.mxu0 %v5658_v38 }
 0x4e1   :  { %1448 = vmatpush.msrb.mxu2 %v4533_v58  ;;  %1485 = vmatpush.msrb.mxu3 %v5661_v33 }
 0x4e2   :  { %1423 = vmatpush.msrb.mxu1 %v4447_v21  ;;  %1225 = vmatpush.msra.mxu0 %v5660_v48 }
 0x4e3   :  { %1450 = vmatpush.msrb.mxu2 %v4535_v59  ;;  %1491 = vmatpush.msrb.mxu3 %v5662_v18 }
 0x4e4   :  { %1425 = vmatpush.msrb.mxu1 %v4449_v25  ;;  %1376 = vmatpush.msrb.mxu0 %v5663_v23 }
 0x4e5   :  { %1452 = vmatpush.msrb.mxu2 %v4537_v60  ;;  %1497 = vmatpush.msrb.mxu3 %v5664_v28  ;;  %v5675_v28 = vld [vmem:[#allocation22_spill] sm:$0xff] }
 0x4e6   :  { %1427 = vmatpush.msrb.mxu1 %v4451_v26  ;;  %1380 = vmatpush.msrb.mxu0 %v5665_v36  ;;  %v5674_v36 = vld [vmem:[#allocation33_spill] sm:$0xff] }
 0x4e7   :  { %1454 = vmatpush.msrb.mxu2 %v4613_v29  ;;  %1503 = vmatpush.msrb.mxu3 %v5666_v16  ;;  %v5672_v16 = vld [vmem:[#allocation32_spill] sm:$0xff] }
 0x4e8   :  { %1429 = vmatpush.msrb.mxu1 %v5655_v47  ;;  %1384 = vmatpush.msrb.mxu0 %v5667_v5  ;;  %v5673_v5 = vld [vmem:[#allocation20_spill] sm:$0xff] }
 0x4e9   :  { %1456 = vmatpush.msrb.mxu2 %v4634_v46  ;;  %1509 = vmatpush.msrb.mxu3 %v5668_v44  ;;  %v5676_v44 = vld [vmem:[#allocation23_spill] sm:$0xff] }
 0x4ea   :  { %1431 = vmatpush.msrb.mxu1 %v5658_v38  ;;  %1388 = vmatpush.msrb.mxu0 %v5669_v42 }
 0x4eb   :  { %1458 = vmatpush.msrb.mxu2 %v4643_v54  ;;  %1515 = vmatpush.msrb.mxu3 %v5670_v43 }
 0x4ec   :  { %1433 = vmatpush.msrb.mxu1 %v5660_v48  ;;  %1392 = vmatpush.msrb.mxu0 %v5671_v27  ;;  %v101_v27 = vmul.f32 %v72_v22, %v5651_v50 }
 0x4ed   :  { %1460 = vmatpush.msrb.mxu2 %v4654_v13  ;;  %1521 = vmatpush.msrb.mxu3 %v5672_v16 }
 0x4ee   :  { %1396 = vmatpush.msrb.mxu0 %v5673_v5 }
 0x4ef   :  { %1462 = vmatpush.msrb.mxu2 %v4667_v9  ;;  %1527 = vmatpush.msrb.mxu3 %v5674_v36  ;;  %v109_v36 = vadd.f32 %v101_v27, %v5652_v37 }
 0x4f0   :  { %1400 = vmatpush.msrb.mxu0 %v5675_v28 }
 0x4f2   :  { %1404 = vmatpush.msrb.mxu0 %v5676_v44 }
 0x535   :  { %v765_v42 = vpop.f32.mrf.mxu1 }
 0x53d   :  { %v704_v23 = vpop.f32.mrf.mxu0  ;;  %v803_v33 = vpop.f32.mrf.mxu2 }
 0x53e   :  { %v766_v18 = vadd.f32 %v765_v42, %v704_v23  ;;  %v908_v39 = vpop.f32.mrf.mxu1 }
 0x53f   :  { %v834_v48 = vpop.f32.mrf.mxu3 }
 0x540   :  { %v804_v43 = vadd.f32 %v803_v33, %v766_v18 }
 0x542   :  { %v835_v38 = vadd.f32 %v834_v48, %v804_v43 }
 0x546   :  { %v941_v5 = vpop.f32.mrf.mxu2 }
 0x547   :  { %v879_v16 = vpop.f32.mrf.mxu0 }
 0x548   :  { %v880_v40 = vadd.f32 %v879_v16, %v835_v38  ;;  %v1071_v42 = vpop.f32.mrf.mxu1 }
 0x549   :  { %v1002_v28 = vpop.f32.mrf.mxu3 }
 0x54a   :  { %v909_v47 = vadd.f32 %v908_v39, %v880_v40  ;;  %v1003_v44 = vadd.f32 %v1002_v28, %v941_v5 }
 0x54c   :  { %v1169_v41 = vadd.f32 %v909_v47, %v109_v36 }
 0x54e   :  { %4316 = vtanh.f32 %v1169_v41 }
 0x54f   :  { %v1040_v17 = vpop.f32.mrf.mxu0 }
 0x550   :  { %v1041_v23 = vadd.f32 %v1040_v17, %v1003_v44  ;;  %v1116_v33 = vpop.f32.mrf.mxu2 }
 0x552   :  { %v1072_v26 = vadd.f32 %v1071_v42, %v1041_v23  ;;  %v1145_v50 = vpop.f32.mrf.mxu3 }
 0x554   :  { %v4317_v18 = vpop.eup %4316  ;;  %v1117_v35 = vadd.f32 %v1116_v33, %v1072_v26 }
 0x555   :  { %1175 = vrot.lane.b32.xlu1 %v4317_v18, %s4404_s1  ;;  %v1171_v47 = vmul.f32 0.5, %v4317_v18 }
 0x556   :  { %v1146_v22 = vadd.f32 %v1145_v50, %v1117_v35 }
 0x557   :  { %v1172_v41 = vadd.f32 0.5, %v1171_v47 }
 0x558   :  { %v1148_v38 = vadd.f32 %v1146_v22, %v4804_v62 }
 0x559   :  { %v1173_v44 = vmul.f32 %v1172_v41, %v4816_v24 }
 0x55a   :  { %4318 = vtanh.f32 %v1148_v38 }
 0x560   :  { %v4319_v37 = vpop.eup %4318 }
 0x561   :  { %1154 = vrot.lane.b32.xlu0 %v4319_v37, %s4404_s1  ;;  %v1150_v17 = vmul.f32 0.5, %v4319_v37 }
 0x563   :  { %v1151_v48 = vadd.f32 0.5, %v1150_v17 }
 0x565   :  { %v1152_v35 = vmul.f32 %v1151_v48, %v4811_v56  ;;  %v54_v56 = vld [vmem:[%s5539_s0 + $0x18] sm:$0xff] }
 0x5c7   :  { %v1176_v40 = vpop.permute.xlu1 %1175 }
 0x5c8   :  { %v1178_v39 = vmul.f32 %v1176_v40, %v1172_v41 }
 0x5ca   :  { %1180 = vrot.lane.b32.xlu0 %v1178_v39, %s4405_s18 }
 0x5d3   :  { %v1155_v28 = vpop.permute.xlu0 %1154 }
 0x5d4   :  { %v1157_v26 = vmul.f32 %v1155_v28, %v1151_v48  ;;  %v5678_v28 = vld [vmem:[#allocation8_spill] sm:$0xff] }
 0x5d6   :  { %1159 = vrot.lane.b32.xlu2 %v1157_v26, %s4405_s18  ;;  %v5679_v26 = vld [vmem:[#allocation24_spill] sm:$0xff] }
 0x630   :  { %v1160_v36 = vpop.permute.xlu2 %1159 }
 0x631   :  { %v4931_v16 = vadd.f32 %v1160_v36, %v1152_v35  ;;  %v5680_v35 = vld [vmem:[#allocation12_spill] sm:$0xff]  ;;  %v5681_v36 = vld [vmem:[#allocation9_spill] sm:$0xff] }
 0x633   :  { %4320 = vtanh.f32 %v4931_v16 }
 0x639   :  { %v4321_v5 = vpop.eup %4320 }
 0x63a   :  { %1165 = vrot.lane.b32.xlu1 %v4321_v5, %s4404_s1  ;;  %v5682_v5 = vld [vmem:[#allocation27_spill] sm:$0xff] }
 0x63c   :  { %v1181_v43 = vpop.permute.xlu0 %1180 }
 0x63d   :  { %v4936_v27 = vadd.f32 %v1181_v43, %v1173_v44  ;;  %v5683_v44 = vld [vmem:[#allocation19_spill] sm:$0xff]  ;;  %v5684_v43 = vld [vmem:[#allocation10_spill] sm:$0xff] }
 0x63f   :  { %4322 = vtanh.f32 %v4936_v27 }
 0x645   :  { %v4323_v23 = vpop.eup %4322 }
 0x646   :  { %1186 = vrot.lane.b32.xlu2 %v4323_v23, %s4404_s1  ;;  %v5685_v23 = vld [vmem:[#allocation21_spill] sm:$0xff] }
 0x64e   :  { %76 = vperm.xlu2 %4303, %v54_v56   ;;  %v5686_v56 = vld [vmem:[#allocation13_spill] sm:$0xff] }
 0x6a0   :  { %v1187_v42 = vpop.permute.xlu2 %1186 }
 0x6a1   :  { %v1189_v33 = vmul.f32 %v1187_v42, %v1172_v41  ;;  %v5687_v42 = vld [vmem:[#allocation25_spill] sm:$0xff] }
 0x6a3   :  { %1191 = vrot.lane.b32.xlu0 %v1189_v33, %s4405_s18  ;;  %v5688_v33 = vld [vmem:[#allocation26_spill] sm:$0xff] }
 0x6ac   :  { %v1166_v18 = vpop.permute.xlu1 %1165 }
 0x6ad   :  { %v1168_v50 = vmul.f32 %v1166_v18, %v1151_v48  ;;  %v5677_v48 = vld [vmem:[#allocation11_spill] sm:$0xff]  ;;  %v5689_v18 = vld [vmem:[#allocation14_spill] sm:$0xff] }
 0x6af   :  { %1195 = vrot.lane.b32.xlu1 %v1168_v50, %s4404_s1  ;;  %v5690_v50 = vld [vmem:[#allocation28_spill] sm:$0xff] }
 0x715   :  { %v1192_v24 = vpop.permute.xlu0 %1191 }
 0x721   :  { %v1196_v22 = vpop.permute.xlu1 %1195 }
 0x722   :  { %v1198_v38 = vsel %vm140_vm0, %v1192_v24, %v1196_v22  ;;  %v5691_v24 = vld [vmem:[#allocation15_spill] sm:$0xff]  ;;  %v5692_v22 = vld [vmem:[#allocation29_spill] sm:$0xff] }
 0x723   :  { %v1200_v37 = vsel %vm142_vm1, %v1198_v38, 0  ;;  %v5693_v38 = vld [vmem:[#allocation16_spill] sm:$0xff] }
 0x724   :  { %v1226_v47 = vand.u32 4294901760, %v1200_v37 }
 0x726   :  { %v1227_v40 = vsub.f32 %v1200_v37, %v1226_v47  ;;  %1292 = vmatmul.f32.vlgmr.msra.gmra.mxu1 %v1226_v47  ;;  %v5694_v37 = vld [vmem:[#allocation30_spill] sm:$0xff] }
 0x727   :  { %1580 = vmatpush.msra.mxu1 %v4533_v58 }
 0x728   :  { %1330 = vmatmul.f32.vlgmr.msra.gmra.mxu2 %v1227_v40  ;;  %v1228_v39 = vand.u32 4294901760, %v1227_v40 }
 0x729   :  { %1582 = vmatpush.msra.mxu1 %v4535_v59  ;;  %1613 = vmatpush.msra.mxu2 %v4568_v7 }
 0x72a   :  { %1361 = vmatmul.f32.vlgmr.msra.gmra.mxu3 %v1228_v39  ;;  %v1229_v41 = vsub.f32 %v1227_v40, %v1228_v39 }
 0x72b   :  { %1584 = vmatpush.msra.mxu1 %v4537_v60  ;;  %1617 = vmatpush.msra.mxu2 %v4571_v8 }
 0x72c   :  { %1656 = vmatpush.msra.mxu3 %v4533_v58  ;;  %v1230_v17 = vand.u32 4294901760, %v1229_v41  ;;  %v5698_v41 = vld [vmem:[#allocation32_spill] sm:$0xff] }
 0x72d   :  { %1586 = vmatpush.msra.mxu1 %v4613_v29  ;;  %1621 = vmatpush.msra.mxu2 %v4574_v10 }
 0x72e   :  { %1658 = vmatpush.msra.mxu3 %v4535_v59  ;;  %1231 = vmatmul.f32.vlgmr.msra.gmra.mxu0 %v1230_v17 }
 0x72f   :  { %1435 = vmatmul.f32.vlgmr.msrb.gmra.mxu1 %v1226_v47  ;;  %1543 = vmatpush.msra.mxu0 %v4551_v0 }
 0x730   :  { %1588 = vmatpush.msra.mxu1 %v4634_v46  ;;  %1625 = vmatpush.msra.mxu2 %v4641_v51 }
 0x731   :  { %1660 = vmatpush.msra.mxu3 %v4537_v60  ;;  %1468 = vmatmul.f32.vlgmr.msrb.gmra.mxu2 %v1230_v17  ;;  %v5699_v17 = vld [vmem:[#allocation20_spill] sm:$0xff] }
 0x732   :  { %1546 = vmatpush.msra.mxu0 %v4554_v1  ;;  %1590 = vmatpush.msra.mxu1 %v4643_v54 }
 0x733   :  { %1629 = vmatpush.msra.mxu2 %v4652_v11  ;;  %1662 = vmatpush.msra.mxu3 %v4613_v29 }
 0x734   :  { %1529 = vmatmul.f32.vlgmr.msrb.gmra.mxu3 %v1226_v47  ;;  %1549 = vmatpush.msra.mxu0 %v4557_v3 }
 0x735   :  { %1592 = vmatpush.msra.mxu1 %v4654_v13  ;;  %1633 = vmatpush.msra.mxu2 %v4665_v45 }
 0x736   :  { %1664 = vmatpush.msra.mxu3 %v4634_v46  ;;  %1552 = vmatpush.msra.mxu0 %v4637_v49 }
 0x737   :  { %1594 = vmatpush.msra.mxu1 %v4667_v9  ;;  %1637 = vmatpush.msra.mxu2 %v4682_v2 }
 0x738   :  { %1666 = vmatpush.msra.mxu3 %v4643_v54  ;;  %1406 = vmatmul.f32.vlgmr.msrb.gmra.mxu0 %v1226_v47 }
 0x739   :  { %1598 = vmatmul.f32.vlgmr.msra.gmra.mxu1 %v1228_v39  ;;  %1555 = vmatpush.msra.mxu0 %v4646_v55  ;;  %v5697_v39 = vld [vmem:[#allocation18_spill] sm:$0xff] }
 0x73a   :  { %1641 = vmatpush.msra.mxu2 %v4688_v61  ;;  %1668 = vmatpush.msra.mxu3 %v4654_v13 }
 0x73b   :  { %1643 = vmatmul.f32.vlgmr.msra.gmra.mxu2 %v1226_v47  ;;  %1558 = vmatpush.msra.mxu0 %v4657_v15 }
 0x73c   :  { %1670 = vmatpush.msra.mxu3 %v4667_v9  ;;  %1776 = vmatpush.msrb.mxu1 %v4515_v52 }
 0x73d   :  { %1672 = vmatmul.f32.vlgmr.msra.gmra.mxu3 %v1226_v47  ;;  %1561 = vmatpush.msra.mxu0 %v4670_v14  ;;  %v5695_v47 = vld [vmem:[#allocation17_spill] sm:$0xff] }
 0x73e   :  { %1782 = vmatpush.msrb.mxu1 %v4517_v53  ;;  %1834 = vmatpush.msrb.mxu2 %v4456_v30 }
 0x73f   :  { %1564 = vmatpush.msra.mxu0 %v4679_v4  ;;  %1871 = vmatpush.msrb.mxu3 %v4443_v19 }
 0x740   :  { %1567 = vmatmul.f32.vlgmr.msra.gmra.mxu0 %v1227_v40  ;;  %1788 = vmatpush.msrb.mxu1 %v4530_v57  ;;  %v5696_v40 = vld [vmem:[#allocation31_spill] sm:$0xff] }
 0x741   :  { %1837 = vmatpush.msrb.mxu2 %v4459_v31  ;;  %1873 = vmatpush.msrb.mxu3 %v4445_v20 }
 0x742   :  { %1794 = vmatpush.msrb.mxu1 %v4547_v63  ;;  %1739 = vmatpush.msrb.mxu0 %v4443_v19 }
 0x743   :  { %1840 = vmatpush.msrb.mxu2 %v4462_v32  ;;  %1875 = vmatpush.msrb.mxu3 %v4447_v21 }
 0x744   :  { %1800 = vmatpush.msrb.mxu1 %v4564_v6  ;;  %1741 = vmatpush.msrb.mxu0 %v4445_v20 }
 0x745   :  { %1843 = vmatpush.msrb.mxu2 %v4469_v34  ;;  %1877 = vmatpush.msrb.mxu3 %v4449_v25 }
 0x746   :  { %1806 = vmatpush.msrb.mxu1 %v4581_v12  ;;  %1743 = vmatpush.msrb.mxu0 %v4447_v21 }
 0x747   :  { %1846 = vmatpush.msrb.mxu2 %v5677_v48  ;;  %1879 = vmatpush.msrb.mxu3 %v5678_v28 }
 0x748   :  { %1812 = vmatpush.msrb.mxu1 %v5679_v26  ;;  %1745 = vmatpush.msrb.mxu0 %v4449_v25 }
 0x749   :  { %1849 = vmatpush.msrb.mxu2 %v5680_v35  ;;  %1881 = vmatpush.msrb.mxu3 %v5681_v36 }
 0x74a   :  { %1818 = vmatpush.msrb.mxu1 %v5682_v5  ;;  %1747 = vmatpush.msrb.mxu0 %v5678_v28 }
 0x74b   :  { %1852 = vmatpush.msrb.mxu2 %v5683_v44  ;;  %1883 = vmatpush.msrb.mxu3 %v5684_v43  ;;  %v5046_v44 = vld [vmem:[#allocation2 + $0x88] ss:$0 sm:$0xff] }
 0x74c   :  { %1947 = vmatpush.msra.mxu1 %v4443_v19  ;;  %1749 = vmatpush.msrb.mxu0 %v5681_v36 }
 0x74d   :  { %1855 = vmatpush.msrb.mxu2 %v5685_v23  ;;  %1885 = vmatpush.msrb.mxu3 %v5686_v56 }
 0x74e   :  { %1949 = vmatpush.msra.mxu1 %v4445_v20  ;;  %1751 = vmatpush.msrb.mxu0 %v5684_v43 }
 0x74f   :  { %1976 = vmatpush.msra.mxu2 %v4533_v58  ;;  %2013 = vmatpush.msra.mxu3 %v5687_v42  ;;  %v77_v42 = vpop.permute.xlu2 %76 }
 0x750   :  { %1951 = vmatpush.msra.mxu1 %v4447_v21  ;;  %1753 = vmatpush.msrb.mxu0 %v5686_v56 }
 0x751   :  { %1978 = vmatpush.msra.mxu2 %v4535_v59  ;;  %2019 = vmatpush.msra.mxu3 %v5688_v33 }
 0x752   :  { %1953 = vmatpush.msra.mxu1 %v4449_v25  ;;  %1904 = vmatpush.msra.mxu0 %v5689_v18 }
 0x753   :  { %1980 = vmatpush.msra.mxu2 %v4537_v60  ;;  %2025 = vmatpush.msra.mxu3 %v5690_v50 }
 0x754   :  { %1955 = vmatpush.msra.mxu1 %v5678_v28  ;;  %1908 = vmatpush.msra.mxu0 %v5691_v24 }
 0x755   :  { %1982 = vmatpush.msra.mxu2 %v4613_v29  ;;  %2031 = vmatpush.msra.mxu3 %v5692_v22  ;;  %v5701_v22 = vld [vmem:[#allocation22_spill] sm:$0xff] }
 0x756   :  { %1957 = vmatpush.msra.mxu1 %v5681_v36  ;;  %1912 = vmatpush.msra.mxu0 %v5693_v38  ;;  %v5700_v38 = vld [vmem:[#allocation33_spill] sm:$0xff] }
 0x757   :  { %1984 = vmatpush.msra.mxu2 %v4634_v46  ;;  %2037 = vmatpush.msra.mxu3 %v5694_v37  ;;  %v5702_v37 = vld [vmem:[#allocation23_spill] sm:$0xff] }
 0x758   :  { %1959 = vmatpush.msra.mxu1 %v5684_v43  ;;  %1916 = vmatpush.msra.mxu0 %v5695_v47 }
 0x759   :  { %1986 = vmatpush.msra.mxu2 %v4643_v54  ;;  %2043 = vmatpush.msra.mxu3 %v5696_v40 }
 0x75a   :  { %1961 = vmatpush.msra.mxu1 %v5686_v56  ;;  %1920 = vmatpush.msra.mxu0 %v5697_v39  ;;  %v5043_v39 = vld [vmem:[#allocation2 + $0x80] ss:$0 sm:$0xff] }
 0x75b   :  { %1988 = vmatpush.msra.mxu2 %v4654_v13  ;;  %2049 = vmatpush.msra.mxu3 %v5698_v41  ;;  %v102_v56 = vmul.f32 %v5043_v39, %v77_v42 }
 0x75c   :  { %1924 = vmatpush.msra.mxu0 %v5699_v17 }
 0x75d   :  { %1990 = vmatpush.msra.mxu2 %v4667_v9  ;;  %2055 = vmatpush.msra.mxu3 %v5700_v38 }
 0x75e   :  { %1928 = vmatpush.msra.mxu0 %v5701_v22 }
 0x760   :  { %1932 = vmatpush.msra.mxu0 %v5702_v37  ;;  %v110_v37 = vadd.f32 %v5046_v44, %v102_v56 }
 0x7a3   :  { %v1293_v47 = vpop.f32.mrf.mxu1 }
 0x7ab   :  { %v1232_v24 = vpop.f32.mrf.mxu0  ;;  %v1331_v18 = vpop.f32.mrf.mxu2 }
 0x7ac   :  { %v1294_v50 = vadd.f32 %v1293_v47, %v1232_v24  ;;  %v1436_v23 = vpop.f32.mrf.mxu1 }
 0x7ad   :  { %v1362_v33 = vpop.f32.mrf.mxu3 }
 0x7ae   :  { %v1332_v40 = vadd.f32 %v1331_v18, %v1294_v50 }
 0x7b0   :  { %v1363_v41 = vadd.f32 %v1362_v33, %v1332_v40 }
 0x7b4   :  { %v1469_v38 = vpop.f32.mrf.mxu2 }
 0x7b5   :  { %v1407_v17 = vpop.f32.mrf.mxu0 }
 0x7b6   :  { %v1408_v43 = vadd.f32 %v1407_v17, %v1363_v41  ;;  %v1599_v36 = vpop.f32.mrf.mxu1 }
 0x7b7   :  { %v1530_v5 = vpop.f32.mrf.mxu3 }
 0x7b8   :  { %v1437_v22 = vadd.f32 %v1436_v23, %v1408_v43  ;;  %v1531_v47 = vadd.f32 %v1530_v5, %v1469_v38 }
 0x7ba   :  { %v1697_v24 = vadd.f32 %v1437_v22, %v110_v37 }
 0x7bc   :  { %4324 = vtanh.f32 %v1697_v24 }
 0x7bd   :  { %v1568_v18 = vpop.f32.mrf.mxu0 }
 0x7be   :  { %v1569_v50 = vadd.f32 %v1568_v18, %v1531_v47  ;;  %v1644_v26 = vpop.f32.mrf.mxu2 }
 0x7c0   :  { %v1600_v35 = vadd.f32 %v1599_v36, %v1569_v50  ;;  %v1673_v40 = vpop.f32.mrf.mxu3 }
 0x7c2   :  { %v4325_v42 = vpop.eup %4324  ;;  %v1645_v33 = vadd.f32 %v1644_v26, %v1600_v35 }
 0x7c3   :  { %1703 = vrot.lane.b32.xlu1 %v4325_v42, %s4404_s1  ;;  %v1699_v43 = vmul.f32 0.5, %v4325_v42 }
 0x7c4   :  { %v1674_v41 = vadd.f32 %v1673_v40, %v1645_v33 }
 0x7c5   :  { %v1700_v23 = vadd.f32 0.5, %v1699_v43 }
 0x7c6   :  { %v1676_v17 = vadd.f32 %v1674_v41, %v4804_v62 }
 0x7c7   :  { %v1701_v18 = vmul.f32 %v1700_v23, %v4936_v27 }
 0x7c8   :  { %4326 = vtanh.f32 %v1676_v17 }
 0x7ce   :  { %v4327_v56 = vpop.eup %4326 }
 0x7cf   :  { %1682 = vrot.lane.b32.xlu0 %v4327_v56, %s4404_s1  ;;  %v1678_v36 = vmul.f32 0.5, %v4327_v56 }
 0x7d1   :  { %v1679_v38 = vadd.f32 0.5, %v1678_v36 }
 0x7d3   :  { %v1680_v35 = vmul.f32 %v1679_v38, %v4931_v16  ;;  %v55_v16 = vld [vmem:[%s5539_s0 + $0x20] sm:$0xff] }
 0x835   :  { %v1704_v5 = vpop.permute.xlu1 %1703 }
 0x836   :  { %v1706_v22 = vmul.f32 %v1704_v5, %v1700_v23 }
 0x838   :  { %1708 = vrot.lane.b32.xlu0 %v1706_v22, %s4405_s18 }
 0x841   :  { %v1683_v37 = vpop.permute.xlu0 %1682 }
 0x842   :  { %v1685_v26 = vmul.f32 %v1683_v37, %v1679_v38 }
 0x844   :  { %1687 = vrot.lane.b32.xlu2 %v1685_v26, %s4405_s18 }
 0x89e   :  { %v1688_v24 = vpop.permute.xlu2 %1687 }
 0x89f   :  { %v5055_v62 = vadd.f32 %v1688_v24, %v1680_v35  ;;  %v5703_v35 = vld [vmem:[#allocation24_spill] sm:$0xff] }
 0x8a0   :  { %v5704_v24 = vld [vmem:[#allocation12_spill] sm:$0xff] }
 0x8a1   :  { %4328 = vtanh.f32 %v5055_v62 }
 0x8a7   :  { %v4329_v47 = vpop.eup %4328 }
 0x8a8   :  { %1693 = vrot.lane.b32.xlu1 %v4329_v47, %s4404_s1  ;;  %v5705_v47 = vld [vmem:[#allocation9_spill] sm:$0xff] }
 0x8aa   :  { %v1709_v50 = vpop.permute.xlu0 %1708 }
 0x8ab   :  { %v5060_v42 = vadd.f32 %v1709_v50, %v1701_v18  ;;  %v5706_v18 = vld [vmem:[#allocation27_spill] sm:$0xff] }
 0x8ac   :  { %v5707_v50 = vld [vmem:[#allocation19_spill] sm:$0xff] }
 0x8ad   :  { %4330 = vtanh.f32 %v5060_v42 }
 0x8b3   :  { %v4331_v33 = vpop.eup %4330 }
 0x8b4   :  { %1714 = vrot.lane.b32.xlu2 %v4331_v33, %s4404_s1  ;;  %v5708_v33 = vld [vmem:[#allocation10_spill] sm:$0xff] }
 0x8bc   :  { %81 = vperm.xlu2 %4303, %v55_v16   ;;  %v5709_v16 = vld [vmem:[#allocation21_spill] sm:$0xff] }
 0x90e   :  { %v1715_v40 = vpop.permute.xlu2 %1714 }
 0x90f   :  { %v1717_v41 = vmul.f32 %v1715_v40, %v1700_v23  ;;  %v5710_v40 = vld [vmem:[#allocation13_spill] sm:$0xff] }
 0x911   :  { %1719 = vrot.lane.b32.xlu0 %v1717_v41, %s4405_s18  ;;  %v5711_v41 = vld [vmem:[#allocation25_spill] sm:$0xff] }
 0x91a   :  { %v1694_v17 = vpop.permute.xlu1 %1693 }
 0x91b   :  { %v1696_v56 = vmul.f32 %v1694_v17, %v1679_v38  ;;  %v5712_v17 = vld [vmem:[#allocation26_spill] sm:$0xff] }
 0x91d   :  { %1723 = vrot.lane.b32.xlu1 %v1696_v56, %s4404_s1  ;;  %v5713_v56 = vld [vmem:[#allocation14_spill] sm:$0xff] }
 0x983   :  { %v1720_v27 = vpop.permute.xlu0 %1719 }
 0x98f   :  { %v1724_v43 = vpop.permute.xlu1 %1723 }
 0x990   :  { %v1726_v5 = vsel %vm140_vm0, %v1720_v27, %v1724_v43  ;;  %v5714_v27 = vld [vmem:[#allocation28_spill] sm:$0xff]  ;;  %v5715_v43 = vld [vmem:[#allocation15_spill] sm:$0xff] }
 0x991   :  { %v1728_v22 = vsel %vm142_vm1, %v1726_v5, 0  ;;  %v5716_v5 = vld [vmem:[#allocation29_spill] sm:$0xff] }
 0x992   :  { %v1754_v36 = vand.u32 4294901760, %v1728_v22 }
 0x994   :  { %v1755_v37 = vsub.f32 %v1728_v22, %v1754_v36  ;;  %1820 = vmatmul.f32.vlgmr.msrb.gmra.mxu1 %v1754_v36  ;;  %v5717_v22 = vld [vmem:[#allocation16_spill] sm:$0xff] }
 0x995   :  { %2108 = vmatpush.msrb.mxu1 %v4533_v58 }
 0x996   :  { %1858 = vmatmul.f32.vlgmr.msrb.gmra.mxu2 %v1755_v37  ;;  %v1756_v26 = vand.u32 4294901760, %v1755_v37 }
 0x997   :  { %2110 = vmatpush.msrb.mxu1 %v4535_v59  ;;  %2141 = vmatpush.msrb.mxu2 %v4568_v7 }
 0x998   :  { %1889 = vmatmul.f32.vlgmr.msrb.gmra.mxu3 %v1756_v26  ;;  %v1757_v23 = vsub.f32 %v1755_v37, %v1756_v26 }
 0x999   :  { %2112 = vmatpush.msrb.mxu1 %v4537_v60  ;;  %2145 = vmatpush.msrb.mxu2 %v4571_v8 }
 0x99a   :  { %2184 = vmatpush.msrb.mxu3 %v4533_v58  ;;  %v1758_v38 = vand.u32 4294901760, %v1757_v23  ;;  %v5721_v23 = vld [vmem:[#allocation18_spill] sm:$0xff] }
 0x99b   :  { %2114 = vmatpush.msrb.mxu1 %v4613_v29  ;;  %2149 = vmatpush.msrb.mxu2 %v4574_v10 }
 0x99c   :  { %2186 = vmatpush.msrb.mxu3 %v4535_v59  ;;  %1759 = vmatmul.f32.vlgmr.msrb.gmra.mxu0 %v1758_v38 }
 0x99d   :  { %1963 = vmatmul.f32.vlgmr.msra.gmra.mxu1 %v1754_v36  ;;  %2071 = vmatpush.msrb.mxu0 %v4551_v0 }
 0x99e   :  { %2116 = vmatpush.msrb.mxu1 %v4634_v46  ;;  %2153 = vmatpush.msrb.mxu2 %v4641_v51 }
 0x99f   :  { %2188 = vmatpush.msrb.mxu3 %v4537_v60  ;;  %1996 = vmatmul.f32.vlgmr.msra.gmra.mxu2 %v1758_v38  ;;  %v5722_v38 = vld [vmem:[#allocation32_spill] sm:$0xff] }
 0x9a0   :  { %2074 = vmatpush.msrb.mxu0 %v4554_v1  ;;  %2118 = vmatpush.msrb.mxu1 %v4643_v54 }
 0x9a1   :  { %2157 = vmatpush.msrb.mxu2 %v4652_v11  ;;  %2190 = vmatpush.msrb.mxu3 %v4613_v29 }
 0x9a2   :  { %2057 = vmatmul.f32.vlgmr.msra.gmra.mxu3 %v1754_v36  ;;  %2077 = vmatpush.msrb.mxu0 %v4557_v3 }
 0x9a3   :  { %2120 = vmatpush.msrb.mxu1 %v4654_v13  ;;  %2161 = vmatpush.msrb.mxu2 %v4665_v45 }
 0x9a4   :  { %2192 = vmatpush.msrb.mxu3 %v4634_v46  ;;  %2080 = vmatpush.msrb.mxu0 %v4637_v49 }
 0x9a5   :  { %2122 = vmatpush.msrb.mxu1 %v4667_v9  ;;  %2165 = vmatpush.msrb.mxu2 %v4682_v2 }
 0x9a6   :  { %2194 = vmatpush.msrb.mxu3 %v4643_v54  ;;  %1934 = vmatmul.f32.vlgmr.msra.gmra.mxu0 %v1754_v36 }
 0x9a7   :  { %2126 = vmatmul.f32.vlgmr.msrb.gmra.mxu1 %v1756_v26  ;;  %2083 = vmatpush.msrb.mxu0 %v4646_v55  ;;  %v5720_v26 = vld [vmem:[#allocation31_spill] sm:$0xff] }
 0x9a8   :  { %2169 = vmatpush.msrb.mxu2 %v4688_v61  ;;  %2196 = vmatpush.msrb.mxu3 %v4654_v13 }
 0x9a9   :  { %2171 = vmatmul.f32.vlgmr.msrb.gmra.mxu2 %v1754_v36  ;;  %2086 = vmatpush.msrb.mxu0 %v4657_v15 }
 0x9aa   :  { %2198 = vmatpush.msrb.mxu3 %v4667_v9  ;;  %2304 = vmatpush.msra.mxu1 %v4515_v52 }
 0x9ab   :  { %2200 = vmatmul.f32.vlgmr.msrb.gmra.mxu3 %v1754_v36  ;;  %2089 = vmatpush.msrb.mxu0 %v4670_v14  ;;  %v5718_v36 = vld [vmem:[#allocation30_spill] sm:$0xff] }
 0x9ac   :  { %2310 = vmatpush.msra.mxu1 %v4517_v53  ;;  %2362 = vmatpush.msra.mxu2 %v4456_v30 }
 0x9ad   :  { %2092 = vmatpush.msrb.mxu0 %v4679_v4  ;;  %2399 = vmatpush.msra.mxu3 %v4443_v19 }
 0x9ae   :  { %2095 = vmatmul.f32.vlgmr.msrb.gmra.mxu0 %v1755_v37  ;;  %2316 = vmatpush.msra.mxu1 %v4530_v57  ;;  %v5719_v37 = vld [vmem:[#allocation17_spill] sm:$0xff] }
 0x9af   :  { %2365 = vmatpush.msra.mxu2 %v4459_v31  ;;  %2401 = vmatpush.msra.mxu3 %v4445_v20 }
 0x9b0   :  { %2322 = vmatpush.msra.mxu1 %v4547_v63  ;;  %2267 = vmatpush.msra.mxu0 %v4443_v19 }
 0x9b1   :  { %2368 = vmatpush.msra.mxu2 %v4462_v32  ;;  %2403 = vmatpush.msra.mxu3 %v4447_v21 }
 0x9b2   :  { %2328 = vmatpush.msra.mxu1 %v4564_v6  ;;  %2269 = vmatpush.msra.mxu0 %v4445_v20 }
 0x9b3   :  { %2371 = vmatpush.msra.mxu2 %v4469_v34  ;;  %2405 = vmatpush.msra.mxu3 %v4449_v25 }
 0x9b4   :  { %2334 = vmatpush.msra.mxu1 %v4581_v12  ;;  %2271 = vmatpush.msra.mxu0 %v4447_v21 }
 0x9b5   :  { %2374 = vmatpush.msra.mxu2 %v5677_v48  ;;  %2407 = vmatpush.msra.mxu3 %v5678_v28 }
 0x9b6   :  { %2340 = vmatpush.msra.mxu1 %v5703_v35  ;;  %2273 = vmatpush.msra.mxu0 %v4449_v25 }
 0x9b7   :  { %2377 = vmatpush.msra.mxu2 %v5704_v24  ;;  %2409 = vmatpush.msra.mxu3 %v5705_v47 }
 0x9b8   :  { %2346 = vmatpush.msra.mxu1 %v5706_v18  ;;  %2275 = vmatpush.msra.mxu0 %v5678_v28 }
 0x9b9   :  { %2380 = vmatpush.msra.mxu2 %v5707_v50  ;;  %2411 = vmatpush.msra.mxu3 %v5708_v33 }
 0x9ba   :  { %2475 = vmatpush.msrb.mxu1 %v4443_v19  ;;  %2277 = vmatpush.msra.mxu0 %v5705_v47 }
 0x9bb   :  { %2383 = vmatpush.msra.mxu2 %v5709_v16  ;;  %2413 = vmatpush.msra.mxu3 %v5710_v40 }
 0x9bc   :  { %2477 = vmatpush.msrb.mxu1 %v4445_v20  ;;  %2279 = vmatpush.msra.mxu0 %v5708_v33 }
 0x9bd   :  { %2504 = vmatpush.msrb.mxu2 %v4533_v58  ;;  %2541 = vmatpush.msrb.mxu3 %v5711_v41 }
 0x9be   :  { %2479 = vmatpush.msrb.mxu1 %v4447_v21  ;;  %2281 = vmatpush.msra.mxu0 %v5710_v40 }
 0x9bf   :  { %2506 = vmatpush.msrb.mxu2 %v4535_v59  ;;  %2547 = vmatpush.msrb.mxu3 %v5712_v17 }
 0x9c0   :  { %2481 = vmatpush.msrb.mxu1 %v4449_v25  ;;  %2432 = vmatpush.msrb.mxu0 %v5713_v56 }
 0x9c1   :  { %2508 = vmatpush.msrb.mxu2 %v4537_v60  ;;  %2553 = vmatpush.msrb.mxu3 %v5714_v27 }
 0x9c2   :  { %2483 = vmatpush.msrb.mxu1 %v5678_v28  ;;  %2436 = vmatpush.msrb.mxu0 %v5715_v43  ;;  %v5725_v43 = vld [vmem:[#allocation22_spill] sm:$0xff] }
 0x9c3   :  { %2510 = vmatpush.msrb.mxu2 %v4613_v29  ;;  %2559 = vmatpush.msrb.mxu3 %v5716_v5  ;;  %v5724_v5 = vld [vmem:[#allocation33_spill] sm:$0xff] }
 0x9c4   :  { %2485 = vmatpush.msrb.mxu1 %v5705_v47  ;;  %2440 = vmatpush.msrb.mxu0 %v5717_v22  ;;  %v5723_v22 = vld [vmem:[#allocation20_spill] sm:$0xff] }
 0x9c5   :  { %2512 = vmatpush.msrb.mxu2 %v4634_v46  ;;  %2565 = vmatpush.msrb.mxu3 %v5718_v36  ;;  %v5726_v36 = vld [vmem:[#allocation23_spill] sm:$0xff] }
 0x9c6   :  { %2487 = vmatpush.msrb.mxu1 %v5708_v33  ;;  %2444 = vmatpush.msrb.mxu0 %v5719_v37 }
 0x9c7   :  { %2514 = vmatpush.msrb.mxu2 %v4643_v54  ;;  %2571 = vmatpush.msrb.mxu3 %v5720_v26 }
 0x9c8   :  { %2489 = vmatpush.msrb.mxu1 %v5710_v40  ;;  %2448 = vmatpush.msrb.mxu0 %v5721_v23  ;;  %v82_v40 = vpop.permute.xlu2 %81 }
 0x9c9   :  { %2516 = vmatpush.msrb.mxu2 %v4654_v13  ;;  %2577 = vmatpush.msrb.mxu3 %v5722_v38  ;;  %v103_v23 = vmul.f32 %v5043_v39, %v82_v40 }
 0x9ca   :  { %2452 = vmatpush.msrb.mxu0 %v5723_v22 }
 0x9cb   :  { %2518 = vmatpush.msrb.mxu2 %v4667_v9  ;;  %2583 = vmatpush.msrb.mxu3 %v5724_v5  ;;  %v111_v5 = vadd.f32 %v5046_v44, %v103_v23 }
 0x9cc   :  { %2456 = vmatpush.msrb.mxu0 %v5725_v43 }
 0x9ce   :  { %2460 = vmatpush.msrb.mxu0 %v5726_v36 }
 0xa11   :  { %v1821_v37 = vpop.f32.mrf.mxu1 }
 0xa19   :  { %v1760_v27 = vpop.f32.mrf.mxu0  ;;  %v1859_v17 = vpop.f32.mrf.mxu2 }
 0xa1a   :  { %v1822_v56 = vadd.f32 %v1821_v37, %v1760_v27  ;;  %v1964_v33 = vpop.f32.mrf.mxu1 }
 0xa1b   :  { %v1890_v41 = vpop.f32.mrf.mxu3 }
 0xa1c   :  { %v1860_v26 = vadd.f32 %v1859_v17, %v1822_v56 }
 0xa1e   :  { %v1891_v16 = vadd.f32 %v1890_v41, %v1860_v26 }
 0xa22   :  { %v1997_v22 = vpop.f32.mrf.mxu2 }
 0xa23   :  { %v1935_v38 = vpop.f32.mrf.mxu0 }
 0xa24   :  { %v1936_v50 = vadd.f32 %v1935_v38, %v1891_v16  ;;  %v2127_v37 = vpop.f32.mrf.mxu1  ;;  %v5170_v16 = vld [vmem:[#allocation2 + $0x81] ss:$0 sm:$0xff] }
 0xa25   :  { %v2058_v43 = vpop.f32.mrf.mxu3 }
 0xa26   :  { %v1965_v18 = vadd.f32 %v1964_v33, %v1936_v50  ;;  %v2059_v36 = vadd.f32 %v2058_v43, %v1997_v22 }
 0xa28   :  { %v2225_v47 = vadd.f32 %v1965_v18, %v111_v5 }
 0xa2a   :  { %4332 = vtanh.f32 %v2225_v47 }
 0xa2b   :  { %v2096_v24 = vpop.f32.mrf.mxu0 }
 0xa2c   :  { %v2097_v27 = vadd.f32 %v2096_v24, %v2059_v36  ;;  %v2172_v17 = vpop.f32.mrf.mxu2 }
 0xa2e   :  { %v2128_v35 = vadd.f32 %v2127_v37, %v2097_v27  ;;  %v2201_v40 = vpop.f32.mrf.mxu3 }
 0xa30   :  { %v4333_v56 = vpop.eup %4332  ;;  %v2173_v28 = vadd.f32 %v2172_v17, %v2128_v35 }
 0xa31   :  { %2231 = vrot.lane.b32.xlu1 %v4333_v56, %s4404_s1  ;;  %v2227_v47 = vmul.f32 0.5, %v4333_v56 }
 0xa32   :  { %v2202_v41 = vadd.f32 %v2201_v40, %v2173_v28 }
 0xa33   :  { %v2228_v18 = vadd.f32 0.5, %v2227_v47 }
 0xa34   :  { %v2204_v26 = vadd.f32 %v5170_v16, %v2202_v41 }
 0xa35   :  { %v2229_v27 = vmul.f32 %v2228_v18, %v5060_v42 }
 0xa36   :  { %4334 = vtanh.f32 %v2204_v26 }
 0xa3c   :  { %v4335_v50 = vpop.eup %4334 }
 0xa3d   :  { %2210 = vrot.lane.b32.xlu0 %v4335_v50, %s4404_s1  ;;  %v2206_v43 = vmul.f32 0.5, %v4335_v50 }
 0xa3f   :  { %v2207_v35 = vadd.f32 0.5, %v2206_v43 }
 0xa41   :  { %v2208_v28 = vmul.f32 %v2207_v35, %v5055_v62  ;;  %v56_v62 = vld [vmem:[%s5539_s0 + $0x28] sm:$0xff] }
 0xaa3   :  { %v2232_v24 = vpop.permute.xlu1 %2231 }
 0xaa4   :  { %v2234_v33 = vmul.f32 %v2232_v24, %v2228_v18 }
 0xaa6   :  { %2236 = vrot.lane.b32.xlu0 %v2234_v33, %s4405_s18 }
 0xaaf   :  { %v2211_v5 = vpop.permute.xlu0 %2210 }
 0xab0   :  { %v2213_v22 = vmul.f32 %v2211_v5, %v2207_v35 }
 0xab2   :  { %2215 = vrot.lane.b32.xlu2 %v2213_v22, %s4405_s18 }
 0xb0c   :  { %v2216_v36 = vpop.permute.xlu2 %2215 }
 0xb0d   :  { %v5177_v23 = vadd.f32 %v2216_v36, %v2208_v28  ;;  %v5727_v28 = vld [vmem:[#allocation8_spill] sm:$0xff] }
 0xb0e   :  { %v5728_v36 = vld [vmem:[#allocation24_spill] sm:$0xff] }
 0xb0f   :  { %4336 = vtanh.f32 %v5177_v23 }
 0xb15   :  { %v4337_v38 = vpop.eup %4336 }
 0xb16   :  { %2221 = vrot.lane.b32.xlu1 %v4337_v38, %s4404_s1  ;;  %v5729_v38 = vld [vmem:[#allocation12_spill] sm:$0xff] }
 0xb18   :  { %v2237_v37 = vpop.permute.xlu0 %2236 }
 0xb19   :  { %v5182_v17 = vadd.f32 %v2237_v37, %v2229_v27  ;;  %v5730_v27 = vld [vmem:[#allocation9_spill] sm:$0xff]  ;;  %v5731_v37 = vld [vmem:[#allocation27_spill] sm:$0xff] }
 0xb1b   :  { %4338 = vtanh.f32 %v5182_v17 }
 0xb21   :  { %v4339_v56 = vpop.eup %4338 }
 0xb22   :  { %2242 = vrot.lane.b32.xlu2 %v4339_v56, %s4404_s1  ;;  %v5732_v56 = vld [vmem:[#allocation19_spill] sm:$0xff] }
 0xb2a   :  { %86 = vperm.xlu2 %4303, %v56_v62   ;;  %v5733_v62 = vld [vmem:[#allocation10_spill] sm:$0xff] }
 0xb7c   :  { %v2243_v40 = vpop.permute.xlu2 %2242 }
 0xb7d   :  { %v2245_v41 = vmul.f32 %v2243_v40, %v2228_v18  ;;  %v5734_v40 = vld [vmem:[#allocation21_spill] sm:$0xff] }
 0xb7f   :  { %2247 = vrot.lane.b32.xlu0 %v2245_v41, %s4405_s18  ;;  %v5735_v41 = vld [vmem:[#allocation13_spill] sm:$0xff] }
 0xb88   :  { %v2222_v26 = vpop.permute.xlu1 %2221 }
 0xb89   :  { %v2224_v50 = vmul.f32 %v2222_v26, %v2207_v35  ;;  %v5736_v26 = vld [vmem:[#allocation25_spill] sm:$0xff] }
 0xb8b   :  { %2251 = vrot.lane.b32.xlu1 %v2224_v50, %s4404_s1  ;;  %v5737_v50 = vld [vmem:[#allocation26_spill] sm:$0xff] }
 0xbf1   :  { %v2248_v42 = vpop.permute.xlu0 %2247 }
 0xbfd   :  { %v2252_v47 = vpop.permute.xlu1 %2251 }
 0xbfe   :  { %v2254_v24 = vsel %vm140_vm0, %v2248_v42, %v2252_v47  ;;  %v5738_v42 = vld [vmem:[#allocation14_spill] sm:$0xff]  ;;  %v5739_v47 = vld [vmem:[#allocation28_spill] sm:$0xff] }
 0xbff   :  { %v2256_v33 = vsel %vm142_vm1, %v2254_v24, 0  ;;  %v5740_v24 = vld [vmem:[#allocation15_spill] sm:$0xff] }
 0xc00   :  { %v2282_v43 = vand.u32 4294901760, %v2256_v33 }
 0xc02   :  { %v2283_v5 = vsub.f32 %v2256_v33, %v2282_v43  ;;  %2348 = vmatmul.f32.vlgmr.msra.gmra.mxu1 %v2282_v43  ;;  %v5741_v33 = vld [vmem:[#allocation29_spill] sm:$0xff] }
 0xc03   :  { %2636 = vmatpush.msra.mxu1 %v4533_v58 }
 0xc04   :  { %2386 = vmatmul.f32.vlgmr.msra.gmra.mxu2 %v2283_v5  ;;  %v2284_v22 = vand.u32 4294901760, %v2283_v5 }
 0xc05   :  { %2638 = vmatpush.msra.mxu1 %v4535_v59  ;;  %2669 = vmatpush.msra.mxu2 %v4568_v7 }
 0xc06   :  { %2417 = vmatmul.f32.vlgmr.msra.gmra.mxu3 %v2284_v22  ;;  %v2285_v18 = vsub.f32 %v2283_v5, %v2284_v22 }
 0xc07   :  { %2640 = vmatpush.msra.mxu1 %v4537_v60  ;;  %2673 = vmatpush.msra.mxu2 %v4571_v8 }
 0xc08   :  { %2712 = vmatpush.msra.mxu3 %v4533_v58  ;;  %v2286_v35 = vand.u32 4294901760, %v2285_v18  ;;  %v5745_v18 = vld [vmem:[#allocation31_spill] sm:$0xff] }
 0xc09   :  { %2642 = vmatpush.msra.mxu1 %v4613_v29  ;;  %2677 = vmatpush.msra.mxu2 %v4574_v10 }
 0xc0a   :  { %2714 = vmatpush.msra.mxu3 %v4535_v59  ;;  %2287 = vmatmul.f32.vlgmr.msra.gmra.mxu0 %v2286_v35 }
 0xc0b   :  { %2491 = vmatmul.f32.vlgmr.msrb.gmra.mxu1 %v2282_v43  ;;  %2599 = vmatpush.msra.mxu0 %v4551_v0 }
 0xc0c   :  { %2644 = vmatpush.msra.mxu1 %v4634_v46  ;;  %2681 = vmatpush.msra.mxu2 %v4641_v51 }
 0xc0d   :  { %2716 = vmatpush.msra.mxu3 %v4537_v60  ;;  %2524 = vmatmul.f32.vlgmr.msrb.gmra.mxu2 %v2286_v35  ;;  %v5746_v35 = vld [vmem:[#allocation18_spill] sm:$0xff] }
 0xc0e   :  { %2602 = vmatpush.msra.mxu0 %v4554_v1  ;;  %2646 = vmatpush.msra.mxu1 %v4643_v54 }
 0xc0f   :  { %2685 = vmatpush.msra.mxu2 %v4652_v11  ;;  %2718 = vmatpush.msra.mxu3 %v4613_v29 }
 0xc10   :  { %2585 = vmatmul.f32.vlgmr.msrb.gmra.mxu3 %v2282_v43  ;;  %2605 = vmatpush.msra.mxu0 %v4557_v3 }
 0xc11   :  { %2648 = vmatpush.msra.mxu1 %v4654_v13  ;;  %2689 = vmatpush.msra.mxu2 %v4665_v45 }
 0xc12   :  { %2720 = vmatpush.msra.mxu3 %v4634_v46  ;;  %2608 = vmatpush.msra.mxu0 %v4637_v49 }
 0xc13   :  { %2650 = vmatpush.msra.mxu1 %v4667_v9  ;;  %2693 = vmatpush.msra.mxu2 %v4682_v2 }
 0xc14   :  { %2722 = vmatpush.msra.mxu3 %v4643_v54  ;;  %2462 = vmatmul.f32.vlgmr.msrb.gmra.mxu0 %v2282_v43 }
 0xc15   :  { %2654 = vmatmul.f32.vlgmr.msra.gmra.mxu1 %v2284_v22  ;;  %2611 = vmatpush.msra.mxu0 %v4646_v55  ;;  %v5744_v22 = vld [vmem:[#allocation17_spill] sm:$0xff] }
 0xc16   :  { %2697 = vmatpush.msra.mxu2 %v4688_v61  ;;  %2724 = vmatpush.msra.mxu3 %v4654_v13 }
 0xc17   :  { %2699 = vmatmul.f32.vlgmr.msra.gmra.mxu2 %v2282_v43  ;;  %2614 = vmatpush.msra.mxu0 %v4657_v15 }
 0xc18   :  { %2726 = vmatpush.msra.mxu3 %v4667_v9  ;;  %2832 = vmatpush.msrb.mxu1 %v4515_v52 }
 0xc19   :  { %2728 = vmatmul.f32.vlgmr.msra.gmra.mxu3 %v2282_v43  ;;  %2617 = vmatpush.msra.mxu0 %v4670_v14  ;;  %v5742_v43 = vld [vmem:[#allocation16_spill] sm:$0xff] }
 0xc1a   :  { %2838 = vmatpush.msrb.mxu1 %v4517_v53  ;;  %2890 = vmatpush.msrb.mxu2 %v4456_v30 }
 0xc1b   :  { %2620 = vmatpush.msra.mxu0 %v4679_v4  ;;  %2927 = vmatpush.msrb.mxu3 %v4443_v19 }
 0xc1c   :  { %2623 = vmatmul.f32.vlgmr.msra.gmra.mxu0 %v2283_v5  ;;  %2844 = vmatpush.msrb.mxu1 %v4530_v57  ;;  %v5743_v5 = vld [vmem:[#allocation30_spill] sm:$0xff] }
 0xc1d   :  { %2893 = vmatpush.msrb.mxu2 %v4459_v31  ;;  %2929 = vmatpush.msrb.mxu3 %v4445_v20 }
 0xc1e   :  { %2850 = vmatpush.msrb.mxu1 %v4547_v63  ;;  %2795 = vmatpush.msrb.mxu0 %v4443_v19 }
 0xc1f   :  { %2896 = vmatpush.msrb.mxu2 %v4462_v32  ;;  %2931 = vmatpush.msrb.mxu3 %v4447_v21 }
 0xc20   :  { %2856 = vmatpush.msrb.mxu1 %v4564_v6  ;;  %2797 = vmatpush.msrb.mxu0 %v4445_v20 }
 0xc21   :  { %2899 = vmatpush.msrb.mxu2 %v4469_v34  ;;  %2933 = vmatpush.msrb.mxu3 %v4449_v25 }
 0xc22   :  { %2862 = vmatpush.msrb.mxu1 %v4581_v12  ;;  %2799 = vmatpush.msrb.mxu0 %v4447_v21 }
 0xc23   :  { %2902 = vmatpush.msrb.mxu2 %v5677_v48  ;;  %2935 = vmatpush.msrb.mxu3 %v5727_v28 }
 0xc24   :  { %2868 = vmatpush.msrb.mxu1 %v5728_v36  ;;  %2801 = vmatpush.msrb.mxu0 %v4449_v25 }
 0xc25   :  { %2905 = vmatpush.msrb.mxu2 %v5729_v38  ;;  %2937 = vmatpush.msrb.mxu3 %v5730_v27 }
 0xc26   :  { %2874 = vmatpush.msrb.mxu1 %v5731_v37  ;;  %2803 = vmatpush.msrb.mxu0 %v5727_v28 }
 0xc27   :  { %2908 = vmatpush.msrb.mxu2 %v5732_v56  ;;  %2939 = vmatpush.msrb.mxu3 %v5733_v62 }
 0xc28   :  { %3003 = vmatpush.msra.mxu1 %v4443_v19  ;;  %2805 = vmatpush.msrb.mxu0 %v5730_v27 }
 0xc29   :  { %2911 = vmatpush.msrb.mxu2 %v5734_v40  ;;  %2941 = vmatpush.msrb.mxu3 %v5735_v41  ;;  %v87_v40 = vpop.permute.xlu2 %86 }
 0xc2a   :  { %3005 = vmatpush.msra.mxu1 %v4445_v20  ;;  %2807 = vmatpush.msrb.mxu0 %v5733_v62 }
 0xc2b   :  { %3032 = vmatpush.msra.mxu2 %v4533_v58  ;;  %3069 = vmatpush.msra.mxu3 %v5736_v26 }
 0xc2c   :  { %3007 = vmatpush.msra.mxu1 %v4447_v21  ;;  %2809 = vmatpush.msrb.mxu0 %v5735_v41 }
 0xc2d   :  { %3034 = vmatpush.msra.mxu2 %v4535_v59  ;;  %3075 = vmatpush.msra.mxu3 %v5737_v50 }
 0xc2e   :  { %3009 = vmatpush.msra.mxu1 %v4449_v25  ;;  %2960 = vmatpush.msra.mxu0 %v5738_v42 }
 0xc2f   :  { %3036 = vmatpush.msra.mxu2 %v4537_v60  ;;  %3081 = vmatpush.msra.mxu3 %v5739_v47  ;;  %v5750_v47 = vld [vmem:[#allocation22_spill] sm:$0xff] }
 0xc30   :  { %3011 = vmatpush.msra.mxu1 %v5727_v28  ;;  %2964 = vmatpush.msra.mxu0 %v5740_v24  ;;  %v5749_v24 = vld [vmem:[#allocation33_spill] sm:$0xff] }
 0xc31   :  { %3038 = vmatpush.msra.mxu2 %v4613_v29  ;;  %3087 = vmatpush.msra.mxu3 %v5741_v33  ;;  %v5747_v33 = vld [vmem:[#allocation32_spill] sm:$0xff] }
 0xc32   :  { %3013 = vmatpush.msra.mxu1 %v5730_v27  ;;  %2968 = vmatpush.msra.mxu0 %v5742_v43  ;;  %v5748_v43 = vld [vmem:[#allocation20_spill] sm:$0xff] }
 0xc33   :  { %3040 = vmatpush.msra.mxu2 %v4634_v46  ;;  %3093 = vmatpush.msra.mxu3 %v5743_v5  ;;  %v5751_v5 = vld [vmem:[#allocation23_spill] sm:$0xff] }
 0xc34   :  { %3015 = vmatpush.msra.mxu1 %v5733_v62  ;;  %2972 = vmatpush.msra.mxu0 %v5744_v22 }
 0xc35   :  { %3042 = vmatpush.msra.mxu2 %v4643_v54  ;;  %3099 = vmatpush.msra.mxu3 %v5745_v18 }
 0xc36   :  { %3017 = vmatpush.msra.mxu1 %v5735_v41  ;;  %2976 = vmatpush.msra.mxu0 %v5746_v35  ;;  %v104_v35 = vmul.f32 %v5043_v39, %v87_v40 }
 0xc37   :  { %3044 = vmatpush.msra.mxu2 %v4654_v13  ;;  %3105 = vmatpush.msra.mxu3 %v5747_v33 }
 0xc38   :  { %2980 = vmatpush.msra.mxu0 %v5748_v43 }
 0xc39   :  { %3046 = vmatpush.msra.mxu2 %v4667_v9  ;;  %3111 = vmatpush.msra.mxu3 %v5749_v24  ;;  %v112_v24 = vadd.f32 %v5046_v44, %v104_v35 }
 0xc3a   :  { %2984 = vmatpush.msra.mxu0 %v5750_v47 }
 0xc3c   :  { %2988 = vmatpush.msra.mxu0 %v5751_v5 }
 0xc7f   :  { %v2349_v22 = vpop.f32.mrf.mxu1 }
 0xc87   :  { %v2288_v42 = vpop.f32.mrf.mxu0  ;;  %v2387_v26 = vpop.f32.mrf.mxu2 }
 0xc88   :  { %v2350_v50 = vadd.f32 %v2349_v22, %v2288_v42  ;;  %v2492_v56 = vpop.f32.mrf.mxu1 }
 0xc89   :  { %v2418_v41 = vpop.f32.mrf.mxu3 }
 0xc8a   :  { %v2388_v18 = vadd.f32 %v2387_v26, %v2350_v50 }
 0xc8c   :  { %v2419_v62 = vadd.f32 %v2418_v41, %v2388_v18 }
 0xc90   :  { %v2525_v43 = vpop.f32.mrf.mxu2 }
 0xc91   :  { %v2463_v33 = vpop.f32.mrf.mxu0 }
 0xc92   :  { %v2464_v37 = vadd.f32 %v2463_v33, %v2419_v62  ;;  %v2655_v22 = vpop.f32.mrf.mxu1 }
 0xc93   :  { %v2586_v47 = vpop.f32.mrf.mxu3 }
 0xc94   :  { %v2493_v27 = vadd.f32 %v2492_v56, %v2464_v37  ;;  %v2587_v5 = vadd.f32 %v2586_v47, %v2525_v43 }
 0xc96   :  { %v2753_v38 = vadd.f32 %v2493_v27, %v112_v24 }
 0xc98   :  { %4340 = vtanh.f32 %v2753_v38 }
 0xc99   :  { %v2624_v36 = vpop.f32.mrf.mxu0 }
 0xc9a   :  { %v2625_v42 = vadd.f32 %v2624_v36, %v2587_v5  ;;  %v2700_v26 = vpop.f32.mrf.mxu2 }
 0xc9c   :  { %v2656_v28 = vadd.f32 %v2655_v22, %v2625_v42  ;;  %v2729_v39 = vpop.f32.mrf.mxu3 }
 0xc9e   :  { %v4341_v50 = vpop.eup %4340  ;;  %v2701_v48 = vadd.f32 %v2700_v26, %v2656_v28 }
 0xc9f   :  { %2759 = vrot.lane.b32.xlu1 %v4341_v50, %s4404_s1  ;;  %v2755_v27 = vmul.f32 0.5, %v4341_v50 }
 0xca0   :  { %v2730_v40 = vadd.f32 %v2729_v39, %v2701_v48 }
 0xca1   :  { %v2756_v38 = vadd.f32 0.5, %v2755_v27 }
 0xca2   :  { %v2732_v62 = vadd.f32 %v5170_v16, %v2730_v40 }
 0xca3   :  { %v2757_v5 = vmul.f32 %v2756_v38, %v5182_v17 }
 0xca4   :  { %4342 = vtanh.f32 %v2732_v62 }
 0xcaa   :  { %v4343_v44 = vpop.eup %4342 }
 0xcab   :  { %2738 = vrot.lane.b32.xlu0 %v4343_v44, %s4404_s1  ;;  %v2734_v36 = vmul.f32 0.5, %v4343_v44 }
 0xcad   :  { %v2735_v41 = vadd.f32 0.5, %v2734_v36 }
 0xcaf   :  { %v2736_v48 = vmul.f32 %v2735_v41, %v5177_v23  ;;  %v57_v23 = vld [vmem:[%s5539_s0 + $0x30] sm:$0xff] }
 0xd11   :  { %v2760_v37 = vpop.permute.xlu1 %2759 }
 0xd12   :  { %v2762_v56 = vmul.f32 %v2760_v37, %v2756_v38 }
 0xd14   :  { %2764 = vrot.lane.b32.xlu0 %v2762_v56, %s4405_s18 }
 0xd1d   :  { %v2739_v47 = vpop.permute.xlu0 %2738 }
 0xd1e   :  { %v2741_v28 = vmul.f32 %v2739_v47, %v2735_v41  ;;  %v5766_v47 = vld [vmem:[#allocation15_spill] sm:$0xff] }
 0xd20   :  { %2743 = vrot.lane.b32.xlu2 %v2741_v28, %s4405_s18  ;;  %v5768_v28 = vld [vmem:[#allocation16_spill] sm:$0xff] }
 0xd7a   :  { %v2744_v24 = vpop.permute.xlu2 %2743 }
 0xd7b   :  { %v5297_v33 = vadd.f32 %v2744_v24, %v2736_v48  ;;  %v5769_v48 = vld [vmem:[#allocation30_spill] sm:$0xff]  ;;  %v5770_v24 = vld [vmem:[#allocation17_spill] sm:$0xff] }
 0xd7d   :  { %4344 = vtanh.f32 %v5297_v33 }
 0xd83   :  { %v4345_v43 = vpop.eup %4344 }
 0xd84   :  { %2749 = vrot.lane.b32.xlu1 %v4345_v43, %s4404_s1  ;;  %v5771_v43 = vld [vmem:[#allocation31_spill] sm:$0xff] }
 0xd86   :  { %v2765_v18 = vpop.permute.xlu0 %2764 }
 0xd87   :  { %v5302_v35 = vadd.f32 %v2765_v18, %v2757_v5  ;;  %v5772_v5 = vld [vmem:[#allocation18_spill] sm:$0xff]  ;;  %v5773_v18 = vld [vmem:[#allocation32_spill] sm:$0xff] }
 0xd89   :  { %4346 = vtanh.f32 %v5302_v35 }
 0xd8f   :  { %v4347_v42 = vpop.eup %4346 }
 0xd90   :  { %2770 = vrot.lane.b32.xlu2 %v4347_v42, %s4404_s1  ;;  %v5774_v42 = vld [vmem:[#allocation20_spill] sm:$0xff] }
 0xd98   :  { %91 = vperm.xlu2 %4303, %v57_v23   ;;  %v5775_v23 = vld [vmem:[#allocation33_spill] sm:$0xff] }
 0xdea   :  { %v2771_v22 = vpop.permute.xlu2 %2770 }
 0xdeb   :  { %v2773_v26 = vmul.f32 %v2771_v22, %v2756_v38  ;;  %v5776_v22 = vld [vmem:[#allocation22_spill] sm:$0xff] }
 0xded   :  { %2775 = vrot.lane.b32.xlu0 %v2773_v26, %s4405_s18  ;;  %v5777_v26 = vld [vmem:[#allocation23_spill] sm:$0xff] }
 0xdf6   :  { %v2750_v50 = vpop.permute.xlu1 %2749 }
 0xdf7   :  { %v2752_v39 = vmul.f32 %v2750_v50, %v2735_v41  ;;  %v5762_v41 = vld [vmem:[#allocation25_spill] sm:$0xff] }
 0xdf9   :  { %2779 = vrot.lane.b32.xlu1 %v2752_v39, %s4404_s1 }
 0xe5f   :  { %v2776_v17 = vpop.permute.xlu0 %2775 }
 0xe6b   :  { %v2780_v40 = vpop.permute.xlu1 %2779 }
 0xe6c   :  { %v2782_v62 = vsel %vm140_vm0, %v2776_v17, %v2780_v40 }
 0xe6d   :  { %v2784_v44 = vsel %vm142_vm1, %v2782_v62, 0 }
 0xe6e   :  { %v2810_v27 = vand.u32 4294901760, %v2784_v44 }
 0xe70   :  { %v2811_v37 = vsub.f32 %v2784_v44, %v2810_v27  ;;  %2876 = vmatmul.f32.vlgmr.msrb.gmra.mxu1 %v2810_v27 }
 0xe71   :  { %3164 = vmatpush.msrb.mxu1 %v4533_v58 }
 0xe72   :  { %2914 = vmatmul.f32.vlgmr.msrb.gmra.mxu2 %v2811_v37  ;;  %v2812_v56 = vand.u32 4294901760, %v2811_v37 }
 0xe73   :  { %3166 = vmatpush.msrb.mxu1 %v4535_v59  ;;  %3197 = vmatpush.msrb.mxu2 %v4568_v7 }
 0xe74   :  { %2945 = vmatmul.f32.vlgmr.msrb.gmra.mxu3 %v2812_v56  ;;  %v2813_v38 = vsub.f32 %v2811_v37, %v2812_v56 }
 0xe75   :  { %3168 = vmatpush.msrb.mxu1 %v4537_v60  ;;  %3201 = vmatpush.msrb.mxu2 %v4571_v8 }
 0xe76   :  { %3240 = vmatpush.msrb.mxu3 %v4533_v58  ;;  %v2814_v36 = vand.u32 4294901760, %v2813_v38 }
 0xe77   :  { %3170 = vmatpush.msrb.mxu1 %v4613_v29  ;;  %3205 = vmatpush.msrb.mxu2 %v4574_v10 }
 0xe78   :  { %3242 = vmatpush.msrb.mxu3 %v4535_v59  ;;  %2815 = vmatmul.f32.vlgmr.msrb.gmra.mxu0 %v2814_v36 }
 0xe79   :  { %3019 = vmatmul.f32.vlgmr.msra.gmra.mxu1 %v2810_v27  ;;  %3127 = vmatpush.msrb.mxu0 %v4551_v0 }
 0xe7a   :  { %3172 = vmatpush.msrb.mxu1 %v4634_v46  ;;  %3209 = vmatpush.msrb.mxu2 %v4641_v51 }
 0xe7b   :  { %3244 = vmatpush.msrb.mxu3 %v4537_v60  ;;  %3052 = vmatmul.f32.vlgmr.msra.gmra.mxu2 %v2814_v36 }
 0xe7c   :  { %3130 = vmatpush.msrb.mxu0 %v4554_v1  ;;  %3174 = vmatpush.msrb.mxu1 %v4643_v54 }
 0xe7d   :  { %3213 = vmatpush.msrb.mxu2 %v4652_v11  ;;  %3246 = vmatpush.msrb.mxu3 %v4613_v29 }
 0xe7e   :  { %3113 = vmatmul.f32.vlgmr.msra.gmra.mxu3 %v2810_v27  ;;  %3133 = vmatpush.msrb.mxu0 %v4557_v3 }
 0xe7f   :  { %3176 = vmatpush.msrb.mxu1 %v4654_v13  ;;  %3217 = vmatpush.msrb.mxu2 %v4665_v45 }
 0xe80   :  { %3248 = vmatpush.msrb.mxu3 %v4634_v46  ;;  %3136 = vmatpush.msrb.mxu0 %v4637_v49 }
 0xe81   :  { %3178 = vmatpush.msrb.mxu1 %v4667_v9  ;;  %3221 = vmatpush.msrb.mxu2 %v4682_v2 }
 0xe82   :  { %3250 = vmatpush.msrb.mxu3 %v4643_v54  ;;  %2990 = vmatmul.f32.vlgmr.msra.gmra.mxu0 %v2810_v27 }
 0xe83   :  { %3182 = vmatmul.f32.vlgmr.msrb.gmra.mxu1 %v2812_v56  ;;  %3139 = vmatpush.msrb.mxu0 %v4646_v55 }
 0xe84   :  { %3225 = vmatpush.msrb.mxu2 %v4688_v61  ;;  %3252 = vmatpush.msrb.mxu3 %v4654_v13 }
 0xe85   :  { %3227 = vmatmul.f32.vlgmr.msrb.gmra.mxu2 %v2810_v27  ;;  %3142 = vmatpush.msrb.mxu0 %v4657_v15 }
 0xe86   :  { %3254 = vmatpush.msrb.mxu3 %v4667_v9  ;;  %3360 = vmatpush.msra.mxu1 %v4515_v52  ;;  %v5754_v52 = vld [vmem:[#allocation24_spill] sm:$0xff] }
 0xe87   :  { %3256 = vmatmul.f32.vlgmr.msrb.gmra.mxu3 %v2810_v27  ;;  %3145 = vmatpush.msrb.mxu0 %v4670_v14  ;;  %v92_v27 = vpop.permute.xlu2 %91 }
 0xe88   :  { %3366 = vmatpush.msra.mxu1 %v4517_v53  ;;  %3418 = vmatpush.msra.mxu2 %v4456_v30  ;;  %v5752_v30 = vld [vmem:[#allocation11_spill] sm:$0xff]  ;;  %v5756_v53 = vld [vmem:[#allocation9_spill] sm:$0xff] }
 0xe89   :  { %3148 = vmatpush.msrb.mxu0 %v4679_v4  ;;  %3455 = vmatpush.msra.mxu3 %v4443_v19 }
 0xe8a   :  { %3151 = vmatmul.f32.vlgmr.msrb.gmra.mxu0 %v2811_v37  ;;  %3372 = vmatpush.msra.mxu1 %v4530_v57  ;;  %v5757_v57 = vld [vmem:[#allocation27_spill] sm:$0xff] }
 0xe8b   :  { %3421 = vmatpush.msra.mxu2 %v4459_v31  ;;  %3457 = vmatpush.msra.mxu3 %v4445_v20  ;;  %v5753_v31 = vld [vmem:[#allocation8_spill] sm:$0xff]  ;;  %v5409_v37 = vld [vmem:[#allocation2 + $0x80] ss:$0 sm:$0xff] }
 0xe8c   :  { %3378 = vmatpush.msra.mxu1 %v4547_v63  ;;  %3323 = vmatpush.msra.mxu0 %v4443_v19  ;;  %v5759_v63 = vld [vmem:[#allocation10_spill] sm:$0xff]  ;;  %v105_v56 = vmul.f32 %v5409_v37, %v92_v27 }
 0xe8d   :  { %3424 = vmatpush.msra.mxu2 %v4462_v32  ;;  %3459 = vmatpush.msra.mxu3 %v4447_v21  ;;  %v5755_v32 = vld [vmem:[#allocation12_spill] sm:$0xff] }
 0xe8e   :  { %3384 = vmatpush.msra.mxu1 %v4564_v6  ;;  %3325 = vmatpush.msra.mxu0 %v4445_v20  ;;  %v5760_v6 = vld [vmem:[#allocation21_spill] sm:$0xff] }
 0xe8f   :  { %3427 = vmatpush.msra.mxu2 %v4469_v34  ;;  %3461 = vmatpush.msra.mxu3 %v4449_v25  ;;  %v5758_v34 = vld [vmem:[#allocation19_spill] sm:$0xff] }
 0xe90   :  { %3390 = vmatpush.msra.mxu1 %v4581_v12  ;;  %3327 = vmatpush.msra.mxu0 %v4447_v21  ;;  %v5761_v12 = vld [vmem:[#allocation13_spill] sm:$0xff] }
 0xe91   :  { %3430 = vmatpush.msra.mxu2 %v5752_v30  ;;  %3463 = vmatpush.msra.mxu3 %v5753_v31 }
 0xe92   :  { %3396 = vmatpush.msra.mxu1 %v5754_v52  ;;  %3329 = vmatpush.msra.mxu0 %v4449_v25 }
 0xe93   :  { %3433 = vmatpush.msra.mxu2 %v5755_v32  ;;  %3465 = vmatpush.msra.mxu3 %v5756_v53  ;;  %v5412_v32 = vld [vmem:[#allocation2 + $0x88] ss:$0 sm:$0xff] }
 0xe94   :  { %3402 = vmatpush.msra.mxu1 %v5757_v57  ;;  %3331 = vmatpush.msra.mxu0 %v5753_v31 }
 0xe95   :  { %3436 = vmatpush.msra.mxu2 %v5758_v34  ;;  %3467 = vmatpush.msra.mxu3 %v5759_v63 }
 0xe96   :  { %3531 = vmatpush.msrb.mxu1 %v4443_v19  ;;  %3333 = vmatpush.msra.mxu0 %v5756_v53  ;;  %v5763_v19 = vld [vmem:[#allocation26_spill] sm:$0xff] }
 0xe97   :  { %3439 = vmatpush.msra.mxu2 %v5760_v6  ;;  %3469 = vmatpush.msra.mxu3 %v5761_v12 }
 0xe98   :  { %3533 = vmatpush.msrb.mxu1 %v4445_v20  ;;  %3335 = vmatpush.msra.mxu0 %v5759_v63  ;;  %v5764_v20 = vld [vmem:[#allocation14_spill] sm:$0xff] }
 0xe99   :  { %3560 = vmatpush.msrb.mxu2 %v4533_v58  ;;  %3597 = vmatpush.msrb.mxu3 %v5762_v41 }
 0xe9a   :  { %3535 = vmatpush.msrb.mxu1 %v4447_v21  ;;  %3337 = vmatpush.msra.mxu0 %v5761_v12  ;;  %v5765_v21 = vld [vmem:[#allocation28_spill] sm:$0xff] }
 0xe9b   :  { %3562 = vmatpush.msrb.mxu2 %v4535_v59  ;;  %3603 = vmatpush.msrb.mxu3 %v5763_v19 }
 0xe9c   :  { %3537 = vmatpush.msrb.mxu1 %v4449_v25  ;;  %3488 = vmatpush.msrb.mxu0 %v5764_v20  ;;  %v5767_v25 = vld [vmem:[#allocation29_spill] sm:$0xff] }
 0xe9d   :  { %3564 = vmatpush.msrb.mxu2 %v4537_v60  ;;  %3609 = vmatpush.msrb.mxu3 %v5765_v21 }
 0xe9e   :  { %3539 = vmatpush.msrb.mxu1 %v5753_v31  ;;  %3492 = vmatpush.msrb.mxu0 %v5766_v47 }
 0xe9f   :  { %3566 = vmatpush.msrb.mxu2 %v4613_v29  ;;  %3615 = vmatpush.msrb.mxu3 %v5767_v25 }
 0xea0   :  { %3541 = vmatpush.msrb.mxu1 %v5756_v53  ;;  %3496 = vmatpush.msrb.mxu0 %v5768_v28  ;;  %v113_v53 = vadd.f32 %v5412_v32, %v105_v56 }
 0xea1   :  { %3568 = vmatpush.msrb.mxu2 %v4634_v46  ;;  %3621 = vmatpush.msrb.mxu3 %v5769_v48 }
 0xea2   :  { %3543 = vmatpush.msrb.mxu1 %v5759_v63  ;;  %3500 = vmatpush.msrb.mxu0 %v5770_v24 }
 0xea3   :  { %3570 = vmatpush.msrb.mxu2 %v4643_v54  ;;  %3627 = vmatpush.msrb.mxu3 %v5771_v43 }
 0xea4   :  { %3545 = vmatpush.msrb.mxu1 %v5761_v12  ;;  %3504 = vmatpush.msrb.mxu0 %v5772_v5 }
 0xea5   :  { %3572 = vmatpush.msrb.mxu2 %v4654_v13  ;;  %3633 = vmatpush.msrb.mxu3 %v5773_v18 }
 0xea6   :  { %3508 = vmatpush.msrb.mxu0 %v5774_v42 }
 0xea7   :  { %3574 = vmatpush.msrb.mxu2 %v4667_v9  ;;  %3639 = vmatpush.msrb.mxu3 %v5775_v23 }
 0xea8   :  { %3512 = vmatpush.msrb.mxu0 %v5776_v22 }
 0xeaa   :  { %3516 = vmatpush.msrb.mxu0 %v5777_v26 }
 0xeed   :  { %v2877_v50 = vpop.f32.mrf.mxu1 }
 0xef5   :  { %v2816_v39 = vpop.f32.mrf.mxu0  ;;  %v2915_v40 = vpop.f32.mrf.mxu2 }
 0xef6   :  { %v2878_v17 = vadd.f32 %v2877_v50, %v2816_v39  ;;  %v3020_v36 = vpop.f32.mrf.mxu1 }
 0xef7   :  { %v2946_v62 = vpop.f32.mrf.mxu3 }
 0xef8   :  { %v2916_v44 = vadd.f32 %v2915_v40, %v2878_v17 }
 0xefa   :  { %v2947_v38 = vadd.f32 %v2946_v62, %v2916_v44 }
 0xefe   :  { %v3053_v52 = vpop.f32.mrf.mxu2 }
 0xeff   :  { %v2991_v30 = vpop.f32.mrf.mxu0 }
 0xf00   :  { %v2992_v31 = vadd.f32 %v2991_v30, %v2947_v38  ;;  %v3183_v47 = vpop.f32.mrf.mxu1 }
 0xf01   :  { %v3114_v34 = vpop.f32.mrf.mxu3 }
 0xf02   :  { %v3021_v57 = vadd.f32 %v3020_v36, %v2992_v31  ;;  %v3115_v6 = vadd.f32 %v3114_v34, %v3053_v52 }
 0xf04   :  { %v3281_v63 = vadd.f32 %v3021_v57, %v113_v53 }
 0xf06   :  { %4348 = vtanh.f32 %v3281_v63 }
 0xf07   :  { %v3152_v12 = vpop.f32.mrf.mxu0 }
 0xf08   :  { %v3153_v20 = vadd.f32 %v3152_v12, %v3115_v6  ;;  %v3228_v24 = vpop.f32.mrf.mxu2 }
 0xf0a   :  { %v3184_v28 = vadd.f32 %v3183_v47, %v3153_v20  ;;  %v3257_v22 = vpop.f32.mrf.mxu3 }
 0xf0c   :  { %v4349_v5 = vpop.eup %4348  ;;  %v3229_v42 = vadd.f32 %v3228_v24, %v3184_v28 }
 0xf0d   :  { %3287 = vrot.lane.b32.xlu1 %v4349_v5, %s4404_s1  ;;  %v3283_v17 = vmul.f32 0.5, %v4349_v5 }
 0xf0e   :  { %v3258_v26 = vadd.f32 %v3257_v22, %v3229_v42 }
 0xf0f   :  { %v3284_v40 = vadd.f32 0.5, %v3283_v17 }
 0xf10   :  { %v3260_v50 = vadd.f32 %v5170_v16, %v3258_v26 }
 0xf11   :  { %v3285_v53 = vmul.f32 %v3284_v40, %v5302_v35 }
 0xf12   :  { %4350 = vtanh.f32 %v3260_v50 }
 0xf18   :  { %v4351_v39 = vpop.eup %4350 }
 0xf19   :  { %3266 = vrot.lane.b32.xlu0 %v4351_v39, %s4404_s1  ;;  %v3262_v27 = vmul.f32 0.5, %v4351_v39 }
 0xf1b   :  { %v3263_v56 = vadd.f32 0.5, %v3262_v27 }
 0xf1d   :  { %v3264_v30 = vmul.f32 %v3263_v56, %v5297_v33  ;;  %v58_v33 = vld [vmem:[%s5539_s0 + $0x38] sm:$0xff] }
 0xf7f   :  { %v3288_v62 = vpop.permute.xlu1 %3287 }
 0xf80   :  { %v3290_v44 = vmul.f32 %v3288_v62, %v3284_v40 }
 0xf82   :  { %3292 = vrot.lane.b32.xlu0 %v3290_v44, %s4405_s18 }
 0xf8b   :  { %v3267_v38 = vpop.permute.xlu0 %3266 }
 0xf8c   :  { %v3269_v36 = vmul.f32 %v3267_v38, %v3263_v56 }
 0xf8e   :  { %3271 = vrot.lane.b32.xlu2 %v3269_v36, %s4405_s18 }
 0xfe8   :  { %v3272_v31 = vpop.permute.xlu2 %3271 }
 0xfe9   :  { %v5421_v16 = vadd.f32 %v3272_v31, %v3264_v30 }
 0xfeb   :  { %4352 = vtanh.f32 %v5421_v16 }
 0xff1   :  { %v4353_v52 = vpop.eup %4352 }
 0xff2   :  { %3277 = vrot.lane.b32.xlu1 %v4353_v52, %s4404_s1 }
 0xff4   :  { %v3293_v57 = vpop.permute.xlu0 %3292 }
 0xff5   :  { %v5426_v34 = vadd.f32 %v3293_v57, %v3285_v53 }
 0xff7   :  { %4354 = vtanh.f32 %v5426_v34 }
 0xffd   :  { %v4355_v63 = vpop.eup %4354 }
 0xffe   :  { %3298 = vrot.lane.b32.xlu2 %v4355_v63, %s4404_s1 }
0x1006   :  { %96 = vperm.xlu2 %4303, %v58_v33  }
0x1058   :  { %v3299_v6 = vpop.permute.xlu2 %3298 }
0x1059   :  { %v3301_v12 = vmul.f32 %v3299_v6, %v3284_v40 }
0x105b   :  { %3303 = vrot.lane.b32.xlu0 %v3301_v12, %s4405_s18 }
0x1064   :  { %v3278_v20 = vpop.permute.xlu1 %3277 }
0x1065   :  { %v3280_v47 = vmul.f32 %v3278_v20, %v3263_v56 }
0x1067   :  { %3307 = vrot.lane.b32.xlu1 %v3280_v47, %s4404_s1 }
0x10cd   :  { %v3304_v35 = vpop.permute.xlu0 %3303 }
0x10d9   :  { %v3308_v28 = vpop.permute.xlu1 %3307 }
0x10da   :  { %v3310_v24 = vsel %vm140_vm0, %v3304_v35, %v3308_v28 }
0x10db   :  { %v3312_v5 = vsel %vm142_vm1, %v3310_v24, 0 }
0x10dc   :  { %v3338_v42 = vand.u32 4294901760, %v3312_v5 }
0x10de   :  { %v3339_v22 = vsub.f32 %v3312_v5, %v3338_v42  ;;  %3404 = vmatmul.f32.vlgmr.msra.gmra.mxu1 %v3338_v42 }
0x10df   :  { %3692 = vmatpush.msra.mxu1 %v4533_v58 }
0x10e0   :  { %3442 = vmatmul.f32.vlgmr.msra.gmra.mxu2 %v3339_v22  ;;  %v3340_v26 = vand.u32 4294901760, %v3339_v22 }
0x10e1   :  { %3694 = vmatpush.msra.mxu1 %v4535_v59  ;;  %3725 = vmatpush.msra.mxu2 %v4568_v7 }
0x10e2   :  { %3473 = vmatmul.f32.vlgmr.msra.gmra.mxu3 %v3340_v26  ;;  %v3341_v50 = vsub.f32 %v3339_v22, %v3340_v26 }
0x10e3   :  { %3696 = vmatpush.msra.mxu1 %v4537_v60  ;;  %3729 = vmatpush.msra.mxu2 %v4571_v8 }
0x10e4   :  { %3768 = vmatpush.msra.mxu3 %v4533_v58  ;;  %v3342_v39 = vand.u32 4294901760, %v3341_v50 }
0x10e5   :  { %3698 = vmatpush.msra.mxu1 %v4613_v29  ;;  %3733 = vmatpush.msra.mxu2 %v4574_v10 }
0x10e6   :  { %3770 = vmatpush.msra.mxu3 %v4535_v59  ;;  %3343 = vmatmul.f32.vlgmr.msra.gmra.mxu0 %v3342_v39 }
0x10e7   :  { %3547 = vmatmul.f32.vlgmr.msrb.gmra.mxu1 %v3338_v42  ;;  %3655 = vmatpush.msra.mxu0 %v4551_v0 }
0x10e8   :  { %3700 = vmatpush.msra.mxu1 %v4634_v46  ;;  %3737 = vmatpush.msra.mxu2 %v4641_v51 }
0x10e9   :  { %3772 = vmatpush.msra.mxu3 %v4537_v60  ;;  %3580 = vmatmul.f32.vlgmr.msrb.gmra.mxu2 %v3342_v39 }
0x10ea   :  { %3658 = vmatpush.msra.mxu0 %v4554_v1  ;;  %3702 = vmatpush.msra.mxu1 %v4643_v54 }
0x10eb   :  { %3741 = vmatpush.msra.mxu2 %v4652_v11  ;;  %3774 = vmatpush.msra.mxu3 %v4613_v29 }
0x10ec   :  { %3641 = vmatmul.f32.vlgmr.msrb.gmra.mxu3 %v3338_v42  ;;  %3661 = vmatpush.msra.mxu0 %v4557_v3 }
0x10ed   :  { %3704 = vmatpush.msra.mxu1 %v4654_v13  ;;  %3745 = vmatpush.msra.mxu2 %v4665_v45 }
0x10ee   :  { %3776 = vmatpush.msra.mxu3 %v4634_v46  ;;  %3664 = vmatpush.msra.mxu0 %v4637_v49 }
0x10ef   :  { %3706 = vmatpush.msra.mxu1 %v4667_v9  ;;  %3749 = vmatpush.msra.mxu2 %v4682_v2 }
0x10f0   :  { %3778 = vmatpush.msra.mxu3 %v4643_v54  ;;  %3518 = vmatmul.f32.vlgmr.msrb.gmra.mxu0 %v3338_v42 }
0x10f1   :  { %3710 = vmatmul.f32.vlgmr.msra.gmra.mxu1 %v3340_v26  ;;  %3667 = vmatpush.msra.mxu0 %v4646_v55 }
0x10f2   :  { %3753 = vmatpush.msra.mxu2 %v4688_v61  ;;  %3780 = vmatpush.msra.mxu3 %v4654_v13 }
0x10f3   :  { %3755 = vmatmul.f32.vlgmr.msra.gmra.mxu2 %v3338_v42  ;;  %3670 = vmatpush.msra.mxu0 %v4657_v15 }
0x10f4   :  { %3782 = vmatpush.msra.mxu3 %v4667_v9  ;;  %3888 = vmatpush.msrb.mxu1 %v5762_v41 }
0x10f5   :  { %3784 = vmatmul.f32.vlgmr.msra.gmra.mxu3 %v3338_v42  ;;  %3673 = vmatpush.msra.mxu0 %v4670_v14 }
0x10f6   :  { %3894 = vmatpush.msrb.mxu1 %v5763_v19  ;;  %3946 = vmatpush.msrb.mxu2 %v4551_v0 }
0x10f7   :  { %3676 = vmatpush.msra.mxu0 %v4679_v4  ;;  %3983 = vmatpush.msrb.mxu3 %v4533_v58 }
0x10f8   :  { %3679 = vmatmul.f32.vlgmr.msra.gmra.mxu0 %v3339_v22  ;;  %3900 = vmatpush.msrb.mxu1 %v5765_v21 }
0x10f9   :  { %3851 = vmatpush.msrb.mxu0 %v4533_v58  ;;  %3949 = vmatpush.msrb.mxu2 %v4554_v1  ;;  %v97_v1 = vpop.permute.xlu2 %96 }
0x10fa   :  { %3906 = vmatpush.msrb.mxu1 %v5767_v25  ;;  %3985 = vmatpush.msrb.mxu3 %v4535_v59  ;;  %v4373_v25 = vld [vmem:[#allocation2 + $0x81] ss:$0 sm:$0xff] }
0x10fb   :  { %3853 = vmatpush.msrb.mxu0 %v4535_v59  ;;  %3952 = vmatpush.msrb.mxu2 %v4557_v3  ;;  %v106_v3 = vmul.f32 %v5409_v37, %v97_v1 }
0x10fc   :  { %3912 = vmatpush.msrb.mxu1 %v5769_v48  ;;  %3987 = vmatpush.msrb.mxu3 %v4537_v60 }
0x10fd   :  { %3855 = vmatpush.msrb.mxu0 %v4537_v60  ;;  %3955 = vmatpush.msrb.mxu2 %v4637_v49  ;;  %v114_v49 = vadd.f32 %v5412_v32, %v106_v3 }
0x10fe   :  { %3918 = vmatpush.msrb.mxu1 %v5771_v43  ;;  %3989 = vmatpush.msrb.mxu3 %v4613_v29 }
0x10ff   :  { %3857 = vmatpush.msrb.mxu0 %v4613_v29  ;;  %3958 = vmatpush.msrb.mxu2 %v4646_v55 }
0x1100   :  { %3924 = vmatpush.msrb.mxu1 %v5773_v18  ;;  %3991 = vmatpush.msrb.mxu3 %v4634_v46 }
0x1101   :  { %3859 = vmatpush.msrb.mxu0 %v4634_v46  ;;  %3961 = vmatpush.msrb.mxu2 %v4657_v15 }
0x1102   :  { %3930 = vmatpush.msrb.mxu1 %v5775_v23  ;;  %3993 = vmatpush.msrb.mxu3 %v4643_v54 }
0x1103   :  { %3861 = vmatpush.msrb.mxu0 %v4643_v54  ;;  %3964 = vmatpush.msrb.mxu2 %v4670_v14 }
0x1104   :  { %4059 = vmatpush.msra.mxu1 %v4533_v58  ;;  %3995 = vmatpush.msrb.mxu3 %v4654_v13 }
0x1105   :  { %3863 = vmatpush.msrb.mxu0 %v4654_v13  ;;  %3967 = vmatpush.msrb.mxu2 %v4679_v4 }
0x1106   :  { %4061 = vmatpush.msra.mxu1 %v4535_v59  ;;  %3997 = vmatpush.msrb.mxu3 %v4667_v9 }
0x1107   :  { %3865 = vmatpush.msrb.mxu0 %v4667_v9 }
0x1108   :  { %4063 = vmatpush.msra.mxu1 %v4537_v60 }
0x1109   :  { %4016 = vmatpush.msra.mxu0 %v4568_v7 }
0x110a   :  { %4065 = vmatpush.msra.mxu1 %v4613_v29 }
0x110b   :  { %4020 = vmatpush.msra.mxu0 %v4571_v8 }
0x110c   :  { %4067 = vmatpush.msra.mxu1 %v4634_v46 }
0x110d   :  { %4024 = vmatpush.msra.mxu0 %v4574_v10 }
0x110e   :  { %4069 = vmatpush.msra.mxu1 %v4643_v54 }
0x110f   :  { %4028 = vmatpush.msra.mxu0 %v4641_v51 }
0x1110   :  { %4071 = vmatpush.msra.mxu1 %v4654_v13 }
0x1111   :  { %4032 = vmatpush.msra.mxu0 %v4652_v11 }
0x1112   :  { %4073 = vmatpush.msra.mxu1 %v4667_v9 }
0x1113   :  { %4036 = vmatpush.msra.mxu0 %v4665_v45 }
0x1115   :  { %4040 = vmatpush.msra.mxu0 %v4682_v2 }
0x1117   :  { %4044 = vmatpush.msra.mxu0 %v4688_v61 }
0x115b   :  { %v3405_v4 = vpop.f32.mrf.mxu1 }
0x1163   :  { %v3344_v14 = vpop.f32.mrf.mxu0  ;;  %v3443_v59 = vpop.f32.mrf.mxu2 }
0x1164   :  { %v3406_v58 = vadd.f32 %v3405_v4, %v3344_v14  ;;  %v3548_v8 = vpop.f32.mrf.mxu1 }
0x1165   :  { %v3474_v60 = vpop.f32.mrf.mxu3 }
0x1166   :  { %v3444_v0 = vadd.f32 %v3443_v59, %v3406_v58 }
0x1168   :  { %v3475_v7 = vadd.f32 %v3474_v60, %v3444_v0 }
0x116c   :  { %v3581_v46 = vpop.f32.mrf.mxu2 }
0x116d   :  { %v3519_v10 = vpop.f32.mrf.mxu0 }
0x116e   :  { %v3520_v29 = vadd.f32 %v3519_v10, %v3475_v7  ;;  %v3711_v15 = vpop.f32.mrf.mxu1 }
0x116f   :  { %v3642_v2 = vpop.f32.mrf.mxu3 }
0x1170   :  { %v3549_v51 = vadd.f32 %v3548_v8, %v3520_v29  ;;  %v3643_v55 = vadd.f32 %v3642_v2, %v3581_v46 }
0x1172   :  { %v3809_v54 = vadd.f32 %v3549_v51, %v114_v49 }
0x1174   :  { %4356 = vtanh.f32 %v3809_v54  ;;  %v50_v54 = vld [vmem:[#allocation2 + $0xc0] sm:$0xff] }
0x1175   :  { %v3680_v11 = vpop.f32.mrf.mxu0 }
0x1176   :  { %v3681_v13 = vadd.f32 %v3680_v11, %v3643_v55  ;;  %v3756_v9 = vpop.f32.mrf.mxu2  ;;  %v49_v55 = vld [vmem:[#allocation2 + $0xb0] sm:$0xff]  ;;  %v4117_v11 = vand.u32 4294901760, %v50_v54 }
0x1178   :  { %v3712_v45 = vadd.f32 %v3711_v15, %v3681_v13  ;;  %v3785_v19 = vpop.f32.mrf.mxu3  ;;  %v4119_v13 = vand.u32 4294901760, %v49_v55  ;;  %v4147_v15 = vsub.f32 %v50_v54, %v4117_v11  ;;  %4118 = vmatpush.msra.mxu2 %v4117_v11 }
0x117a   :  { %v4357_v61 = vpop.eup %4356  ;;  %v3757_v41 = vadd.f32 %v3756_v9, %v3712_v45  ;;  %v4153_v45 = vsub.f32 %v49_v55, %v4119_v13  ;;  %v4148_v9 = vand.u32 4294901760, %v4147_v15  ;;  %4120 = vmatpush.msra.mxu2 %v4119_v13 }
0x117b   :  { %3815 = vrot.lane.b32.xlu1 %v4357_v61, %s4404_s1  ;;  %v3811_v18 = vmul.f32 0.5, %v4357_v61 }
0x117c   :  { %v3786_v21 = vadd.f32 %v3785_v19, %v3757_v41  ;;  %v4154_v61 = vand.u32 4294901760, %v4153_v45  ;;  %v4149_v41 = vsub.f32 %v4147_v15, %v4148_v9 }
0x117d   :  { %v3812_v23 = vadd.f32 0.5, %v3811_v18  ;;  %v48_v18 = vld [vmem:[#allocation2 + $0xa0] sm:$0xff] }
0x117e   :  { %v3788_v48 = vadd.f32 %v4373_v25, %v3786_v21  ;;  %v4155_v19 = vsub.f32 %v4153_v45, %v4154_v61  ;;  %v4150_v21 = vand.u32 4294901760, %v4149_v41 }
0x117f   :  { %v3813_v30 = vmul.f32 %v3812_v23, %v5426_v34 }
0x1180   :  { %4358 = vtanh.f32 %v3788_v48  ;;  %4151 = vmatpush.msra.mxu3 %v4150_v21 }
0x1186   :  { %v4359_v43 = vpop.eup %4358 }
0x1187   :  { %3794 = vrot.lane.b32.xlu0 %v4359_v43, %s4404_s1  ;;  %v3790_v17 = vmul.f32 0.5, %v4359_v43 }
0x1189   :  { %v3791_v40 = vadd.f32 0.5, %v3790_v17 }
0x118b   :  { %v3792_v27 = vmul.f32 %v3791_v40, %v5421_v16 }
0x11ed   :  { %v3816_v37 = vpop.permute.xlu1 %3815 }
0x11ee   :  { %v3818_v32 = vmul.f32 %v3816_v37, %v3812_v23  ;;  %v47_v37 = vld [vmem:[#allocation2 + $0x90] sm:$0xff] }
0x11ef   :  { %v4123_v17 = vand.u32 4294901760, %v47_v37 }
0x11f0   :  { %3820 = vrot.lane.b32.xlu0 %v3818_v32, %s4405_s18 }
0x11f9   :  { %v3795_v62 = vpop.permute.xlu0 %3794 }
0x11fa   :  { %v3797_v44 = vmul.f32 %v3795_v62, %v3791_v40  ;;  %v4165_v62 = vsub.f32 %v47_v37, %v4123_v17 }
0x11fc   :  { %3799 = vrot.lane.b32.xlu2 %v3797_v44, %s4405_s18 }
0x1256   :  { %v3800_v56 = vpop.permute.xlu2 %3799 }
0x1257   :  { %v3802_v38 = vadd.f32 %v3800_v56, %v3792_v27  ;;  %v4166_v27 = vand.u32 4294901760, %v4165_v62 }
0x1259   :  { %4360 = vtanh.f32 %v3802_v38 }
0x125f   :  { %v4361_v36 = vpop.eup %4360 }
0x1260   :  { %3805 = vrot.lane.b32.xlu1 %v4361_v36, %s4404_s1 }
0x1262   :  { %v3821_v31 = vpop.permute.xlu0 %3820 }
0x1263   :  { %v3823_v52 = vadd.f32 %v3821_v31, %v3813_v30 }
0x1265   :  { %4362 = vtanh.f32 %v3823_v52 }
0x126b   :  { %v4363_v53 = vpop.eup %4362 }
0x126c   :  { %3826 = vrot.lane.b32.xlu2 %v4363_v53, %s4404_s1 }
0x12c6   :  { %v3827_v57 = vpop.permute.xlu2 %3826 }
0x12c7   :  { %v3829_v63 = vmul.f32 %v3827_v57, %v3812_v23  ;;  %v4121_v23 = vand.u32 4294901760, %v48_v18 }
0x12c9   :  { %3831 = vrot.lane.b32.xlu0 %v3829_v63, %s4405_s18  ;;  %v4159_v32 = vsub.f32 %v48_v18, %v4121_v23  ;;  %4122 = vmatpush.msra.mxu2 %v4121_v23 }
0x12cb   :  { %4124 = vmatpush.msra.mxu2 %v4123_v17 }
0x12d2   :  { %v3806_v33 = vpop.permute.xlu1 %3805 }
0x12d3   :  { %v3808_v16 = vmul.f32 %v3806_v33, %v3791_v40  ;;  %v4160_v40 = vand.u32 4294901760, %v4159_v32 }
0x12d5   :  { %3835 = vrot.lane.b32.xlu1 %v3808_v16, %s4404_s1  ;;  %v4161_v44 = vsub.f32 %v4159_v32, %v4160_v40 }
0x12d7   :  { %v4162_v56 = vand.u32 4294901760, %v4161_v44 }
0x133b   :  { %v3832_v6 = vpop.permute.xlu0 %3831 }
0x1347   :  { %v3836_v12 = vpop.permute.xlu1 %3835 }
0x1348   :  { %v3838_v20 = vsel %vm140_vm0, %v3832_v6, %v3836_v12  ;;  %v46_v6 = vld [vmem:[#allocation2 + $0x89] ss:$0 sm:$0xff] }
0x1349   :  { %v3840_v34 = vsel %vm142_vm1, %v3838_v20, 0 }
0x134a   :  { %v3866_v47 = vand.u32 4294901760, %v3840_v34 }
0x134c   :  { %v3867_v35 = vsub.f32 %v3840_v34, %v3866_v47  ;;  %3932 = vmatmul.f32.vlgmr.msrb.gmra.mxu1 %v3866_v47 }
0x134d   :  { %4278 = vmatpush.msrb.mxu1 %v4117_v11 }
0x134e   :  { %3970 = vmatmul.f32.vlgmr.msrb.gmra.mxu2 %v3867_v35  ;;  %v3868_v28 = vand.u32 4294901760, %v3867_v35 }
0x134f   :  { %4280 = vmatpush.msrb.mxu1 %v4119_v13  ;;  %4189 = vmatpush.msrb.mxu2 %v4147_v15 }
0x1350   :  { %4001 = vmatmul.f32.vlgmr.msrb.gmra.mxu3 %v3868_v28  ;;  %v3869_v24 = vsub.f32 %v3867_v35, %v3868_v28 }
0x1351   :  { %4282 = vmatpush.msrb.mxu1 %v4121_v23  ;;  %4192 = vmatpush.msrb.mxu2 %v4153_v45 }
0x1352   :  { %v3870_v5 = vand.u32 4294901760, %v3869_v24 }
0x1353   :  { %4284 = vmatpush.msrb.mxu1 %v4123_v17  ;;  %4195 = vmatpush.msrb.mxu2 %v4159_v32 }
0x1354   :  { %3871 = vmatmul.f32.vlgmr.msrb.gmra.mxu0 %v3870_v5  ;;  %4075 = vmatmul.f32.vlgmr.msra.gmra.mxu1 %v3866_v47 }
0x1355   :  { %4247 = vmatpush.msrb.mxu0 %v4148_v9  ;;  %4198 = vmatpush.msrb.mxu2 %v4165_v62 }
0x1357   :  { %4251 = vmatpush.msrb.mxu0 %v4154_v61 }
0x1359   :  { %4255 = vmatpush.msrb.mxu0 %v4160_v40 }
0x135b   :  { %4259 = vmatpush.msrb.mxu0 %v4166_v27 }
0x135c   :  { %4046 = vmatmul.f32.vlgmr.msra.gmra.mxu0 %v3866_v47 }
0x13c9   :  { %v3933_v42 = vpop.f32.mrf.mxu1 }
0x13d1   :  { %v3872_v22 = vpop.f32.mrf.mxu0  ;;  %v3971_v50 = vpop.f32.mrf.mxu2 }
0x13d2   :  { %v3934_v26 = vadd.f32 %v3933_v42, %v3872_v22  ;;  %v4076_v60 = vpop.f32.mrf.mxu1 }
0x13d3   :  { %v4002_v4 = vpop.f32.mrf.mxu3 }
0x13d4   :  { %v3972_v39 = vadd.f32 %v3971_v50, %v3934_v26 }
0x13d6   :  { %v4003_v14 = vadd.f32 %v4002_v4, %v3972_v39 }
0x13d9   :  { %v4047_v58 = vpop.f32.mrf.mxu0 }
0x13da   :  { %v4048_v59 = vadd.f32 %v4047_v58, %v4003_v14 }
0x13dc   :  { %v4077_v0 = vadd.f32 %v4076_v60, %v4048_v59 }
0x13de   :  { %v4079_v1 = vadd.f32 %v4373_v25, %v4077_v0  ;;  %v4156_v25 = vand.u32 4294901760, %v4155_v19 }
0x13e0   :  { %4364 = vtanh.f32 %v4079_v1  ;;  %4157 = vmatpush.msra.mxu3 %v4156_v25 }
0x13e2   :  { %4163 = vmatpush.msra.mxu3 %v4162_v56 }
0x13e6   :  { %v4365_v3 = vpop.eup %4364 }
0x13e7   :  { %4085 = vrot.lane.b32.xlu2 %v4365_v3, %s4404_s1  ;;  %v4081_v7 = vmul.f32 0.5, %v4365_v3 }
0x13e9   :  { %v4082_v8 = vadd.f32 0.5, %v4081_v7 }
0x13eb   :  { %v4083_v46 = vmul.f32 %v4082_v8, %v3802_v38  ;;  %v4167_v38 = vsub.f32 %v4165_v62, %v4166_v27 }
0x13ed   :  { %v4168_v36 = vand.u32 4294901760, %v4167_v38 }
0x13ef   :  { %4169 = vmatpush.msra.mxu3 %v4168_v36 }
0x13f1   :  { %4218 = vmatpush.msrb.mxu3 %v4117_v11 }
0x13f3   :  { %4220 = vmatpush.msrb.mxu3 %v4119_v13 }
0x13f5   :  { %4222 = vmatpush.msrb.mxu3 %v4121_v23 }
0x13f7   :  { %4224 = vmatpush.msrb.mxu3 %v4123_v17 }
0x1441   :  { %v4086_v10 = vpop.permute.xlu2 %4085 }
0x1442   :  { %v4088_v29 = vmul.f32 %v4086_v10, %v4082_v8 }
0x1444   :  { %4090 = vrot.lane.b32.xlu0 %v4088_v29, %s4405_s18 }
0x14b6   :  { %v4091_v49 = vpop.permute.xlu0 %4090 }
0x14b7   :  { %v4093_v51 = vadd.f32 %v4091_v49, %v4083_v46 }
0x14b9   :  { %4366 = vtanh.f32 %v4093_v51 }
0x14bf   :  { %v4367_v2 = vpop.eup %4366 }
0x14c0   :  { %4096 = vrot.lane.b32.xlu1 %v4367_v2, %s4404_s1 }
0x1532   :  { %v4097_v48 = vpop.permute.xlu1 %4096 }
0x1533   :  { %v4099_v43 = vmul.f32 %v4097_v48, %v4082_v8 }
0x1535   :  { %4101 = vrot.lane.b32.xlu2 %v4099_v43, %s4405_s18 }
0x158f   :  { %v4102_v30 = vpop.permute.xlu2 %4101 }
0x1590   :  { %v4103_v31 = vsel %vm140_vm0, %v4102_v30, 0 }
0x1591   :  { %v4125_v52 = vand.u32 4294901760, %v4103_v31 }
0x1593   :  { %v4126_v53 = vsub.f32 %v4103_v31, %v4125_v52  ;;  %4171 = vmatmul.f32.vlgmr.msra.gmra.mxu3 %v4125_v52  ;;  %4261 = vmatmul.f32.vlgmr.msrb.gmra.mxu0 %v4125_v52 }
0x1594   :  { %4286 = vmatmul.f32.vlgmr.msrb.gmra.mxu1 %v4125_v52 }
0x1595   :  { %v4127_v57 = vand.u32 4294901760, %v4126_v53 }
0x1597   :  { %v4128_v63 = vsub.f32 %v4126_v53, %v4127_v57 }
0x1599   :  { %v4129_v33 = vand.u32 4294901760, %v4128_v63 }
0x159b   :  { %4130 = vmatmul.f32.vlgmr.msra.gmra.mxu2 %v4129_v33  ;;  %4228 = vmatmul.f32.vlgmr.msrb.gmra.mxu3 %v4127_v57 }
0x15a3   :  { %4201 = vmatmul.f32.vlgmr.msrb.gmra.mxu2 %v4126_v53 }
0x1610   :  { %v4262_v5 = vpop.f32.mrf.mxu0 }
0x1611   :  { %v4287_v22 = vpop.f32.mrf.mxu1 }
0x1616   :  { %v4172_v16 = vpop.f32.mrf.mxu3 }
0x161e   :  { %v4131_v12 = vpop.f32.mrf.mxu2  ;;  %v4229_v28 = vpop.f32.mrf.mxu3 }
0x161f   :  { %v4132_v20 = vadd.f32 %v4131_v12, %v46_v6 }
0x1621   :  { %v4173_v34 = vadd.f32 %v4172_v16, %v4132_v20 }
0x1626   :  { %v4202_v47 = vpop.f32.mrf.mxu2 }
0x1627   :  { %v4203_v35 = vadd.f32 %v4202_v47, %v4173_v34 }
0x1629   :  { %v4230_v24 = vadd.f32 %v4229_v28, %v4203_v35 }
0x162b   :  { %v4263_v42 = vadd.f32 %v4262_v5, %v4230_v24 }
0x162d   :  { %v4288_v26 = vadd.f32 %v4287_v22, %v4263_v42 }
0x162f   :  { %4290 = vst [vmem:[%s5541_s2] sm:$0xff] %v4288_v26 }
0x1630   :  { %4295 = vsyncpa [#allocation3], 1 }

</bundles_post_ra>
